<compile_context>
chip_gen: v6e
topology: v6e:2x2x1
jax: 0.10.0
libtpu: 0.0.40
codegen_flags: <defaults>
</compile_context>

<pallas_src>
import functools

import jax
import jax.numpy as jnp
from jax.experimental import pallas as pl
from jax.experimental.pallas import tpu as pltpu


# ----------------------------------------------------------------------------
# Fused kernel: time-MLP + concat + length-padding + 6 conv blocks, all VMEM.
# ----------------------------------------------------------------------------
def _unet_fused_kernel(
    # inputs -----------------------------------------------------------------
    t_ref, x_ref,
    tw1_ref, tb1_ref, tw2_ref, tb2_ref, tw3_ref, tb3_ref,
    w0_ref, b0_ref, g0_ref, be0_ref,
    w1_ref, b1_ref, g1_ref, be1_ref,
    w2_ref, b2_ref, g2_ref, be2_ref,
    w3_ref, b3_ref, g3_ref, be3_ref,
    w4_ref, b4_ref, g4_ref, be4_ref,
    w5_ref, b5_ref,
    # outputs ----------------------------------------------------------------
    out_ref,
    # scratch ----------------------------------------------------------------
    buf_a, buf_b, patch_buf,
    *, B, L, channels):
  f32 = jnp.float32

  # ---- time MLP, evaluated transposed (features on sublanes, batch on lanes)
  #      so the output t_embT has shape (L, B) with L already on sublanes.
  t_row = t_ref[...]                                               # (1, B)
  h = jnp.maximum(tw1_ref[...] * t_row + tb1_ref[...], 0.0)        # (D, B)
  h = jnp.maximum(
      jnp.dot(tw2_ref[...], h, preferred_element_type=f32) + tb2_ref[...],
      0.0)                                                         # (D, B)
  t_embT = (jnp.dot(tw3_ref[...], h, preferred_element_type=f32)
            + tb3_ref[...])                                        # (L, B)

  # ---- zero the length-padded ping-pong activation buffers once; pad rows
  #      (0 and L+1) stay zero for every layer -> implicit Conv1d padding=1.
  buf_a[...] = jnp.zeros_like(buf_a)
  buf_b[...] = jnp.zeros_like(buf_b)

  # ---- h0 = concat([x, t_emb[..., None]], -1) written directly into the
  #      padded scratch (replaces the old wrapper-side concat + pad).
  cin0 = channels[0]
  buf_a[:, 1:L + 1, :cin0 - 1] = x_ref[...]
  for b in range(B):                       # B is tiny and static -> unrolled
    buf_a[b, 1:L + 1, cin0 - 1:cin0] = t_embT[:, b:b + 1]

  layer_params = (
      (w0_ref, b0_ref, g0_ref, be0_ref),
      (w1_ref, b1_ref, g1_ref, be1_ref),
      (w2_ref, b2_ref, g2_ref, be2_ref),
      (w3_ref, b3_ref, g3_ref, be3_ref),
      (w4_ref, b4_ref, g4_ref, be4_ref),
      (w5_ref, b5_ref, None, None),        # final conv: no ReLU / BatchNorm
  )

  src, dst = buf_a, buf_b
  n_layers = len(layer_params)
  for li, (w_ref, b_ref, g_ref, be_ref) in enumerate(layer_params):
    cin = channels[li]
    cout = channels[li + 1]
    last = li == n_layers - 1

    # im2col: three shifted length-windows of the zero-padded activation laid
    # side-by-side along channels -> one (B*L, 3*Cin) @ (3*Cin, Cout) matmul.
    for k in range(3):
      patch_buf[:, :, k * cin:(k + 1) * cin] = src[:, k:k + L, :cin]
    patches = patch_buf[:, :, :3 * cin].reshape(B * L, 3 * cin)

    acc = (jnp.dot(patches, w_ref[...], preferred_element_type=f32)
           + b_ref[...])                                           # (B*L, Cout)

    if not last:
      acc = jnp.maximum(acc, 0.0)                                  # ReLU
      # BatchNorm1d, training mode: biased batch stats over the B*L rows.
      mu = jnp.mean(acc, axis=0, keepdims=True)                    # (1, Cout)
      var = jnp.mean((acc - mu) * (acc - mu), axis=0, keepdims=True)
      acc = (acc - mu) * jax.lax.rsqrt(var + 1e-5)
      acc = acc * g_ref[...] + be_ref[...]
      dst[:, 1:L + 1, :cout] = acc.reshape(B, L, cout)
      src, dst = dst, src
    else:
      out_ref[...] = acc.reshape(B, L, cout)


# ----------------------------------------------------------------------------
# Wrapper around the single pallas_call
# ----------------------------------------------------------------------------
@jax.jit
def simple_unet_forward(params, x, t):
  # x: (B, traj_length, in_channels), t: (B,)
  B, L, cin_x = x.shape
  cin0 = cin_x + 1
  names = ("enc1", "enc2", "enc3", "dec1", "dec2", "dec3")
  channels = (cin0,) + tuple(params[n]["w"].shape[1] for n in names)
  cmax = max(channels[:-1])                       # widest activation (256)
  cout = channels[-1]

  conv_args = []
  for n in names[:-1]:
    p = params[n]
    conv_args += [p["w"], p["b"], p["gamma"], p["beta"]]
  conv_args += [params["dec3"]["w"], params["dec3"]["b"]]

  t_row = t.astype(jnp.float32).reshape(1, B)

  kernel = functools.partial(_unet_fused_kernel, B=B, L=L, channels=channels)
  return pl.pallas_call(
      kernel,
      out_shape=jax.ShapeDtypeStruct((B, L, cout), jnp.float32),
      scratch_shapes=[
          pltpu.VMEM((B, L + 2, cmax), jnp.float32),      # padded act (ping)
          pltpu.VMEM((B, L + 2, cmax), jnp.float32),      # padded act (pong)
          pltpu.VMEM((B, L, 3 * cmax), jnp.float32),      # im2col patches
      ],
  )(t_row, x.astype(jnp.float32),
    params["t_w1"], params["t_b1"], params["t_w2"], params["t_b2"],
    params["t_w3"], params["t_b3"], *conv_args)


# ----------------------------------------------------------------------------
# Parameter construction (deterministic, synthetic)
# ----------------------------------------------------------------------------
def init_params(key, in_channels=2, out_channels=2, time_dim=32, traj_length=16):
  keys = iter(jax.random.split(key, 32))

  def lin_t(din, dout):
    # time-MLP Linear stored transposed: w == W_torch (out, in), b as (out, 1)
    w = 0.05 * jax.random.normal(next(keys), (dout, din), jnp.float32)
    b = 0.01 * jax.random.normal(next(keys), (dout, 1), jnp.float32)
    return w, b

  def conv(cin, cout):
    # Conv1d weight im2col-flattened: w[k*cin + ci, co] == W_torch[co, ci, k]
    w = 0.05 * jax.random.normal(next(keys), (3 * cin, cout), jnp.float32)
    b = 0.01 * jax.random.normal(next(keys), (1, cout), jnp.float32)
    gamma = jnp.ones((1, cout), jnp.float32)
    beta = jnp.zeros((1, cout), jnp.float32)
    return dict(w=w, b=b, gamma=gamma, beta=beta)

  params = {}
  params["t_w1"], params["t_b1"] = lin_t(1, time_dim)
  params["t_w2"], params["t_b2"] = lin_t(time_dim, time_dim)
  params["t_w3"], params["t_b3"] = lin_t(time_dim, traj_length)
  params["enc1"] = conv(in_channels + 1, 64)
  params["enc2"] = conv(64, 128)
  params["enc3"] = conv(128, 256)
  params["dec1"] = conv(256, 128)
  params["dec2"] = conv(128, 64)
  params["dec3"] = conv(64, out_channels)
  return params


# ----------------------------------------------------------------------------
if __name__ == "__main__":
  B, L, CIN, COUT, TDIM = 2, 16, 2, 2, 32

  key = jax.random.PRNGKey(0)
  k_param, k_x, k_t = jax.random.split(key, 3)

  params = init_params(k_param, in_channels=CIN, out_channels=COUT,
                       time_dim=TDIM, traj_length=L)
  x = jax.random.normal(k_x, (B, L, CIN), jnp.float32)
  t = jax.random.randint(k_t, (B,), 0, 1000).astype(jnp.float32)

  out = simple_unet_forward(params, x, t)
  out = jax.block_until_ready(out)
  assert out.shape == (B, L, COUT), out.shape
  assert jnp.all(jnp.isfinite(out))
  print("KERNEL_OK")
</pallas_src>

<mosaic_0001>
module attributes {stable_mosaic.version = 11 : i64} {
  func.func @_unet_fused_kernel(%arg0: memref<1x2xf32, #tpu.memory_space<vmem>>, %arg1: memref<2x16x2xf32, #tpu.memory_space<vmem>>, %arg2: memref<32x1xf32, #tpu.memory_space<vmem>>, %arg3: memref<32x1xf32, #tpu.memory_space<vmem>>, %arg4: memref<32x32xf32, #tpu.memory_space<vmem>>, %arg5: memref<32x1xf32, #tpu.memory_space<vmem>>, %arg6: memref<16x32xf32, #tpu.memory_space<vmem>>, %arg7: memref<16x1xf32, #tpu.memory_space<vmem>>, %arg8: memref<9x64xf32, #tpu.memory_space<vmem>>, %arg9: memref<1x64xf32, #tpu.memory_space<vmem>>, %arg10: memref<1x64xf32, #tpu.memory_space<vmem>>, %arg11: memref<1x64xf32, #tpu.memory_space<vmem>>, %arg12: memref<192x128xf32, #tpu.memory_space<vmem>>, %arg13: memref<1x128xf32, #tpu.memory_space<vmem>>, %arg14: memref<1x128xf32, #tpu.memory_space<vmem>>, %arg15: memref<1x128xf32, #tpu.memory_space<vmem>>, %arg16: memref<384x256xf32, #tpu.memory_space<vmem>>, %arg17: memref<1x256xf32, #tpu.memory_space<vmem>>, %arg18: memref<1x256xf32, #tpu.memory_space<vmem>>, %arg19: memref<1x256xf32, #tpu.memory_space<vmem>>, %arg20: memref<768x128xf32, #tpu.memory_space<vmem>>, %arg21: memref<1x128xf32, #tpu.memory_space<vmem>>, %arg22: memref<1x128xf32, #tpu.memory_space<vmem>>, %arg23: memref<1x128xf32, #tpu.memory_space<vmem>>, %arg24: memref<384x64xf32, #tpu.memory_space<vmem>>, %arg25: memref<1x64xf32, #tpu.memory_space<vmem>>, %arg26: memref<1x64xf32, #tpu.memory_space<vmem>>, %arg27: memref<1x64xf32, #tpu.memory_space<vmem>>, %arg28: memref<192x2xf32, #tpu.memory_space<vmem>>, %arg29: memref<1x2xf32, #tpu.memory_space<vmem>>, %arg30: memref<2x16x2xf32, #tpu.memory_space<vmem>>, %arg31: memref<2x18x256xf32, #tpu.memory_space<vmem>>, %arg32: memref<2x18x256xf32, #tpu.memory_space<vmem>>, %arg33: memref<2x16x768xf32, #tpu.memory_space<vmem>>) attributes {dimension_semantics = [], scalar_prefetch = 0 : i64, scratch_operands = 3 : i64, tpu.core_type = #tpu.core_type<tc>} {
    %c0 = arith.constant 0 : index
    %c0_0 = arith.constant 0 : index
    %0 = vector.load %arg0[%c0, %c0_0] : memref<1x2xf32, #tpu.memory_space<vmem>>, vector<1x2xf32>
    %c0_1 = arith.constant 0 : index
    %c0_2 = arith.constant 0 : index
    %1 = vector.load %arg2[%c0_1, %c0_2] : memref<32x1xf32, #tpu.memory_space<vmem>>, vector<32x1xf32>
    %2 = vector.broadcast %1 : vector<32x1xf32> to vector<32x2xf32>
    %3 = vector.broadcast %0 : vector<1x2xf32> to vector<32x2xf32>
    %4 = arith.mulf %2, %3 : vector<32x2xf32>
    %c0_3 = arith.constant 0 : index
    %c0_4 = arith.constant 0 : index
    %5 = vector.load %arg3[%c0_3, %c0_4] : memref<32x1xf32, #tpu.memory_space<vmem>>, vector<32x1xf32>
    %6 = vector.broadcast %5 : vector<32x1xf32> to vector<32x2xf32>
    %7 = arith.addf %4, %6 : vector<32x2xf32>
    %cst = arith.constant 0.000000e+00 : f32
    %8 = vector.broadcast %cst : f32 to vector<32x2xf32>
    %9 = arith.maximumf %7, %8 : vector<32x2xf32>
    %c0_5 = arith.constant 0 : index
    %c0_6 = arith.constant 0 : index
    %10 = vector.load %arg4[%c0_5, %c0_6] : memref<32x32xf32, #tpu.memory_space<vmem>>, vector<32x32xf32>
    %cst_7 = arith.constant dense<0.000000e+00> : vector<32x2xf32>
    %11 = tpu.matmul %10, %9, %cst_7 {dimension_numbers = #tpu.dot_dimension_numbers<[1], [0], [0], [1], [0, 0, 1, 1], [], []>} : vector<32x32xf32>, vector<32x2xf32>, vector<32x2xf32> -> vector<32x2xf32>
    %c0_8 = arith.constant 0 : index
    %c0_9 = arith.constant 0 : index
    %12 = vector.load %arg5[%c0_8, %c0_9] : memref<32x1xf32, #tpu.memory_space<vmem>>, vector<32x1xf32>
    %13 = vector.broadcast %12 : vector<32x1xf32> to vector<32x2xf32>
    %14 = arith.addf %11, %13 : vector<32x2xf32>
    %cst_10 = arith.constant 0.000000e+00 : f32
    %15 = vector.broadcast %cst_10 : f32 to vector<32x2xf32>
    %16 = arith.maximumf %14, %15 : vector<32x2xf32>
    %c0_11 = arith.constant 0 : index
    %c0_12 = arith.constant 0 : index
    %17 = vector.load %arg6[%c0_11, %c0_12] : memref<16x32xf32, #tpu.memory_space<vmem>>, vector<16x32xf32>
    %cst_13 = arith.constant dense<0.000000e+00> : vector<16x2xf32>
    %18 = tpu.matmul %17, %16, %cst_13 {dimension_numbers = #tpu.dot_dimension_numbers<[1], [0], [0], [1], [0, 0, 1, 1], [], []>} : vector<16x32xf32>, vector<32x2xf32>, vector<16x2xf32> -> vector<16x2xf32>
    %c0_14 = arith.constant 0 : index
    %c0_15 = arith.constant 0 : index
    %19 = vector.load %arg7[%c0_14, %c0_15] : memref<16x1xf32, #tpu.memory_space<vmem>>, vector<16x1xf32>
    %20 = vector.broadcast %19 : vector<16x1xf32> to vector<16x2xf32>
    %21 = arith.addf %18, %20 : vector<16x2xf32>
    %cst_16 = arith.constant 0.000000e+00 : f32
    %22 = vector.broadcast %cst_16 : f32 to vector<2x18x256xf32>
    %c0_17 = arith.constant 0 : index
    %c0_18 = arith.constant 0 : index
    %c0_19 = arith.constant 0 : index
    %23 = vector.load %arg31[%c0_17, %c0_18, %c0_19] : memref<2x18x256xf32, #tpu.memory_space<vmem>>, vector<2x18x256xf32>
    tpu.vector_store %arg31[%c0_17, %c0_18, %c0_19], %22 {strides = array<i32>} : memref<2x18x256xf32, #tpu.memory_space<vmem>>, vector<2x18x256xf32>,
    %cst_20 = arith.constant 0.000000e+00 : f32
    %24 = vector.broadcast %cst_20 : f32 to vector<2x18x256xf32>
    %c0_21 = arith.constant 0 : index
    %c0_22 = arith.constant 0 : index
    %c0_23 = arith.constant 0 : index
    %25 = vector.load %arg32[%c0_21, %c0_22, %c0_23] : memref<2x18x256xf32, #tpu.memory_space<vmem>>, vector<2x18x256xf32>
    tpu.vector_store %arg32[%c0_21, %c0_22, %c0_23], %24 {strides = array<i32>} : memref<2x18x256xf32, #tpu.memory_space<vmem>>, vector<2x18x256xf32>,
    %c0_24 = arith.constant 0 : index
    %c0_25 = arith.constant 0 : index
    %c0_26 = arith.constant 0 : index
    %26 = vector.load %arg1[%c0_24, %c0_25, %c0_26] : memref<2x16x2xf32, #tpu.memory_space<vmem>>, vector<2x16x2xf32>
    %c0_27 = arith.constant 0 : index
    %c1 = arith.constant 1 : index
    %c0_28 = arith.constant 0 : index
    %27 = vector.load %arg31[%c0_27, %c1, %c0_28] : memref<2x18x256xf32, #tpu.memory_space<vmem>>, vector<2x16x2xf32>
    tpu.vector_store %arg31[%c0_27, %c1, %c0_28], %26 {strides = array<i32>} : memref<2x18x256xf32, #tpu.memory_space<vmem>>, vector<2x16x2xf32>,
    %28 = vector.extract_strided_slice %21 {offsets = [0, 0], sizes = [16, 1], strides = [1, 1]} : vector<16x2xf32> to vector<16x1xf32>
    %c0_29 = arith.constant 0 : index
    %c1_30 = arith.constant 1 : index
    %c2 = arith.constant 2 : index
    %29 = vector.load %arg31[%c0_29, %c1_30, %c2] : memref<2x18x256xf32, #tpu.memory_space<vmem>>, vector<1x16x1xf32>
    %30 = vector.shape_cast %29 : vector<1x16x1xf32> to vector<16x1xf32>
    %31 = vector.shape_cast %28 : vector<16x1xf32> to vector<1x16x1xf32>
    tpu.vector_store %arg31[%c0_29, %c1_30, %c2], %31 {strides = array<i32>} : memref<2x18x256xf32, #tpu.memory_space<vmem>>, vector<1x16x1xf32>,
    %32 = vector.extract_strided_slice %21 {offsets = [0, 1], sizes = [16, 1], strides = [1, 1]} : vector<16x2xf32> to vector<16x1xf32>
    %c1_31 = arith.constant 1 : index
    %c1_32 = arith.constant 1 : index
    %c2_33 = arith.constant 2 : index
    %33 = vector.load %arg31[%c1_31, %c1_32, %c2_33] : memref<2x18x256xf32, #tpu.memory_space<vmem>>, vector<1x16x1xf32>
    %34 = vector.shape_cast %33 : vector<1x16x1xf32> to vector<16x1xf32>
    %35 = vector.shape_cast %32 : vector<16x1xf32> to vector<1x16x1xf32>
    tpu.vector_store %arg31[%c1_31, %c1_32, %c2_33], %35 {strides = array<i32>} : memref<2x18x256xf32, #tpu.memory_space<vmem>>, vector<1x16x1xf32>,
    %c0_34 = arith.constant 0 : index
    %c0_35 = arith.constant 0 : index
    %c0_36 = arith.constant 0 : index
    %36 = vector.load %arg31[%c0_34, %c0_35, %c0_36] : memref<2x18x256xf32, #tpu.memory_space<vmem>>, vector<2x16x3xf32>
    %c0_37 = arith.constant 0 : index
    %c0_38 = arith.constant 0 : index
    %c0_39 = arith.constant 0 : index
    %37 = vector.load %arg33[%c0_37, %c0_38, %c0_39] : memref<2x16x768xf32, #tpu.memory_space<vmem>>, vector<2x16x3xf32>
    tpu.vector_store %arg33[%c0_37, %c0_38, %c0_39], %36 {strides = array<i32>} : memref<2x16x768xf32, #tpu.memory_space<vmem>>, vector<2x16x3xf32>,
    %c0_40 = arith.constant 0 : index
    %c1_41 = arith.constant 1 : index
    %c0_42 = arith.constant 0 : index
    %38 = vector.load %arg31[%c0_40, %c1_41, %c0_42] : memref<2x18x256xf32, #tpu.memory_space<vmem>>, vector<2x16x3xf32>
    %c0_43 = arith.constant 0 : index
    %c0_44 = arith.constant 0 : index
    %c3 = arith.constant 3 : index
    %39 = vector.load %arg33[%c0_43, %c0_44, %c3] : memref<2x16x768xf32, #tpu.memory_space<vmem>>, vector<2x16x3xf32>
    tpu.vector_store %arg33[%c0_43, %c0_44, %c3], %38 {strides = array<i32>} : memref<2x16x768xf32, #tpu.memory_space<vmem>>, vector<2x16x3xf32>,
    %c0_45 = arith.constant 0 : index
    %c2_46 = arith.constant 2 : index
    %c0_47 = arith.constant 0 : index
    %40 = vector.load %arg31[%c0_45, %c2_46, %c0_47] : memref<2x18x256xf32, #tpu.memory_space<vmem>>, vector<2x16x3xf32>
    %c0_48 = arith.constant 0 : index
    %c0_49 = arith.constant 0 : index
    %c6 = arith.constant 6 : index
    %41 = vector.load %arg33[%c0_48, %c0_49, %c6] : memref<2x16x768xf32, #tpu.memory_space<vmem>>, vector<2x16x3xf32>
    tpu.vector_store %arg33[%c0_48, %c0_49, %c6], %40 {strides = array<i32>} : memref<2x16x768xf32, #tpu.memory_space<vmem>>, vector<2x16x3xf32>,
    %c0_50 = arith.constant 0 : index
    %c0_51 = arith.constant 0 : index
    %c0_52 = arith.constant 0 : index
    %42 = vector.load %arg33[%c0_50, %c0_51, %c0_52] : memref<2x16x768xf32, #tpu.memory_space<vmem>>, vector<2x16x9xf32>
    %43 = vector.shape_cast %42 : vector<2x16x9xf32> to vector<32x9xf32>
    %c0_53 = arith.constant 0 : index
    %c0_54 = arith.constant 0 : index
    %44 = vector.load %arg8[%c0_53, %c0_54] : memref<9x64xf32, #tpu.memory_space<vmem>>, vector<9x64xf32>
    %cst_55 = arith.constant dense<0.000000e+00> : vector<32x64xf32>
    %45 = tpu.matmul %43, %44, %cst_55 {dimension_numbers = #tpu.dot_dimension_numbers<[1], [0], [0], [1], [0, 0, 1, 1], [], []>} : vector<32x9xf32>, vector<9x64xf32>, vector<32x64xf32> -> vector<32x64xf32>
    %c0_56 = arith.constant 0 : index
    %c0_57 = arith.constant 0 : index
    %46 = vector.load %arg9[%c0_56, %c0_57] : memref<1x64xf32, #tpu.memory_space<vmem>>, vector<1x64xf32>
    %47 = vector.broadcast %46 : vector<1x64xf32> to vector<32x64xf32>
    %48 = arith.addf %45, %47 : vector<32x64xf32>
    %cst_58 = arith.constant 0.000000e+00 : f32
    %49 = vector.broadcast %cst_58 : f32 to vector<32x64xf32>
    %50 = arith.maximumf %48, %49 : vector<32x64xf32>
    %cst_59 = arith.constant dense<0.000000e+00> : vector<64xf32>
    %51 = vector.multi_reduction <add>, %50, %cst_59 [0] : vector<32x64xf32> to vector<64xf32>
    %52 = vector.shape_cast %51 : vector<64xf32> to vector<1x64xf32>
    %cst_60 = arith.constant 3.200000e+01 : f32
    %53 = vector.broadcast %cst_60 : f32 to vector<1x64xf32>
    %54 = arith.divf %52, %53 : vector<1x64xf32>
    %55 = vector.broadcast %54 : vector<1x64xf32> to vector<32x64xf32>
    %56 = arith.subf %50, %55 : vector<32x64xf32>
    %57 = vector.broadcast %54 : vector<1x64xf32> to vector<32x64xf32>
    %58 = arith.subf %50, %57 : vector<32x64xf32>
    %59 = arith.mulf %56, %58 : vector<32x64xf32>
    %cst_61 = arith.constant dense<0.000000e+00> : vector<64xf32>
    %60 = vector.multi_reduction <add>, %59, %cst_61 [0] : vector<32x64xf32> to vector<64xf32>
    %61 = vector.shape_cast %60 : vector<64xf32> to vector<1x64xf32>
    %cst_62 = arith.constant 3.200000e+01 : f32
    %62 = vector.broadcast %cst_62 : f32 to vector<1x64xf32>
    %63 = arith.divf %61, %62 : vector<1x64xf32>
    %64 = vector.broadcast %54 : vector<1x64xf32> to vector<32x64xf32>
    %65 = arith.subf %50, %64 : vector<32x64xf32>
    %cst_63 = arith.constant 9.99999974E-6 : f32
    %66 = vector.broadcast %cst_63 : f32 to vector<1x64xf32>
    %67 = arith.addf %63, %66 : vector<1x64xf32>
    %68 = math.rsqrt %67 : vector<1x64xf32>
    %69 = vector.broadcast %68 : vector<1x64xf32> to vector<32x64xf32>
    %70 = arith.mulf %65, %69 : vector<32x64xf32>
    %c0_64 = arith.constant 0 : index
    %c0_65 = arith.constant 0 : index
    %71 = vector.load %arg10[%c0_64, %c0_65] : memref<1x64xf32, #tpu.memory_space<vmem>>, vector<1x64xf32>
    %72 = vector.broadcast %71 : vector<1x64xf32> to vector<32x64xf32>
    %73 = arith.mulf %70, %72 : vector<32x64xf32>
    %c0_66 = arith.constant 0 : index
    %c0_67 = arith.constant 0 : index
    %74 = vector.load %arg11[%c0_66, %c0_67] : memref<1x64xf32, #tpu.memory_space<vmem>>, vector<1x64xf32>
    %75 = vector.broadcast %74 : vector<1x64xf32> to vector<32x64xf32>
    %76 = arith.addf %73, %75 : vector<32x64xf32>
    %77 = vector.shape_cast %76 : vector<32x64xf32> to vector<2x16x64xf32>
    %c0_68 = arith.constant 0 : index
    %c1_69 = arith.constant 1 : index
    %c0_70 = arith.constant 0 : index
    %78 = vector.load %arg32[%c0_68, %c1_69, %c0_70] : memref<2x18x256xf32, #tpu.memory_space<vmem>>, vector<2x16x64xf32>
    tpu.vector_store %arg32[%c0_68, %c1_69, %c0_70], %77 {strides = array<i32>} : memref<2x18x256xf32, #tpu.memory_space<vmem>>, vector<2x16x64xf32>,
    %c0_71 = arith.constant 0 : index
    %c0_72 = arith.constant 0 : index
    %c0_73 = arith.constant 0 : index
    %79 = vector.load %arg32[%c0_71, %c0_72, %c0_73] : memref<2x18x256xf32, #tpu.memory_space<vmem>>, vector<2x16x64xf32>
    %c0_74 = arith.constant 0 : index
    %c0_75 = arith.constant 0 : index
    %c0_76 = arith.constant 0 : index
    %80 = vector.load %arg33[%c0_74, %c0_75, %c0_76] : memref<2x16x768xf32, #tpu.memory_space<vmem>>, vector<2x16x64xf32>
    tpu.vector_store %arg33[%c0_74, %c0_75, %c0_76], %79 {strides = array<i32>} : memref<2x16x768xf32, #tpu.memory_space<vmem>>, vector<2x16x64xf32>,
    %c0_77 = arith.constant 0 : index
    %c1_78 = arith.constant 1 : index
    %c0_79 = arith.constant 0 : index
    %81 = vector.load %arg32[%c0_77, %c1_78, %c0_79] : memref<2x18x256xf32, #tpu.memory_space<vmem>>, vector<2x16x64xf32>
    %c0_80 = arith.constant 0 : index
    %c0_81 = arith.constant 0 : index
    %c64 = arith.constant 64 : index
    %82 = vector.load %arg33[%c0_80, %c0_81, %c64] : memref<2x16x768xf32, #tpu.memory_space<vmem>>, vector<2x16x64xf32>
    tpu.vector_store %arg33[%c0_80, %c0_81, %c64], %81 {strides = array<i32>} : memref<2x16x768xf32, #tpu.memory_space<vmem>>, vector<2x16x64xf32>,
    %c0_82 = arith.constant 0 : index
    %c2_83 = arith.constant 2 : index
    %c0_84 = arith.constant 0 : index
    %83 = vector.load %arg32[%c0_82, %c2_83, %c0_84] : memref<2x18x256xf32, #tpu.memory_space<vmem>>, vector<2x16x64xf32>
    %c0_85 = arith.constant 0 : index
    %c0_86 = arith.constant 0 : index
    %c128 = arith.constant 128 : index
    %84 = vector.load %arg33[%c0_85, %c0_86, %c128] : memref<2x16x768xf32, #tpu.memory_space<vmem>>, vector<2x16x64xf32>
    tpu.vector_store %arg33[%c0_85, %c0_86, %c128], %83 {strides = array<i32>} : memref<2x16x768xf32, #tpu.memory_space<vmem>>, vector<2x16x64xf32>,
    %c0_87 = arith.constant 0 : index
    %c0_88 = arith.constant 0 : index
    %c0_89 = arith.constant 0 : index
    %85 = vector.load %arg33[%c0_87, %c0_88, %c0_89] : memref<2x16x768xf32, #tpu.memory_space<vmem>>, vector<2x16x192xf32>
    %86 = vector.shape_cast %85 : vector<2x16x192xf32> to vector<32x192xf32>
    %c0_90 = arith.constant 0 : index
    %c0_91 = arith.constant 0 : index
    %87 = vector.load %arg12[%c0_90, %c0_91] : memref<192x128xf32, #tpu.memory_space<vmem>>, vector<192x128xf32>
    %cst_92 = arith.constant dense<0.000000e+00> : vector<32x128xf32>
    %88 = tpu.matmul %86, %87, %cst_92 {dimension_numbers = #tpu.dot_dimension_numbers<[1], [0], [0], [1], [0, 0, 1, 1], [], []>} : vector<32x192xf32>, vector<192x128xf32>, vector<32x128xf32> -> vector<32x128xf32>
    %c0_93 = arith.constant 0 : index
    %c0_94 = arith.constant 0 : index
    %89 = vector.load %arg13[%c0_93, %c0_94] : memref<1x128xf32, #tpu.memory_space<vmem>>, vector<1x128xf32>
    %90 = vector.broadcast %89 : vector<1x128xf32> to vector<32x128xf32>
    %91 = arith.addf %88, %90 : vector<32x128xf32>
    %cst_95 = arith.constant 0.000000e+00 : f32
    %92 = vector.broadcast %cst_95 : f32 to vector<32x128xf32>
    %93 = arith.maximumf %91, %92 : vector<32x128xf32>
    %cst_96 = arith.constant dense<0.000000e+00> : vector<128xf32>
    %94 = vector.multi_reduction <add>, %93, %cst_96 [0] : vector<32x128xf32> to vector<128xf32>
    %95 = vector.shape_cast %94 : vector<128xf32> to vector<1x128xf32>
    %cst_97 = arith.constant 3.200000e+01 : f32
    %96 = vector.broadcast %cst_97 : f32 to vector<1x128xf32>
    %97 = arith.divf %95, %96 : vector<1x128xf32>
    %98 = vector.broadcast %97 : vector<1x128xf32> to vector<32x128xf32>
    %99 = arith.subf %93, %98 : vector<32x128xf32>
    %100 = vector.broadcast %97 : vector<1x128xf32> to vector<32x128xf32>
    %101 = arith.subf %93, %100 : vector<32x128xf32>
    %102 = arith.mulf %99, %101 : vector<32x128xf32>
    %cst_98 = arith.constant dense<0.000000e+00> : vector<128xf32>
    %103 = vector.multi_reduction <add>, %102, %cst_98 [0] : vector<32x128xf32> to vector<128xf32>
    %104 = vector.shape_cast %103 : vector<128xf32> to vector<1x128xf32>
    %cst_99 = arith.constant 3.200000e+01 : f32
    %105 = vector.broadcast %cst_99 : f32 to vector<1x128xf32>
    %106 = arith.divf %104, %105 : vector<1x128xf32>
    %107 = vector.broadcast %97 : vector<1x128xf32> to vector<32x128xf32>
    %108 = arith.subf %93, %107 : vector<32x128xf32>
    %cst_100 = arith.constant 9.99999974E-6 : f32
    %109 = vector.broadcast %cst_100 : f32 to vector<1x128xf32>
    %110 = arith.addf %106, %109 : vector<1x128xf32>
    %111 = math.rsqrt %110 : vector<1x128xf32>
    %112 = vector.broadcast %111 : vector<1x128xf32> to vector<32x128xf32>
    %113 = arith.mulf %108, %112 : vector<32x128xf32>
    %c0_101 = arith.constant 0 : index
    %c0_102 = arith.constant 0 : index
    %114 = vector.load %arg14[%c0_101, %c0_102] : memref<1x128xf32, #tpu.memory_space<vmem>>, vector<1x128xf32>
    %115 = vector.broadcast %114 : vector<1x128xf32> to vector<32x128xf32>
    %116 = arith.mulf %113, %115 : vector<32x128xf32>
    %c0_103 = arith.constant 0 : index
    %c0_104 = arith.constant 0 : index
    %117 = vector.load %arg15[%c0_103, %c0_104] : memref<1x128xf32, #tpu.memory_space<vmem>>, vector<1x128xf32>
    %118 = vector.broadcast %117 : vector<1x128xf32> to vector<32x128xf32>
    %119 = arith.addf %116, %118 : vector<32x128xf32>
    %120 = vector.shape_cast %119 : vector<32x128xf32> to vector<2x16x128xf32>
    %c0_105 = arith.constant 0 : index
    %c1_106 = arith.constant 1 : index
    %c0_107 = arith.constant 0 : index
    %121 = vector.load %arg31[%c0_105, %c1_106, %c0_107] : memref<2x18x256xf32, #tpu.memory_space<vmem>>, vector<2x16x128xf32>
    tpu.vector_store %arg31[%c0_105, %c1_106, %c0_107], %120 {strides = array<i32>} : memref<2x18x256xf32, #tpu.memory_space<vmem>>, vector<2x16x128xf32>,
    %c0_108 = arith.constant 0 : index
    %c0_109 = arith.constant 0 : index
    %c0_110 = arith.constant 0 : index
    %122 = vector.load %arg31[%c0_108, %c0_109, %c0_110] : memref<2x18x256xf32, #tpu.memory_space<vmem>>, vector<2x16x128xf32>
    %c0_111 = arith.constant 0 : index
    %c0_112 = arith.constant 0 : index
    %c0_113 = arith.constant 0 : index
    %123 = vector.load %arg33[%c0_111, %c0_112, %c0_113] : memref<2x16x768xf32, #tpu.memory_space<vmem>>, vector<2x16x128xf32>
    tpu.vector_store %arg33[%c0_111, %c0_112, %c0_113], %122 {strides = array<i32>} : memref<2x16x768xf32, #tpu.memory_space<vmem>>, vector<2x16x128xf32>,
    %c0_114 = arith.constant 0 : index
    %c1_115 = arith.constant 1 : index
    %c0_116 = arith.constant 0 : index
    %124 = vector.load %arg31[%c0_114, %c1_115, %c0_116] : memref<2x18x256xf32, #tpu.memory_space<vmem>>, vector<2x16x128xf32>
    %c0_117 = arith.constant 0 : index
    %c0_118 = arith.constant 0 : index
    %c128_119 = arith.constant 128 : index
    %125 = vector.load %arg33[%c0_117, %c0_118, %c128_119] : memref<2x16x768xf32, #tpu.memory_space<vmem>>, vector<2x16x128xf32>
    tpu.vector_store %arg33[%c0_117, %c0_118, %c128_119], %124 {strides = array<i32>} : memref<2x16x768xf32, #tpu.memory_space<vmem>>, vector<2x16x128xf32>,
    %c0_120 = arith.constant 0 : index
    %c2_121 = arith.constant 2 : index
    %c0_122 = arith.constant 0 : index
    %126 = vector.load %arg31[%c0_120, %c2_121, %c0_122] : memref<2x18x256xf32, #tpu.memory_space<vmem>>, vector<2x16x128xf32>
    %c0_123 = arith.constant 0 : index
    %c0_124 = arith.constant 0 : index
    %c256 = arith.constant 256 : index
    %127 = vector.load %arg33[%c0_123, %c0_124, %c256] : memref<2x16x768xf32, #tpu.memory_space<vmem>>, vector<2x16x128xf32>
    tpu.vector_store %arg33[%c0_123, %c0_124, %c256], %126 {strides = array<i32>} : memref<2x16x768xf32, #tpu.memory_space<vmem>>, vector<2x16x128xf32>,
    %c0_125 = arith.constant 0 : index
    %c0_126 = arith.constant 0 : index
    %c0_127 = arith.constant 0 : index
    %128 = vector.load %arg33[%c0_125, %c0_126, %c0_127] : memref<2x16x768xf32, #tpu.memory_space<vmem>>, vector<2x16x384xf32>
    %129 = vector.shape_cast %128 : vector<2x16x384xf32> to vector<32x384xf32>
    %c0_128 = arith.constant 0 : index
    %c0_129 = arith.constant 0 : index
    %130 = vector.load %arg16[%c0_128, %c0_129] : memref<384x256xf32, #tpu.memory_space<vmem>>, vector<384x256xf32>
    %cst_130 = arith.constant dense<0.000000e+00> : vector<32x256xf32>
    %131 = tpu.matmul %129, %130, %cst_130 {dimension_numbers = #tpu.dot_dimension_numbers<[1], [0], [0], [1], [0, 0, 1, 1], [], []>} : vector<32x384xf32>, vector<384x256xf32>, vector<32x256xf32> -> vector<32x256xf32>
    %c0_131 = arith.constant 0 : index
    %c0_132 = arith.constant 0 : index
    %132 = vector.load %arg17[%c0_131, %c0_132] : memref<1x256xf32, #tpu.memory_space<vmem>>, vector<1x256xf32>
    %133 = vector.broadcast %132 : vector<1x256xf32> to vector<32x256xf32>
    %134 = arith.addf %131, %133 : vector<32x256xf32>
    %cst_133 = arith.constant 0.000000e+00 : f32
    %135 = vector.broadcast %cst_133 : f32 to vector<32x256xf32>
    %136 = arith.maximumf %134, %135 : vector<32x256xf32>
    %cst_134 = arith.constant dense<0.000000e+00> : vector<256xf32>
    %137 = vector.multi_reduction <add>, %136, %cst_134 [0] : vector<32x256xf32> to vector<256xf32>
    %138 = vector.shape_cast %137 : vector<256xf32> to vector<1x256xf32>
    %cst_135 = arith.constant 3.200000e+01 : f32
    %139 = vector.broadcast %cst_135 : f32 to vector<1x256xf32>
    %140 = arith.divf %138, %139 : vector<1x256xf32>
    %141 = vector.broadcast %140 : vector<1x256xf32> to vector<32x256xf32>
    %142 = arith.subf %136, %141 : vector<32x256xf32>
    %143 = vector.broadcast %140 : vector<1x256xf32> to vector<32x256xf32>
    %144 = arith.subf %136, %143 : vector<32x256xf32>
    %145 = arith.mulf %142, %144 : vector<32x256xf32>
    %cst_136 = arith.constant dense<0.000000e+00> : vector<256xf32>
    %146 = vector.multi_reduction <add>, %145, %cst_136 [0] : vector<32x256xf32> to vector<256xf32>
    %147 = vector.shape_cast %146 : vector<256xf32> to vector<1x256xf32>
    %cst_137 = arith.constant 3.200000e+01 : f32
    %148 = vector.broadcast %cst_137 : f32 to vector<1x256xf32>
    %149 = arith.divf %147, %148 : vector<1x256xf32>
    %150 = vector.broadcast %140 : vector<1x256xf32> to vector<32x256xf32>
    %151 = arith.subf %136, %150 : vector<32x256xf32>
    %cst_138 = arith.constant 9.99999974E-6 : f32
    %152 = vector.broadcast %cst_138 : f32 to vector<1x256xf32>
    %153 = arith.addf %149, %152 : vector<1x256xf32>
    %154 = math.rsqrt %153 : vector<1x256xf32>
    %155 = vector.broadcast %154 : vector<1x256xf32> to vector<32x256xf32>
    %156 = arith.mulf %151, %155 : vector<32x256xf32>
    %c0_139 = arith.constant 0 : index
    %c0_140 = arith.constant 0 : index
    %157 = vector.load %arg18[%c0_139, %c0_140] : memref<1x256xf32, #tpu.memory_space<vmem>>, vector<1x256xf32>
    %158 = vector.broadcast %157 : vector<1x256xf32> to vector<32x256xf32>
    %159 = arith.mulf %156, %158 : vector<32x256xf32>
    %c0_141 = arith.constant 0 : index
    %c0_142 = arith.constant 0 : index
    %160 = vector.load %arg19[%c0_141, %c0_142] : memref<1x256xf32, #tpu.memory_space<vmem>>, vector<1x256xf32>
    %161 = vector.broadcast %160 : vector<1x256xf32> to vector<32x256xf32>
    %162 = arith.addf %159, %161 : vector<32x256xf32>
    %163 = vector.shape_cast %162 : vector<32x256xf32> to vector<2x16x256xf32>
    %c0_143 = arith.constant 0 : index
    %c1_144 = arith.constant 1 : index
    %c0_145 = arith.constant 0 : index
    %164 = vector.load %arg32[%c0_143, %c1_144, %c0_145] : memref<2x18x256xf32, #tpu.memory_space<vmem>>, vector<2x16x256xf32>
    tpu.vector_store %arg32[%c0_143, %c1_144, %c0_145], %163 {strides = array<i32>} : memref<2x18x256xf32, #tpu.memory_space<vmem>>, vector<2x16x256xf32>,
    %c0_146 = arith.constant 0 : index
    %c0_147 = arith.constant 0 : index
    %c0_148 = arith.constant 0 : index
    %165 = vector.load %arg32[%c0_146, %c0_147, %c0_148] : memref<2x18x256xf32, #tpu.memory_space<vmem>>, vector<2x16x256xf32>
    %c0_149 = arith.constant 0 : index
    %c0_150 = arith.constant 0 : index
    %c0_151 = arith.constant 0 : index
    %166 = vector.load %arg33[%c0_149, %c0_150, %c0_151] : memref<2x16x768xf32, #tpu.memory_space<vmem>>, vector<2x16x256xf32>
    tpu.vector_store %arg33[%c0_149, %c0_150, %c0_151], %165 {strides = array<i32>} : memref<2x16x768xf32, #tpu.memory_space<vmem>>, vector<2x16x256xf32>,
    %c0_152 = arith.constant 0 : index
    %c1_153 = arith.constant 1 : index
    %c0_154 = arith.constant 0 : index
    %167 = vector.load %arg32[%c0_152, %c1_153, %c0_154] : memref<2x18x256xf32, #tpu.memory_space<vmem>>, vector<2x16x256xf32>
    %c0_155 = arith.constant 0 : index
    %c0_156 = arith.constant 0 : index
    %c256_157 = arith.constant 256 : index
    %168 = vector.load %arg33[%c0_155, %c0_156, %c256_157] : memref<2x16x768xf32, #tpu.memory_space<vmem>>, vector<2x16x256xf32>
    tpu.vector_store %arg33[%c0_155, %c0_156, %c256_157], %167 {strides = array<i32>} : memref<2x16x768xf32, #tpu.memory_space<vmem>>, vector<2x16x256xf32>,
    %c0_158 = arith.constant 0 : index
    %c2_159 = arith.constant 2 : index
    %c0_160 = arith.constant 0 : index
    %169 = vector.load %arg32[%c0_158, %c2_159, %c0_160] : memref<2x18x256xf32, #tpu.memory_space<vmem>>, vector<2x16x256xf32>
    %c0_161 = arith.constant 0 : index
    %c0_162 = arith.constant 0 : index
    %c512 = arith.constant 512 : index
    %170 = vector.load %arg33[%c0_161, %c0_162, %c512] : memref<2x16x768xf32, #tpu.memory_space<vmem>>, vector<2x16x256xf32>
    tpu.vector_store %arg33[%c0_161, %c0_162, %c512], %169 {strides = array<i32>} : memref<2x16x768xf32, #tpu.memory_space<vmem>>, vector<2x16x256xf32>,
    %c0_163 = arith.constant 0 : index
    %c0_164 = arith.constant 0 : index
    %c0_165 = arith.constant 0 : index
    %171 = vector.load %arg33[%c0_163, %c0_164, %c0_165] : memref<2x16x768xf32, #tpu.memory_space<vmem>>, vector<2x16x768xf32>
    %172 = vector.shape_cast %171 : vector<2x16x768xf32> to vector<32x768xf32>
    %c0_166 = arith.constant 0 : index
    %c0_167 = arith.constant 0 : index
    %173 = vector.load %arg20[%c0_166, %c0_167] : memref<768x128xf32, #tpu.memory_space<vmem>>, vector<768x128xf32>
    %cst_168 = arith.constant dense<0.000000e+00> : vector<32x128xf32>
    %174 = tpu.matmul %172, %173, %cst_168 {dimension_numbers = #tpu.dot_dimension_numbers<[1], [0], [0], [1], [0, 0, 1, 1], [], []>} : vector<32x768xf32>, vector<768x128xf32>, vector<32x128xf32> -> vector<32x128xf32>
    %c0_169 = arith.constant 0 : index
    %c0_170 = arith.constant 0 : index
    %175 = vector.load %arg21[%c0_169, %c0_170] : memref<1x128xf32, #tpu.memory_space<vmem>>, vector<1x128xf32>
    %176 = vector.broadcast %175 : vector<1x128xf32> to vector<32x128xf32>
    %177 = arith.addf %174, %176 : vector<32x128xf32>
    %cst_171 = arith.constant 0.000000e+00 : f32
    %178 = vector.broadcast %cst_171 : f32 to vector<32x128xf32>
    %179 = arith.maximumf %177, %178 : vector<32x128xf32>
    %cst_172 = arith.constant dense<0.000000e+00> : vector<128xf32>
    %180 = vector.multi_reduction <add>, %179, %cst_172 [0] : vector<32x128xf32> to vector<128xf32>
    %181 = vector.shape_cast %180 : vector<128xf32> to vector<1x128xf32>
    %cst_173 = arith.constant 3.200000e+01 : f32
    %182 = vector.broadcast %cst_173 : f32 to vector<1x128xf32>
    %183 = arith.divf %181, %182 : vector<1x128xf32>
    %184 = vector.broadcast %183 : vector<1x128xf32> to vector<32x128xf32>
    %185 = arith.subf %179, %184 : vector<32x128xf32>
    %186 = vector.broadcast %183 : vector<1x128xf32> to vector<32x128xf32>
    %187 = arith.subf %179, %186 : vector<32x128xf32>
    %188 = arith.mulf %185, %187 : vector<32x128xf32>
    %cst_174 = arith.constant dense<0.000000e+00> : vector<128xf32>
    %189 = vector.multi_reduction <add>, %188, %cst_174 [0] : vector<32x128xf32> to vector<128xf32>
    %190 = vector.shape_cast %189 : vector<128xf32> to vector<1x128xf32>
    %cst_175 = arith.constant 3.200000e+01 : f32
    %191 = vector.broadcast %cst_175 : f32 to vector<1x128xf32>
    %192 = arith.divf %190, %191 : vector<1x128xf32>
    %193 = vector.broadcast %183 : vector<1x128xf32> to vector<32x128xf32>
    %194 = arith.subf %179, %193 : vector<32x128xf32>
    %cst_176 = arith.constant 9.99999974E-6 : f32
    %195 = vector.broadcast %cst_176 : f32 to vector<1x128xf32>
    %196 = arith.addf %192, %195 : vector<1x128xf32>
    %197 = math.rsqrt %196 : vector<1x128xf32>
    %198 = vector.broadcast %197 : vector<1x128xf32> to vector<32x128xf32>
    %199 = arith.mulf %194, %198 : vector<32x128xf32>
    %c0_177 = arith.constant 0 : index
    %c0_178 = arith.constant 0 : index
    %200 = vector.load %arg22[%c0_177, %c0_178] : memref<1x128xf32, #tpu.memory_space<vmem>>, vector<1x128xf32>
    %201 = vector.broadcast %200 : vector<1x128xf32> to vector<32x128xf32>
    %202 = arith.mulf %199, %201 : vector<32x128xf32>
    %c0_179 = arith.constant 0 : index
    %c0_180 = arith.constant 0 : index
    %203 = vector.load %arg23[%c0_179, %c0_180] : memref<1x128xf32, #tpu.memory_space<vmem>>, vector<1x128xf32>
    %204 = vector.broadcast %203 : vector<1x128xf32> to vector<32x128xf32>
    %205 = arith.addf %202, %204 : vector<32x128xf32>
    %206 = vector.shape_cast %205 : vector<32x128xf32> to vector<2x16x128xf32>
    %c0_181 = arith.constant 0 : index
    %c1_182 = arith.constant 1 : index
    %c0_183 = arith.constant 0 : index
    %207 = vector.load %arg31[%c0_181, %c1_182, %c0_183] : memref<2x18x256xf32, #tpu.memory_space<vmem>>, vector<2x16x128xf32>
    tpu.vector_store %arg31[%c0_181, %c1_182, %c0_183], %206 {strides = array<i32>} : memref<2x18x256xf32, #tpu.memory_space<vmem>>, vector<2x16x128xf32>,
    %c0_184 = arith.constant 0 : index
    %c0_185 = arith.constant 0 : index
    %c0_186 = arith.constant 0 : index
    %208 = vector.load %arg31[%c0_184, %c0_185, %c0_186] : memref<2x18x256xf32, #tpu.memory_space<vmem>>, vector<2x16x128xf32>
    %c0_187 = arith.constant 0 : index
    %c0_188 = arith.constant 0 : index
    %c0_189 = arith.constant 0 : index
    %209 = vector.load %arg33[%c0_187, %c0_188, %c0_189] : memref<2x16x768xf32, #tpu.memory_space<vmem>>, vector<2x16x128xf32>
    tpu.vector_store %arg33[%c0_187, %c0_188, %c0_189], %208 {strides = array<i32>} : memref<2x16x768xf32, #tpu.memory_space<vmem>>, vector<2x16x128xf32>,
    %c0_190 = arith.constant 0 : index
    %c1_191 = arith.constant 1 : index
    %c0_192 = arith.constant 0 : index
    %210 = vector.load %arg31[%c0_190, %c1_191, %c0_192] : memref<2x18x256xf32, #tpu.memory_space<vmem>>, vector<2x16x128xf32>
    %c0_193 = arith.constant 0 : index
    %c0_194 = arith.constant 0 : index
    %c128_195 = arith.constant 128 : index
    %211 = vector.load %arg33[%c0_193, %c0_194, %c128_195] : memref<2x16x768xf32, #tpu.memory_space<vmem>>, vector<2x16x128xf32>
    tpu.vector_store %arg33[%c0_193, %c0_194, %c128_195], %210 {strides = array<i32>} : memref<2x16x768xf32, #tpu.memory_space<vmem>>, vector<2x16x128xf32>,
    %c0_196 = arith.constant 0 : index
    %c2_197 = arith.constant 2 : index
    %c0_198 = arith.constant 0 : index
    %212 = vector.load %arg31[%c0_196, %c2_197, %c0_198] : memref<2x18x256xf32, #tpu.memory_space<vmem>>, vector<2x16x128xf32>
    %c0_199 = arith.constant 0 : index
    %c0_200 = arith.constant 0 : index
    %c256_201 = arith.constant 256 : index
    %213 = vector.load %arg33[%c0_199, %c0_200, %c256_201] : memref<2x16x768xf32, #tpu.memory_space<vmem>>, vector<2x16x128xf32>
    tpu.vector_store %arg33[%c0_199, %c0_200, %c256_201], %212 {strides = array<i32>} : memref<2x16x768xf32, #tpu.memory_space<vmem>>, vector<2x16x128xf32>,
    %c0_202 = arith.constant 0 : index
    %c0_203 = arith.constant 0 : index
    %c0_204 = arith.constant 0 : index
    %214 = vector.load %arg33[%c0_202, %c0_203, %c0_204] : memref<2x16x768xf32, #tpu.memory_space<vmem>>, vector<2x16x384xf32>
    %215 = vector.shape_cast %214 : vector<2x16x384xf32> to vector<32x384xf32>
    %c0_205 = arith.constant 0 : index
    %c0_206 = arith.constant 0 : index
    %216 = vector.load %arg24[%c0_205, %c0_206] : memref<384x64xf32, #tpu.memory_space<vmem>>, vector<384x64xf32>
    %cst_207 = arith.constant dense<0.000000e+00> : vector<32x64xf32>
    %217 = tpu.matmul %215, %216, %cst_207 {dimension_numbers = #tpu.dot_dimension_numbers<[1], [0], [0], [1], [0, 0, 1, 1], [], []>} : vector<32x384xf32>, vector<384x64xf32>, vector<32x64xf32> -> vector<32x64xf32>
    %c0_208 = arith.constant 0 : index
    %c0_209 = arith.constant 0 : index
    %218 = vector.load %arg25[%c0_208, %c0_209] : memref<1x64xf32, #tpu.memory_space<vmem>>, vector<1x64xf32>
    %219 = vector.broadcast %218 : vector<1x64xf32> to vector<32x64xf32>
    %220 = arith.addf %217, %219 : vector<32x64xf32>
    %cst_210 = arith.constant 0.000000e+00 : f32
    %221 = vector.broadcast %cst_210 : f32 to vector<32x64xf32>
    %222 = arith.maximumf %220, %221 : vector<32x64xf32>
    %cst_211 = arith.constant dense<0.000000e+00> : vector<64xf32>
    %223 = vector.multi_reduction <add>, %222, %cst_211 [0] : vector<32x64xf32> to vector<64xf32>
    %224 = vector.shape_cast %223 : vector<64xf32> to vector<1x64xf32>
    %cst_212 = arith.constant 3.200000e+01 : f32
    %225 = vector.broadcast %cst_212 : f32 to vector<1x64xf32>
    %226 = arith.divf %224, %225 : vector<1x64xf32>
    %227 = vector.broadcast %226 : vector<1x64xf32> to vector<32x64xf32>
    %228 = arith.subf %222, %227 : vector<32x64xf32>
    %229 = vector.broadcast %226 : vector<1x64xf32> to vector<32x64xf32>
    %230 = arith.subf %222, %229 : vector<32x64xf32>
    %231 = arith.mulf %228, %230 : vector<32x64xf32>
    %cst_213 = arith.constant dense<0.000000e+00> : vector<64xf32>
    %232 = vector.multi_reduction <add>, %231, %cst_213 [0] : vector<32x64xf32> to vector<64xf32>
    %233 = vector.shape_cast %232 : vector<64xf32> to vector<1x64xf32>
    %cst_214 = arith.constant 3.200000e+01 : f32
    %234 = vector.broadcast %cst_214 : f32 to vector<1x64xf32>
    %235 = arith.divf %233, %234 : vector<1x64xf32>
    %236 = vector.broadcast %226 : vector<1x64xf32> to vector<32x64xf32>
    %237 = arith.subf %222, %236 : vector<32x64xf32>
    %cst_215 = arith.constant 9.99999974E-6 : f32
    %238 = vector.broadcast %cst_215 : f32 to vector<1x64xf32>
    %239 = arith.addf %235, %238 : vector<1x64xf32>
    %240 = math.rsqrt %239 : vector<1x64xf32>
    %241 = vector.broadcast %240 : vector<1x64xf32> to vector<32x64xf32>
    %242 = arith.mulf %237, %241 : vector<32x64xf32>
    %c0_216 = arith.constant 0 : index
    %c0_217 = arith.constant 0 : index
    %243 = vector.load %arg26[%c0_216, %c0_217] : memref<1x64xf32, #tpu.memory_space<vmem>>, vector<1x64xf32>
    %244 = vector.broadcast %243 : vector<1x64xf32> to vector<32x64xf32>
    %245 = arith.mulf %242, %244 : vector<32x64xf32>
    %c0_218 = arith.constant 0 : index
    %c0_219 = arith.constant 0 : index
    %246 = vector.load %arg27[%c0_218, %c0_219] : memref<1x64xf32, #tpu.memory_space<vmem>>, vector<1x64xf32>
    %247 = vector.broadcast %246 : vector<1x64xf32> to vector<32x64xf32>
    %248 = arith.addf %245, %247 : vector<32x64xf32>
    %249 = vector.shape_cast %248 : vector<32x64xf32> to vector<2x16x64xf32>
    %c0_220 = arith.constant 0 : index
    %c1_221 = arith.constant 1 : index
    %c0_222 = arith.constant 0 : index
    %250 = vector.load %arg32[%c0_220, %c1_221, %c0_222] : memref<2x18x256xf32, #tpu.memory_space<vmem>>, vector<2x16x64xf32>
    tpu.vector_store %arg32[%c0_220, %c1_221, %c0_222], %249 {strides = array<i32>} : memref<2x18x256xf32, #tpu.memory_space<vmem>>, vector<2x16x64xf32>,
    %c0_223 = arith.constant 0 : index
    %c0_224 = arith.constant 0 : index
    %c0_225 = arith.constant 0 : index
    %251 = vector.load %arg32[%c0_223, %c0_224, %c0_225] : memref<2x18x256xf32, #tpu.memory_space<vmem>>, vector<2x16x64xf32>
    %c0_226 = arith.constant 0 : index
    %c0_227 = arith.constant 0 : index
    %c0_228 = arith.constant 0 : index
    %252 = vector.load %arg33[%c0_226, %c0_227, %c0_228] : memref<2x16x768xf32, #tpu.memory_space<vmem>>, vector<2x16x64xf32>
    tpu.vector_store %arg33[%c0_226, %c0_227, %c0_228], %251 {strides = array<i32>} : memref<2x16x768xf32, #tpu.memory_space<vmem>>, vector<2x16x64xf32>,
    %c0_229 = arith.constant 0 : index
    %c1_230 = arith.constant 1 : index
    %c0_231 = arith.constant 0 : index
    %253 = vector.load %arg32[%c0_229, %c1_230, %c0_231] : memref<2x18x256xf32, #tpu.memory_space<vmem>>, vector<2x16x64xf32>
    %c0_232 = arith.constant 0 : index
    %c0_233 = arith.constant 0 : index
    %c64_234 = arith.constant 64 : index
    %254 = vector.load %arg33[%c0_232, %c0_233, %c64_234] : memref<2x16x768xf32, #tpu.memory_space<vmem>>, vector<2x16x64xf32>
    tpu.vector_store %arg33[%c0_232, %c0_233, %c64_234], %253 {strides = array<i32>} : memref<2x16x768xf32, #tpu.memory_space<vmem>>, vector<2x16x64xf32>,
    %c0_235 = arith.constant 0 : index
    %c2_236 = arith.constant 2 : index
    %c0_237 = arith.constant 0 : index
    %255 = vector.load %arg32[%c0_235, %c2_236, %c0_237] : memref<2x18x256xf32, #tpu.memory_space<vmem>>, vector<2x16x64xf32>
    %c0_238 = arith.constant 0 : index
    %c0_239 = arith.constant 0 : index
    %c128_240 = arith.constant 128 : index
    %256 = vector.load %arg33[%c0_238, %c0_239, %c128_240] : memref<2x16x768xf32, #tpu.memory_space<vmem>>, vector<2x16x64xf32>
    tpu.vector_store %arg33[%c0_238, %c0_239, %c128_240], %255 {strides = array<i32>} : memref<2x16x768xf32, #tpu.memory_space<vmem>>, vector<2x16x64xf32>,
    %c0_241 = arith.constant 0 : index
    %c0_242 = arith.constant 0 : index
    %c0_243 = arith.constant 0 : index
    %257 = vector.load %arg33[%c0_241, %c0_242, %c0_243] : memref<2x16x768xf32, #tpu.memory_space<vmem>>, vector<2x16x192xf32>
    %258 = vector.shape_cast %257 : vector<2x16x192xf32> to vector<32x192xf32>
    %c0_244 = arith.constant 0 : index
    %c0_245 = arith.constant 0 : index
    %259 = vector.load %arg28[%c0_244, %c0_245] : memref<192x2xf32, #tpu.memory_space<vmem>>, vector<192x2xf32>
    %cst_246 = arith.constant dense<0.000000e+00> : vector<32x2xf32>
    %260 = tpu.matmul %258, %259, %cst_246 {dimension_numbers = #tpu.dot_dimension_numbers<[1], [0], [0], [1], [0, 0, 1, 1], [], []>} : vector<32x192xf32>, vector<192x2xf32>, vector<32x2xf32> -> vector<32x2xf32>
    %c0_247 = arith.constant 0 : index
    %c0_248 = arith.constant 0 : index
    %261 = vector.load %arg29[%c0_247, %c0_248] : memref<1x2xf32, #tpu.memory_space<vmem>>, vector<1x2xf32>
    %262 = vector.broadcast %261 : vector<1x2xf32> to vector<32x2xf32>
    %263 = arith.addf %260, %262 : vector<32x2xf32>
    %264 = vector.shape_cast %263 : vector<32x2xf32> to vector<2x16x2xf32>
    %c0_249 = arith.constant 0 : index
    %c0_250 = arith.constant 0 : index
    %c0_251 = arith.constant 0 : index
    %265 = vector.load %arg30[%c0_249, %c0_250, %c0_251] : memref<2x16x2xf32, #tpu.memory_space<vmem>>, vector<2x16x2xf32>
    tpu.vector_store %arg30[%c0_249, %c0_250, %c0_251], %264 {strides = array<i32>} : memref<2x16x2xf32, #tpu.memory_space<vmem>>, vector<2x16x2xf32>,
    return
  }
}

</mosaic_0001>

<bundles_post_ra>
// kernel: simple_unet_forward.1
= control target key start
LH: loop header
LB: loop body
LE: loop exit
PB: predicated region body
PF: predicated region fallthrough
CT: control target
= control target key end

     0   :  { %s3901_s6 = smov 1   ;;  %s3902_s10 = smov 2   ;;  %s4663_s0 = inlined_call_operand.smem [shape: u32[31], index: -1, kind: input, shape index: {}] }
   0x1   :  { %s3967_s5 = sld [smem:[%s4663_s0]]   ;;  %s3903_s14 = smov 3  }
   0x2   :  { %s3972_s9 = sld [smem:[%s4663_s0 + %s3901_s6]]   ;;  %s3904_s18 = smov 4  }
   0x3   :  { %s3977_s13 = sld [smem:[%s4663_s0 + %s3902_s10]]   ;;  %s3905_s22 = smov 5  }
   0x4   :  { %s3982_s17 = sld [smem:[%s4663_s0 + %s3903_s14]]   ;;  %s3906_s26 = smov 6  }
   0x5   :  { %s3987_s21 = sld [smem:[%s4663_s0 + %s3904_s18]]   ;;  %s3907_s30 = smov 7  }
   0x6   :  { %s3992_s25 = sld [smem:[%s4663_s0 + %s3905_s22]]   ;;  %s3908_s4 = smov 8  }
   0x7   :  { %4672 = sst [smem:[#allocation44_spill]] %s3967_s5  ;;  %s3909_s10 = smov 9  }
   0x8   :  { %4673 = sst [smem:[#allocation45_spill]] %s3972_s9  ;;  %s3910_s15 = smov 10  }
   0x9   :  { %4674 = sst [smem:[#allocation46_spill]] %s3977_s13  ;;  %s3911_s20 = smov 11  }
   0xa   :  { %4675 = sst [smem:[#allocation47_spill]] %s3982_s17  ;;  %s3913_s1 = smov 13  }
   0xb   :  { %s3997_s29 = sld [smem:[%s4663_s0 + %s3906_s26]]   ;;  %s3912_s26 = smov 12  }
   0xc   :  { %4676 = sst [smem:[#allocation48_spill]] %s3992_s25  ;;  %s3914_s7 = smov 14  }
   0xd   :  { %s4002_s3 = sld [smem:[%s4663_s0 + %s3907_s30]]   ;;  %s3916_s22 = smov 16  }
   0xe   :  { %s4007_s8 = sld [smem:[%s4663_s0 + %s3908_s4]]   ;;  %s3917_s28 = smov 17  }
   0xf   :  { %s4012_s14 = sld [smem:[%s4663_s0 + %s3909_s10]]  }
  0x10   :  { %s4017_s19 = sld [smem:[%s4663_s0 + %s3910_s15]]   ;;  %s3915_s15 = smov 15  }
  0x11   :  { %s4022_s24 = sld [smem:[%s4663_s0 + %s3911_s20]]  }
  0x12   :  { %s4027_s30 = sld [smem:[%s4663_s0 + %s3912_s26]]  }
  0x13   :  { %4677 = sst [smem:[#allocation49_spill]] %s4002_s3 }
  0x14   :  { %s4032_s6 = sld [smem:[%s4663_s0 + %s3913_s1]]  }
  0x15   :  { %s4037_s12 = sld [smem:[%s4663_s0 + %s3914_s7]]   ;;  %s3918_s7 = smov 18  }
  0x16   :  { %s4042_s20 = sld [smem:[%s4663_s0 + %s3915_s15]]   ;;  %s3919_s15 = smov 19  }
  0x17   :  { %s4047_s27 = sld [smem:[%s4663_s0 + %s3916_s22]]   ;;  %s3920_s22 = smov 20  }
  0x18   :  { %4678 = sst [smem:[#allocation50_spill]] %s4027_s30 }
  0x19   :  { %s4052_s4 = sld [smem:[%s4663_s0 + %s3917_s28]]   ;;  %s3921_s28 = smov 21  }
  0x1a   :  { %s4057_s30 = sld [smem:[%s4663_s0 + %s3918_s7]]   ;;  %s3922_s7 = smov 22  }
  0x1b   :  { %s4062_s9 = sld [smem:[%s4663_s0 + %s3919_s15]]   ;;  %s3923_s15 = smov 23  }
  0x1c   :  { %s4077_s5 = sld [smem:[%s4663_s0 + %s3922_s7]]   ;;  %s3926_s7 = smov 26  }
  0x1d   :  { %4679 = sst [smem:[#allocation51_spill]] %s4047_s27 }
  0x1e   :  { %s4067_s27 = sld [smem:[%s4663_s0 + %s3920_s22]]   ;;  %s3924_s22 = smov 24  }
  0x1f   :  { %4680 = sst [smem:[#allocation52_spill]] %s4052_s4 }
  0x20   :  { %s4072_s4 = sld [smem:[%s4663_s0 + %s3921_s28]]   ;;  %s3925_s28 = smov 25  }
  0x21   :  { %s4082_s3 = sld [smem:[%s4663_s0 + %s3923_s15]]   ;;  %s3927_s15 = smov 27  }
  0x22   :  { %s4087_s25 = sld [smem:[%s4663_s0 + %s3924_s22]]   ;;  %s3928_s22 = smov 28  }
  0x23   :  { %s4092_s13 = sld [smem:[%s4663_s0 + %s3925_s28]]   ;;  %s3929_s28 = smov 29  }
  0x24   :  { %s4097_s17 = sld [smem:[%s4663_s0 + %s3926_s7]]   ;;  %s3930_s7 = smov 30  }
  0x26   :  { %4681 = sst [smem:[#allocation53_spill]] %s4072_s4 }
  0x27   :  { %4682 = sst [smem:[#allocation54_spill]] %s4082_s3 }
  0x28   :  { %4683 = sst [smem:[#allocation55_spill]] %s4087_s25 }
  0x29   :  { %s4102_s3 = sld [smem:[%s4663_s0 + %s3927_s15]]  }
  0x2a   :  { %4684 = sst [smem:[#allocation56_spill]] %s4097_s17 }
  0x2b   :  { %s4107_s25 = sld [smem:[%s4663_s0 + %s3928_s22]]  }
  0x2c   :  { %s4112_s4 = sld [smem:[%s4663_s0 + %s3929_s28]]  }
  0x2d   :  { %s4117_s17 = sld [smem:[%s4663_s0 + %s3930_s7]]  }
  0x2e   :  { %66 = vsyncpa [#allocation6], 0 }
  0x2f   :  { %67 = vsyncpa [#allocation8], 0 }
  0x30   :  { %68 = vsyncpa [#allocation11], 0 }
  0x31   :  { %69 = vsyncpa [#allocation14], 0 }
  0x32   :  { %70 = vsyncpa [#allocation17], 0 }
  0x33   :  { %71 = vsyncpa [#allocation20], 0 }
  0x34   :  { %72 = vsyncpa [#allocation23], 0 }
  0x35   :  { %73 = vsyncpa [#allocation26], 0 }
  0x36   :  { %74 = vsyncpa [#allocation29], 0 }
  0x37   :  { %75 = vsyncpa [#allocation32], 0  ;;  %s3931_s15 = smov [#allocation7]   ;;  %s3932_s18 = smov [#allocation10]  }
  0x38   :  { %s103_s16 = sshll.u32 %s3931_s15, 4  ;;  %s130_s22 = sshll.u32 %s3932_s18, 4  ;;  %s104_s16 = int_to_ptr.vmem [resolvable:$true] %s103_s16  ;;  %s131_s22 = int_to_ptr.vmem [resolvable:$true] %s130_s22 }
  0x39   :  { %s3509_s23 = scalar_lea.vmem %s104_s16, 256  ;;  %p3514_p1 = scmp.lt.s32.totalorder %s104_s16, %s104_s16 }
  0x3a   :  { %p3510_p0 = scmp.ne.s32.totalorder %s104_s16, %s3509_s23  ;;  %p3515_p2 = scmp.lt.s32.totalorder %s3509_s23, %s3509_s23 }
  0x3c   :  { %p3516_p3 = por %p3515_p2, %p3514_p1 }
  0x3e   :  { %p3517_p4 = pnand %p3516_p3, %p3510_p0 }
  0x40   :  { %3520 = shalt.err (!%p3517_p4)
}
  0x41   :  { %s3933_s0 = smov 128   ;;  %s3934_s26 = smov 8  }
  0x42   :  { %109 = dma.hbm_to_vmem [thread:$0]  %s3997_s29, 256, %s104_s16, [#allocation8], %s3933_s0, %s3933_s0, %s3934_s26  }
  0x43   :  { %s3529_s28 = scalar_lea.vmem %s131_s22, 16  ;;  %s3533_s1 = scalar_lea.vmem %s131_s22, 32 }
  0x44   :  { %p3530_p5 = scmp.ne.s32.totalorder %s131_s22, %s3529_s28  ;;  %p3534_p6 = scmp.lt.s32.totalorder %s131_s22, %s131_s22 }
  0x45   :  { %p3535_p7 = scmp.lt.s32.totalorder %s3533_s1, %s3529_s28 }
  0x47   :  { %p3536_p8 = por %p3535_p7, %p3534_p6 }
  0x49   :  { %p3537_p9 = pnand %p3536_p8, %p3530_p5 }
  0x4b   :  { %3540 = shalt.err (!%p3537_p9)
}
  0x4c   :  { %133 = dma.hbm_to_vmem [thread:$0]  %s4012_s14, 16, %s131_s22, [#allocation11]  }
  0x4d   :  { %s3935_s2 = smov [#allocation13]   ;;  %s3936_s10 = smov [#allocation16]  }
  0x4e   :  { %s150_s7 = sshll.u32 %s3935_s2, 4  ;;  %s172_s11 = sshll.u32 %s3936_s10, 4  ;;  %s151_s7 = int_to_ptr.vmem [resolvable:$true] %s150_s7  ;;  %s173_s11 = int_to_ptr.vmem [resolvable:$true] %s172_s11 }
  0x4f   :  { %s3549_s15 = scalar_lea.vmem %s151_s7, 16  ;;  %s3553_s18 = scalar_lea.vmem %s151_s7, 32 }
  0x50   :  { %p3550_p10 = scmp.ne.s32.totalorder %s151_s7, %s3549_s15  ;;  %p3554_p11 = scmp.lt.s32.totalorder %s151_s7, %s151_s7 }
  0x51   :  { %p3555_p12 = scmp.lt.s32.totalorder %s3553_s18, %s3549_s15 }
  0x53   :  { %p3556_p13 = por %p3555_p12, %p3554_p11 }
  0x55   :  { %p3557_p0 = pnand %p3556_p13, %p3550_p10 }
  0x57   :  { %3560 = shalt.err (!%p3557_p0)
}
  0x58   :  { %153 = dma.hbm_to_vmem [thread:$0]  %s4022_s24, 16, %s151_s7, [#allocation14]  }
  0x59   :  { %s3569_s29 = scalar_lea.vmem %s173_s11, 16  ;;  %s3573_s16 = scalar_lea.vmem %s173_s11, 32 }
  0x5a   :  { %p3570_p1 = scmp.ne.s32.totalorder %s173_s11, %s3569_s29  ;;  %p3574_p2 = scmp.lt.s32.totalorder %s173_s11, %s173_s11 }
  0x5b   :  { %p3575_p3 = scmp.lt.s32.totalorder %s3573_s16, %s3569_s29 }
  0x5d   :  { %p3576_p4 = por %p3575_p3, %p3574_p2 }
  0x5f   :  { %p3577_p5 = pnand %p3576_p4, %p3570_p1 }
  0x61   :  { %3580 = shalt.err (!%p3577_p5)
}
  0x62   :  { %175 = dma.hbm_to_vmem [thread:$0]  %s4037_s12, 16, %s173_s11, [#allocation17]  }
  0x63   :  { %s3937_s14 = smov [#allocation19]   ;;  %s3938_s23 = smov [#allocation22]  }
  0x64   :  { %s196_s22 = sshll.u32 %s3937_s14, 4  ;;  %s215_s28 = sshll.u32 %s3938_s23, 4  ;;  %s197_s22 = int_to_ptr.vmem [resolvable:$true] %s196_s22  ;;  %s216_s28 = int_to_ptr.vmem [resolvable:$true] %s215_s28 }
  0x65   :  { %s3589_s1 = scalar_lea.vmem %s197_s22, 32  ;;  %p3594_p7 = scmp.lt.s32.totalorder %s197_s22, %s197_s22 }
  0x66   :  { %p3590_p6 = scmp.ne.s32.totalorder %s197_s22, %s3589_s1  ;;  %p3595_p8 = scmp.lt.s32.totalorder %s3589_s1, %s3589_s1 }
  0x68   :  { %p3596_p9 = por %p3595_p8, %p3594_p7 }
  0x6a   :  { %p3597_p10 = pnand %p3596_p9, %p3590_p6 }
  0x6c   :  { %3600 = shalt.err (!%p3597_p10)
}
  0x6d   :  { %199 = dma.hbm_to_vmem [thread:$0]  %s4057_s30, 32, %s197_s22, [#allocation20]  }
  0x6e   :  { %s3609_s24 = scalar_lea.vmem %s216_s28, 12288  ;;  %p3614_p12 = scmp.lt.s32.totalorder %s216_s28, %s216_s28 }
  0x6f   :  { %p3610_p11 = scmp.ne.s32.totalorder %s216_s28, %s3609_s24  ;;  %p3615_p13 = scmp.lt.s32.totalorder %s3609_s24, %s3609_s24 }
  0x71   :  { %p3616_p0 = por %p3615_p13, %p3614_p12 }
  0x73   :  { %p3617_p1 = pnand %p3616_p0, %p3610_p11 }
  0x75   :  { %3620 = shalt.err (!%p3617_p1)
}
  0x76   :  { %221 = dma.hbm_to_vmem [thread:$0]  %s4067_s27, 12288, %s216_s28, [#allocation23], %s3933_s0, %s3933_s0, %s3934_s26  }
  0x77   :  { %s3939_s12 = smov [#allocation25]   ;;  %s3940_s7 = smov [#allocation28]  }
  0x78   :  { %s238_s2 = sshll.u32 %s3939_s12, 4  ;;  %s260_s10 = sshll.u32 %s3940_s7, 4  ;;  %s239_s2 = int_to_ptr.vmem [resolvable:$true] %s238_s2  ;;  %s261_s10 = int_to_ptr.vmem [resolvable:$true] %s260_s10 }
  0x79   :  { %s3629_s11 = scalar_lea.vmem %s239_s2, 16  ;;  %s3633_s30 = scalar_lea.vmem %s239_s2, 32 }
  0x7a   :  { %p3630_p2 = scmp.ne.s32.totalorder %s239_s2, %s3629_s11  ;;  %p3634_p3 = scmp.lt.s32.totalorder %s239_s2, %s239_s2 }
  0x7b   :  { %p3635_p4 = scmp.lt.s32.totalorder %s3633_s30, %s3629_s11 }
  0x7d   :  { %p3636_p5 = por %p3635_p4, %p3634_p3 }
  0x7f   :  { %p3637_p6 = pnand %p3636_p5, %p3630_p2 }
  0x81   :  { %3640 = shalt.err (!%p3637_p6)
}
  0x82   :  { %241 = dma.hbm_to_vmem [thread:$0]  %s4077_s5, 16, %s239_s2, [#allocation26]  }
  0x83   :  { %s3649_s15 = scalar_lea.vmem %s261_s10, 16  ;;  %s3653_s18 = scalar_lea.vmem %s261_s10, 32 }
  0x84   :  { %p3650_p7 = scmp.ne.s32.totalorder %s261_s10, %s3649_s15  ;;  %p3654_p8 = scmp.lt.s32.totalorder %s261_s10, %s261_s10 }
  0x85   :  { %p3655_p9 = scmp.lt.s32.totalorder %s3653_s18, %s3649_s15 }
  0x87   :  { %p3656_p10 = por %p3655_p9, %p3654_p8 }
  0x89   :  { %p3657_p11 = pnand %p3656_p10, %p3650_p7 }
  0x8b   :  { %3660 = shalt.err (!%p3657_p11)
}
  0x8c   :  { %263 = dma.hbm_to_vmem [thread:$0]  %s4092_s13, 16, %s261_s10, [#allocation29]  }
  0x8d   :  { %s3941_s27 = smov [#allocation31]   ;;  %s3942_s16 = smov [#allocation5]  }
  0x8e   :  { %s280_s29 = sshll.u32 %s3941_s27, 4  ;;  %s89_s14 = sshll.u32 %s3942_s16, 4  ;;  %s281_s29 = int_to_ptr.vmem [resolvable:$true] %s280_s29  ;;  %s90_s14 = int_to_ptr.vmem [resolvable:$true] %s89_s14 }
  0x8f   :  { %s3669_s22 = scalar_lea.vmem %s281_s29, 16  ;;  %s3673_s23 = scalar_lea.vmem %s281_s29, 32 }
  0x90   :  { %p3670_p12 = scmp.ne.s32.totalorder %s281_s29, %s3669_s22  ;;  %p3674_p13 = scmp.lt.s32.totalorder %s281_s29, %s281_s29 }
  0x91   :  { %p3675_p0 = scmp.lt.s32.totalorder %s3673_s23, %s3669_s22 }
  0x93   :  { %p3676_p1 = por %p3675_p0, %p3674_p13 }
  0x95   :  { %p3677_p2 = pnand %p3676_p1, %p3670_p12 }
  0x97   :  { %3680 = shalt.err (!%p3677_p2)
}
  0x98   :  { %283 = dma.hbm_to_vmem [thread:$0]  %s4102_s3, 16, %s281_s29, [#allocation32]  }
  0x99   :  { %s3689_s5 = scalar_lea.vmem %s90_s14, 512  ;;  %p3694_p4 = scmp.lt.s32.totalorder %s90_s14, %s90_s14 }
  0x9a   :  { %p3690_p3 = scmp.ne.s32.totalorder %s90_s14, %s3689_s5  ;;  %p3695_p5 = scmp.lt.s32.totalorder %s3689_s5, %s3689_s5 }
  0x9c   :  { %p3696_p6 = por %p3695_p5, %p3694_p4 }
  0x9e   :  { %p3697_p7 = pnand %p3696_p6, %p3690_p3 }
  0xa0   :  { %3700 = shalt.err (!%p3697_p7)
}
  0xa1   :  { %95 = dma.hbm_to_vmem [thread:$0]  %s3987_s21, 512, %s90_s14, [#allocation6], %s3933_s0, %s3933_s0, %s3934_s26  }
  0xa2   :  { %s3943_s13 = smov [#allocation9]   ;;  %s3944_s1 = smov [#allocation12]  }
  0xa3   :  { %s117_s28 = sshll.u32 %s3943_s13, 4  ;;  %s140_s24 = sshll.u32 %s3944_s1, 4  ;;  %s118_s28 = int_to_ptr.vmem [resolvable:$true] %s117_s28  ;;  %s141_s24 = int_to_ptr.vmem [resolvable:$true] %s140_s24 }
  0xa4   :  { %s3709_s12 = scalar_lea.vmem %s118_s28, 256  ;;  %p3714_p9 = scmp.lt.s32.totalorder %s118_s28, %s118_s28 }
  0xa5   :  { %p3710_p8 = scmp.ne.s32.totalorder %s118_s28, %s3709_s12  ;;  %p3715_p10 = scmp.lt.s32.totalorder %s3709_s12, %s3709_s12 }
  0xa7   :  { %p3716_p11 = por %p3715_p10, %p3714_p9 }
  0xa9   :  { %p3717_p12 = pnand %p3716_p11, %p3710_p8 }
  0xab   :  { %3720 = shalt.err (!%p3717_p12)
}
  0xac   :  { %123 = dma.hbm_to_vmem [thread:$0]  %s4007_s8, 256, %s118_s28, [#allocation8], %s3933_s0, %s3933_s0, %s3934_s26  }
  0xad   :  { %s3729_s3 = scalar_lea.vmem %s141_s24, 16  ;;  %s3733_s21 = scalar_lea.vmem %s141_s24, 32 }
  0xae   :  { %p3730_p13 = scmp.ne.s32.totalorder %s141_s24, %s3729_s3  ;;  %p3734_p0 = scmp.lt.s32.totalorder %s141_s24, %s141_s24 }
  0xaf   :  { %p3735_p1 = scmp.lt.s32.totalorder %s3733_s21, %s3729_s3 }
  0xb1   :  { %p3736_p2 = por %p3735_p1, %p3734_p0 }
  0xb3   :  { %p3737_p3 = pnand %p3736_p2, %p3730_p13 }
  0xb5   :  { %3740 = shalt.err (!%p3737_p3)
}
  0xb6   :  { %143 = dma.hbm_to_vmem [thread:$0]  %s4017_s19, 16, %s141_s24, [#allocation11]  }
  0xb7   :  { %s3945_s2 = smov [#allocation15]   ;;  %s3946_s10 = smov [#allocation18]  }
  0xb8   :  { %s162_s7 = sshll.u32 %s3945_s2, 4  ;;  %s182_s11 = sshll.u32 %s3946_s10, 4  ;;  %s163_s7 = int_to_ptr.vmem [resolvable:$true] %s162_s7  ;;  %s183_s11 = int_to_ptr.vmem [resolvable:$true] %s182_s11 }
  0xb9   :  { %s3749_s30 = scalar_lea.vmem %s163_s7, 16  ;;  %s3753_s15 = scalar_lea.vmem %s163_s7, 32 }
  0xba   :  { %p3750_p4 = scmp.ne.s32.totalorder %s163_s7, %s3749_s30  ;;  %p3754_p5 = scmp.lt.s32.totalorder %s163_s7, %s163_s7 }
  0xbb   :  { %p3755_p6 = scmp.lt.s32.totalorder %s3753_s15, %s3749_s30 }
  0xbd   :  { %p3756_p7 = por %p3755_p6, %p3754_p5 }
  0xbf   :  { %p3757_p8 = pnand %p3756_p7, %p3750_p4 }
  0xc1   :  { %3760 = shalt.err (!%p3757_p8)
}
  0xc2   :  { %165 = dma.hbm_to_vmem [thread:$0]  %s4032_s6, 16, %s163_s7, [#allocation14]  }
  0xc3   :  { %s3769_s8 = scalar_lea.vmem %s183_s11, 16  ;;  %s3773_s0 = scalar_lea.vmem %s183_s11, 32 }
  0xc4   :  { %p3770_p9 = scmp.ne.s32.totalorder %s183_s11, %s3769_s8  ;;  %p3774_p10 = scmp.lt.s32.totalorder %s183_s11, %s183_s11 }
  0xc5   :  { %p3775_p11 = scmp.lt.s32.totalorder %s3773_s0, %s3769_s8 }
  0xc7   :  { %p3776_p12 = por %p3775_p11, %p3774_p10 }
  0xc9   :  { %p3777_p13 = pnand %p3776_p12, %p3770_p9 }
  0xcb   :  { %3780 = shalt.err (!%p3777_p13)
}
  0xcc   :  { %185 = dma.hbm_to_vmem [thread:$0]  %s4042_s20, 16, %s183_s11, [#allocation17]  }
  0xcd   :  { %s3947_s19 = smov [#allocation21]   ;;  %s3948_s18 = smov [#allocation24]  }
  0xce   :  { %s206_s26 = sshll.u32 %s3947_s19, 4  ;;  %s228_s27 = sshll.u32 %s3948_s18, 4  ;;  %s207_s26 = int_to_ptr.vmem [resolvable:$true] %s206_s26  ;;  %s229_s27 = int_to_ptr.vmem [resolvable:$true] %s228_s27 }
  0xcf   :  { %s3789_s29 = scalar_lea.vmem %s207_s26, 32  ;;  %p3794_p1 = scmp.lt.s32.totalorder %s207_s26, %s207_s26 }
  0xd0   :  { %p3790_p0 = scmp.ne.s32.totalorder %s207_s26, %s3789_s29  ;;  %p3795_p2 = scmp.lt.s32.totalorder %s3789_s29, %s3789_s29 }
  0xd2   :  { %p3796_p3 = por %p3795_p2, %p3794_p1 }
  0xd4   :  { %p3797_p4 = pnand %p3796_p3, %p3790_p0 }
  0xd6   :  { %3800 = shalt.err (!%p3797_p4)
}
  0xd7   :  { %209 = dma.hbm_to_vmem [thread:$0]  %s4062_s9, 32, %s207_s26, [#allocation20]  }
  0xd8   :  { %s3809_s6 = scalar_lea.vmem %s229_s27, 16  ;;  %s3813_s16 = scalar_lea.vmem %s229_s27, 32 }
  0xd9   :  { %p3810_p5 = scmp.ne.s32.totalorder %s229_s27, %s3809_s6  ;;  %p3814_p6 = scmp.lt.s32.totalorder %s229_s27, %s229_s27 }
  0xda   :  { %p3815_p7 = scmp.lt.s32.totalorder %s3813_s16, %s3809_s6 }
  0xdc   :  { %p3816_p8 = por %p3815_p7, %p3814_p6 }
  0xde   :  { %p3817_p9 = pnand %p3816_p8, %p3810_p5 }
  0xe0   :  { %3820 = shalt.err (!%p3817_p9)
}
  0xe1   :  { %s4685_s20 = sld [smem:[#allocation53_spill]]  ;;  %s3949_s14 = smov [#allocation27]  }
  0xe2   :  { %s248_s22 = sshll.u32 %s3949_s14, 4  ;;  %s3950_s23 = smov [#allocation30]   ;;  %s249_s22 = int_to_ptr.vmem [resolvable:$true] %s248_s22 }
  0xe3   :  { %s270_s5 = sshll.u32 %s3950_s23, 4  ;;  %s3829_s13 = scalar_lea.vmem %s249_s22, 16  ;;  %s271_s5 = int_to_ptr.vmem [resolvable:$true] %s270_s5 }
  0xe4   :  { %p3830_p10 = scmp.ne.s32.totalorder %s249_s22, %s3829_s13  ;;  %s3833_s28 = scalar_lea.vmem %s249_s22, 32 }
  0xe5   :  { %p3834_p11 = scmp.lt.s32.totalorder %s249_s22, %s249_s22  ;;  %p3835_p12 = scmp.lt.s32.totalorder %s3833_s28, %s3829_s13 }
  0xe7   :  { %231 = dma.hbm_to_vmem [thread:$0]  %s4685_s20, 16, %s229_s27, [#allocation23]  }
  0xe8   :  { %p3836_p13 = por %p3835_p12, %p3834_p11 }
  0xea   :  { %p3837_p0 = pnand %p3836_p13, %p3830_p10 }
  0xec   :  { %3840 = shalt.err (!%p3837_p0)
}
  0xed   :  { %s4686_s9 = sld [smem:[#allocation54_spill]]  ;;  %s3849_s1 = scalar_lea.vmem %s271_s5, 16 }
  0xee   :  { %p3850_p1 = scmp.ne.s32.totalorder %s271_s5, %s3849_s1  ;;  %s3853_s24 = scalar_lea.vmem %s271_s5, 32 }
  0xef   :  { %p3854_p2 = scmp.lt.s32.totalorder %s271_s5, %s271_s5  ;;  %p3855_p3 = scmp.lt.s32.totalorder %s3853_s24, %s3849_s1 }
  0xf1   :  { %p3856_p4 = por %p3855_p3, %p3854_p2 }
  0xf3   :  { %251 = dma.hbm_to_vmem [thread:$0]  %s4686_s9, 16, %s249_s22, [#allocation26]  }
  0xf4   :  { %p3857_p5 = pnand %p3856_p4, %p3850_p1 }
  0xf6   :  { %3860 = shalt.err (!%p3857_p5)
}
  0xf7   :  { %s4687_s12 = sld [smem:[#allocation56_spill]]  ;;  %s3951_s3 = smov [#allocation33]  }
  0xf8   :  { %s292_s21 = sshll.u32 %s3951_s3, 4  ;;  %s293_s21 = int_to_ptr.vmem [resolvable:$true] %s292_s21 }
  0xf9   :  { %s3869_s2 = scalar_lea.vmem %s293_s21, 16  ;;  %s3873_s7 = scalar_lea.vmem %s293_s21, 32 }
  0xfa   :  { %p3870_p6 = scmp.ne.s32.totalorder %s293_s21, %s3869_s2  ;;  %p3874_p7 = scmp.lt.s32.totalorder %s293_s21, %s293_s21 }
  0xfb   :  { %p3875_p8 = scmp.lt.s32.totalorder %s3873_s7, %s3869_s2 }
  0xfd   :  { %273 = dma.hbm_to_vmem [thread:$0]  %s4687_s12, 16, %s271_s5, [#allocation29]  }
  0xfe   :  { %p3876_p9 = por %p3875_p8, %p3874_p7 }
 0x100   :  { %p3877_p10 = pnand %p3876_p9, %p3870_p6 }
 0x102   :  { %3880 = shalt.err (!%p3877_p10)
}
 0x103   :  { %295 = dma.hbm_to_vmem [thread:$0]  %s4112_s4, 16, %s293_s21, [#allocation32]  }
 0x104   :  { %3881 = dma.done.wait [#allocation6], 512  }
 0x105   :  { %3882 = vsyncadd [#allocation6], 4294966784 }
 0x106   :  { %3883 = dma.done.wait [#allocation8], 512  }
 0x107   :  { %3884 = vsyncadd [#allocation8], 4294966784 }
 0x108   :  { %3885 = dma.done.wait [#allocation11], 32  }
 0x109   :  { %3886 = vsyncadd [#allocation11], 4294967264 }
 0x10a   :  { %3887 = dma.done.wait [#allocation14], 32  }
 0x10b   :  { %3888 = vsyncadd [#allocation14], 4294967264 }
 0x10c   :  { %3889 = dma.done.wait [#allocation17], 32  }
 0x10d   :  { %3890 = vsyncadd [#allocation17], 4294967264 }
 0x10e   :  { %3891 = dma.done.wait [#allocation20], 64  }
 0x10f   :  { %3892 = vsyncadd [#allocation20], 4294967232 }
 0x110   :  { %3893 = dma.done.wait [#allocation23], 12304  }
 0x111   :  { %3894 = vsyncadd [#allocation23], 4294954992 }
 0x112   :  { %3895 = dma.done.wait [#allocation26], 32  }
 0x113   :  { %3896 = vsyncadd [#allocation26], 4294967264 }
 0x114   :  { %3897 = dma.done.wait [#allocation29], 32  }
 0x115   :  { %3898 = vsyncadd [#allocation29], 4294967264 }
 0x116   :  { %3899 = dma.done.wait [#allocation32], 32  }
 0x117   :  { %3900 = vsyncadd [#allocation32], 4294967264  ;;  %v3952_v0 = vmov 0.0   ;;  %s4688_s4 = sld [smem:[#allocation47_spill]]  ;;  %v3953_v1 = vmov 0   ;;  %v420_v12 = vld [vmem:[#allocation5] sm:$0xff] }
 0x118   :  { %646 = vst [vmem:[#allocation2 + $0x8] sm:$0xff] %v3952_v0  ;;  %645 = vst [vmem:[#allocation2] sm:$0xff] %v3952_v0  ;;  %s4689_s10 = sld [smem:[#allocation46_spill]]  ;;  %3486 = vset.pattern.permute.xlu1 %v3953_v1  ;;  %3485 = vset.pattern.permute.xlu0 %v3953_v1  ;;  %vm448_vm0 = vcmask 261120   ;;  %v421_v38 = vld [vmem:[#allocation5 + $0x8] sm:$0xff]  ;;  %v422_v39 = vld [vmem:[#allocation5 + $0x10] sm:$0xff] }
 0x119   :  { %647 = vst [vmem:[#allocation2 + $0x10] sm:$0xff] %v3952_v0  ;;  %649 = vst [vmem:[#allocation2 + $0x20] sm:$0x3] %v3952_v0  ;;  %1157 = vmatprep.subr.mxu0 %v3952_v0  ;;  %s4690_s11 = sld [smem:[#allocation48_spill]]  ;;  %3362 = vmatprep.mubr.msk.f32.mxu1 %vm448_vm0, %v420_v12  ;;  %v423_v40 = vld [vmem:[#allocation5 + $0x18] sm:$0xff]  ;;  %v550_v41 = vld [vmem:[#allocation7] sm:$0xff] }
 0x11a   :  { %651 = vst [vmem:[#allocation2 + $0x30] sm:$0xff] %v3952_v0  ;;  %653 = vst [vmem:[#allocation2 + $0x40] sm:$0xff] %v3952_v0  ;;  %s4691_s30 = sld [smem:[#allocation49_spill]]  ;;  %v551_v58 = vld [vmem:[#allocation7 + $0x8] sm:$0xff]  ;;  %vm694_vm1 = vcmask 8192   ;;  %vm677_vm2 = vcmask 1040384  }
 0x11b   :  { %655 = vst [vmem:[#allocation2 + $0x50] sm:$0x3] %v3952_v0  ;;  %657 = vst [vmem:[#allocation3] sm:$0xff] %v3952_v0  ;;  %s4692_s15 = sld [smem:[#allocation44_spill]]  ;;  %vm692_vm3 = vcmask 15360   ;;  %vm690_vm4 = vcmask 15361  }
 0x11c   :  { %658 = vst [vmem:[#allocation3 + $0x8] sm:$0xff] %v3952_v0  ;;  %659 = vst [vmem:[#allocation3 + $0x10] sm:$0xff] %v3952_v0  ;;  %s4693_s8 = sld [smem:[#allocation45_spill]]  ;;  %s3954_s0 = smov 2   ;;  %vm717_vm5 = vcmask 16400   ;;  %vm715_vm6 = vcmask 23568  }
 0x11d   :  { %661 = vst [vmem:[#allocation3 + $0x20] sm:$0x3] %v3952_v0  ;;  %662 = vst [vmem:[#allocation3 + $0x28] sm:$0x3] %v3952_v0  ;;  %v391_v2 = vld [vmem:[%s4688_s4 + $0x18] sm:$0xff]  ;;  %v390_v6 = vld [vmem:[%s4688_s4 + $0x10] sm:$0xff] }
 0x11e   :  { %663 = vst [vmem:[#allocation3 + $0x30] sm:$0xff] %v3952_v0  ;;  %664 = vst [vmem:[#allocation3 + $0x38] sm:$0xff] %v3952_v0  ;;  %v357_v3 = vld [vmem:[%s4689_s10 + $0x18] sm:$0xff]  ;;  %409 = vperm.xlu1 %3486, %v391_v2   ;;  %v356_v4 = vld [vmem:[%s4689_s10 + $0x10] sm:$0xff]  ;;  %s3955_s19 = smov 1   ;;  %vm713_vm7 = vcmask 23569  }
 0x11f   :  { %665 = vst [vmem:[#allocation3 + $0x40] sm:$0xff] %v3952_v0  ;;  %667 = vst [vmem:[#allocation3 + $0x50] sm:$0x3] %v3952_v0  ;;  %375 = vperm.xlu0 %3485, %v357_v3   ;;  %v355_v5 = vld [vmem:[%s4689_s10 + $0x8] sm:$0xff]  ;;  %v354_v7 = vld [vmem:[%s4689_s10] sm:$0xff]  ;;  %vm736_vm8 = vcmask 23552  }
 0x120   :  { %668 = vst [vmem:[#allocation3 + $0x58] sm:$0x3] %v3952_v0  ;;  %v389_v8 = vld [vmem:[%s4688_s4 + $0x8] sm:$0xff]  ;;  %v388_v9 = vld [vmem:[%s4688_s4] sm:$0xff]  ;;  %v427_v10 = vld [vmem:[%s4690_s11 + $0x18] sm:$0xff]  ;;  %vm753_vm9 = vcmask 1046528  }
 0x121   :  { %v426_v11 = vld [vmem:[%s4690_s11 + $0x10] sm:$0xff]  ;;  %v425_v13 = vld [vmem:[%s4690_s11 + $0x8] sm:$0xff]  ;;  %v424_v14 = vld [vmem:[%s4690_s11] sm:$0xff]  ;;  %s3956_s26 = smov 3   ;;  %vm793_vm10 = vcmask 1045504   ;;  %s3957_s18 = smov 6  }
 0x122   :  { %365 = vperm.xlu1 %3486, %v355_v5   ;;  %v552_v15 = vld [vmem:[%s4691_s30] sm:$0xff]  ;;  %v553_v16 = vld [vmem:[%s4691_s30 + $0x8] sm:$0xff]  ;;  %v671_v1 = vld [vmem:[%s4693_s8 + $0x10] sm:$0xff]  ;;  %vm776_vm11 = vcmask 48152   ;;  %vm816_vm12 = vcmask 72752   ;;  %s4694_s27 = sld [smem:[#allocation50_spill]] }
 0x123   :  { %370 = vperm.xlu0 %3485, %v356_v4   ;;  %v3105_v17 = vld [vmem:[%s4692_s15] ss:$0 sm:$0xff]  ;;  %v670_v59 = vld [vmem:[%s4693_s8 + $0x8] sm:$0xff]  ;;  %v672_v2 = vld [vmem:[%s4693_s8 + $0x18] sm:$0xff]  ;;  %v681_v3 = vrot.slane %v671_v1, 7  ;;  %vm834_vm13 = vcmask 72704  }
 0x124   :  { %v679_v60 = vrot.slane %v670_v59, 7  ;;  %v669_v61 = vld [vmem:[%s4693_s8] sm:$0xff]  ;;  %v682_v4 = vrot.slane %v672_v2, 7  ;;  %vm939_vm14 = vcmask 523264   ;;  %vm1021_vm15 = vcmask 523265   ;;  %s3958_s29 = smov 64  }
 0x125   :  { %v678_v62 = vrot.slane %v669_v61, 7  ;;  %696 = vst.msk [vmem:[#allocation2 + $0x30] sm:$0xfe] %vm690_vm4, %v681_v3  ;;  %s4695_s6 = sld [smem:[#allocation51_spill]] }
 0x126   :  { %360 = vperm.xlu1 %3486, %v354_v7   ;;  %695 = vst.msk [vmem:[#allocation2 + $0x20] sm:$0x1] %vm694_vm1, %v679_v60  ;;  %v683_v5 = vsel %vm677_vm2, %v681_v3, %v682_v4  ;;  %698 = vst.msk [vmem:[#allocation2 + $0x50] sm:$0x1] %vm694_vm1, %v682_v4  ;;  %vm1071_vm1 = vcmask 1048064   ;;  %s4696_s16 = sld [smem:[#allocation52_spill]] }
 0x127   :  { %404 = vperm.xlu0 %3485, %v390_v6   ;;  %v680_v63 = vsel %vm677_vm2, %v678_v62, %v679_v60  ;;  %691 = vst.msk [vmem:[#allocation2] sm:$0xfe] %vm690_vm4, %v678_v62  ;;  %s4697_s20 = sld [smem:[#allocation55_spill]] }
 0x128   :  { %693 = vst.msk [vmem:[#allocation2 + $0x10] sm:$0xff] %vm692_vm3, %v680_v63  ;;  %697 = vst.msk [vmem:[#allocation2 + $0x40] sm:$0xff] %vm692_vm3, %v683_v5  ;;  %v1129_v4 = vld [vmem:[%s4694_s27 + $0x78] sm:$0xff]  ;;  %v1128_v5 = vld [vmem:[%s4694_s27 + $0x70] sm:$0xff] }
 0x129   :  { %1158 = vmatpush1.msra.mxu0 %v1129_v4 }
 0x12a   :  { %394 = vperm.xlu1 %3486, %v388_v9   ;;  %1159 = vmatprep.subr.mxu0 %v3952_v0 }
 0x12b   :  { %399 = vperm.xlu0 %3485, %v389_v8   ;;  %1160 = vmatpush1.msra.mxu0 %v1128_v5 }
 0x12c   :  { %1161 = vmatprep.subr.mxu0 %v3952_v0 }
 0x12e   :  { %440 = vperm.xlu1 %3486, %v426_v11  }
 0x12f   :  { %445 = vperm.xlu0 %3485, %v427_v10  }
 0x132   :  { %430 = vperm.xlu1 %3486, %v424_v14  }
 0x133   :  { %435 = vperm.xlu0 %3485, %v425_v13  }
 0x136   :  { %561 = vperm.xlu1 %3486, %v553_v16  }
 0x137   :  { %556 = vperm.xlu0 %3485, %v552_v15  }
 0x199   :  { %v410_v18 = vpop.permute.xlu1 %409 }
 0x19a   :  { %v376_v19 = vpop.permute.xlu0 %375 }
 0x19b   :  { %v387_v20 = vmul.f32 %v3105_v17, %v376_v19 }
 0x19d   :  { %v415_v21 = vadd.f32 %v410_v18, %v387_v20  ;;  %v366_v23 = vpop.permute.xlu1 %365 }
 0x19e   :  { %v371_v22 = vpop.permute.xlu0 %370  ;;  %v385_v29 = vmul.f32 %v3105_v17, %v366_v23  ;;  %v826_v23 = vld [vmem:[#allocation9 + $0x8] sm:$0x1] }
 0x19f   :  { %v419_v24 = vmax.f32 %v415_v21, 0.0  ;;  %v386_v25 = vmul.f32 %v3105_v17, %v371_v22 }
 0x1a1   :  { %3354 = vmatprep.subr.mxu1 %v419_v24  ;;  %v361_v27 = vpop.permute.xlu1 %360 }
 0x1a2   :  { %v405_v26 = vpop.permute.xlu0 %404  ;;  %3355 = vmatpush3.msra.mxu1 %v419_v24  ;;  %v384_v31 = vmul.f32 %v3105_v17, %v361_v27 }
 0x1a3   :  { %v414_v28 = vadd.f32 %v405_v26, %v386_v25 }
 0x1a5   :  { %v418_v30 = vmax.f32 %v414_v28, 0.0  ;;  %v395_v33 = vpop.permute.xlu1 %394 }
 0x1a6   :  { %v400_v32 = vpop.permute.xlu0 %399  ;;  %v412_v35 = vadd.f32 %v395_v33, %v384_v31  ;;  %v825_v33 = vld [vmem:[#allocation9] sm:$0xff] }
 0x1a7   :  { %v413_v34 = vadd.f32 %v400_v32, %v385_v29  ;;  %3356 = vmatprep.subr.mxu1 %v418_v30 }
 0x1a8   :  { %3357 = vmatpush3.msra.mxu1 %v418_v30  ;;  %v416_v37 = vmax.f32 %v412_v35, 0.0 }
 0x1a9   :  { %v417_v36 = vmax.f32 %v413_v34, 0.0  ;;  %v441_v44 = vpop.permute.xlu1 %440 }
 0x1aa   :  { %v446_v42 = vpop.permute.xlu0 %445 }
 0x1ab   :  { %3358 = vmatprep.subr.mxu1 %v417_v36 }
 0x1ac   :  { %3359 = vmatpush3.msra.mxu1 %v417_v36 }
 0x1ad   :  { %3360 = vmatprep.subr.mxu1 %v416_v37  ;;  %v431_v53 = vpop.permute.xlu1 %430 }
 0x1ae   :  { %3361 = vmatpush3.msra.mxu1 %v416_v37  ;;  %v436_v48 = vpop.permute.xlu0 %435 }
 0x1af   :  { %3363 = vmatmul.mubr.msk.f32.vlgmr.msra.gmra.mxu1 %vm448_vm0, %v421_v38 }
 0x1b0   :  { %3365 = vmatprep.mubr.msk.f32.mxu1 %vm448_vm0, %v422_v39 }
 0x1b1   :  { %v562_v6 = vpop.permute.xlu1 %561 }
 0x1b2   :  { %v557_v9 = vpop.permute.xlu0 %556 }
 0x1b3   :  { %3366 = vmatmul.mubr.msk.f32.gmra.mxu1 %vm448_vm0, %v423_v40 }
 0x1b4   :  { %3376 = vmatprep.mubr.msk.f32.mxu1 %vm448_vm0, %v550_v41 }
 0x26f   :  { %v3364_v43 = vpop.f32.mrf.mxu1 }
 0x270   :  { %v533_v50 = vadd.f32 %v3364_v43, %v436_v48 }
 0x271   :  { %v527_v45 = vpop.f32.mrf.mxu1 }
 0x272   :  { %v528_v54 = vadd.f32 %v527_v45, %v431_v53  ;;  %v547_v56 = vmax.f32 %v533_v50, 0.0 }
 0x273   :  { %v3367_v46 = vpop.f32.mrf.mxu1 }
 0x274   :  { %v543_v47 = vadd.f32 %v3367_v46, %v446_v42  ;;  %v546_v57 = vmax.f32 %v528_v54, 0.0 }
 0x275   :  { %v537_v49 = vpop.f32.mrf.mxu1 }
 0x276   :  { %v549_v51 = vmax.f32 %v543_v47, 0.0  ;;  %v538_v52 = vadd.f32 %v537_v49, %v441_v44 }
 0x278   :  { %v548_v55 = vmax.f32 %v538_v52, 0.0  ;;  %3368 = vmatprep.subr.mxu1 %v549_v51 }
 0x279   :  { %3369 = vmatpush3.msra.mxu1 %v549_v51 }
 0x27a   :  { %3370 = vmatprep.subr.mxu1 %v548_v55 }
 0x27b   :  { %3371 = vmatpush3.msra.mxu1 %v548_v55 }
 0x27c   :  { %3372 = vmatprep.subr.mxu1 %v547_v56 }
 0x27d   :  { %3373 = vmatpush3.msra.mxu1 %v547_v56 }
 0x27e   :  { %3374 = vmatprep.subr.mxu1 %v546_v57 }
 0x27f   :  { %3375 = vmatpush3.msra.mxu1 %v546_v57 }
 0x280   :  { %3377 = vmatmul.mubr.msk.f32.vlgmr.msra.gmra.mxu1 %vm448_vm0, %v551_v58  ;;  %3379 = vmatprep.subr.msk.mxu1 %vm677_vm2, %v826_v23  ;;  %vm1024_vm0 = vcmask 516096  }
 0x281   :  { %3380 = vmatpush3.msk.msra.mxu1 %vm677_vm2, %v826_v23  ;;  %v1114_v23 = vld [vmem:[%s4694_s27] sm:$0xff] }
 0x282   :  { %3381 = vmatprep.subr.mxu1 %v825_v33 }
 0x283   :  { %3382 = vmatpush3.msra.mxu1 %v825_v33 }
 0x340   :  { %v3378_v7 = vpop.f32.mrf.mxu1 }
 0x341   :  { %v642_v8 = vadd.f32 %v3378_v7, %v562_v6  ;;  %v1127_v6 = vld [vmem:[%s4694_s27 + $0x68] sm:$0xff]  ;;  %v1126_v7 = vld [vmem:[%s4694_s27 + $0x60] sm:$0xff] }
 0x342   :  { %v636_v10 = vpop.f32.mrf.mxu1  ;;  %1162 = vmatpush1.msra.mxu0 %v1127_v6 }
 0x343   :  { %v702_v11 = vrot.slane %v642_v8, 7  ;;  %v637_v12 = vadd.f32 %v636_v10, %v557_v9  ;;  %1163 = vmatprep.subr.mxu0 %v3952_v0  ;;  %v1125_v8 = vld [vmem:[%s4694_s27 + $0x58] sm:$0xff]  ;;  %v1124_v9 = vld [vmem:[%s4694_s27 + $0x50] sm:$0xff]  ;;  %v1123_v10 = vld [vmem:[%s4694_s27 + $0x48] sm:$0xff] }
 0x344   :  { %1164 = vmatpush1.msra.mxu0 %v1126_v7 }
 0x345   :  { %v701_v13 = vrot.slane %v637_v12, 7  ;;  %708 = vrot.lane.b32.xlu0 %v702_v11, %s3954_s0  ;;  %1165 = vmatprep.subr.mxu0 %v3952_v0  ;;  %v1121_v12 = vld [vmem:[%s4694_s27 + $0x38] sm:$0xff] }
 0x346   :  { %1166 = vmatpush1.msra.mxu0 %v1125_v8 }
 0x347   :  { %v703_v14 = vsel %vm677_vm2, %v701_v13, %v702_v11  ;;  %1167 = vmatprep.subr.mxu0 %v3952_v0 }
 0x348   :  { %706 = vrot.lane.b32.xlu1 %v703_v14, %s3954_s0  ;;  %1168 = vmatpush1.msra.mxu0 %v1124_v9 }
 0x349   :  { %704 = vrot.lane.b32.xlu0 %v701_v13, %s3954_s0  ;;  %1169 = vmatprep.subr.mxu0 %v3952_v0 }
 0x34a   :  { %1170 = vmatpush1.msra.mxu0 %v1123_v10 }
 0x34b   :  { %1171 = vmatprep.subr.mxu0 %v3952_v0 }
 0x34c   :  { %719 = vrot.lane.b32.xlu1 %v701_v13, %s3955_s19  ;;  %v1120_v13 = vld [vmem:[%s4694_s27 + $0x30] sm:$0xff] }
 0x34d   :  { %721 = vrot.lane.b32.xlu0 %v703_v14, %s3955_s19  ;;  %v1119_v14 = vld [vmem:[%s4694_s27 + $0x28] sm:$0xff] }
 0x350   :  { %723 = vrot.lane.b32.xlu1 %v702_v11, %s3955_s19  ;;  %v1122_v11 = vld [vmem:[%s4694_s27 + $0x40] sm:$0xff] }
 0x351   :  { %1172 = vmatpush1.msra.mxu0 %v1122_v11 }
 0x352   :  { %1173 = vmatprep.subr.mxu0 %v3952_v0 }
 0x353   :  { %1174 = vmatpush1.msra.mxu0 %v1121_v12  ;;  %v3118_v12 = vld [vmem:[#allocation12] ss:$0 sm:$0xff] }
 0x354   :  { %1175 = vmatprep.subr.mxu0 %v3952_v0 }
 0x355   :  { %1176 = vmatpush1.msra.mxu0 %v1120_v13 }
 0x356   :  { %1177 = vmatprep.subr.mxu0 %v3952_v0 }
 0x357   :  { %1178 = vmatpush1.msra.mxu0 %v1119_v14 }
 0x358   :  { %1179 = vmatprep.subr.mxu0 %v3952_v0 }
 0x3b7   :  { %v709_v15 = vpop.permute.xlu0 %708 }
 0x3b8   :  { %718 = vst.msk [vmem:[#allocation2 + $0x20] sm:$0x1] %vm717_vm5, %v709_v15  ;;  %v1118_v15 = vld [vmem:[%s4694_s27 + $0x20] sm:$0xff] }
 0x3b9   :  { %1180 = vmatpush1.msra.mxu0 %v1118_v15 }
 0x3ba   :  { %v707_v16 = vpop.permute.xlu1 %706  ;;  %1181 = vmatprep.subr.mxu0 %v3952_v0 }
 0x3bb   :  { %716 = vst.msk [vmem:[#allocation2 + $0x10] sm:$0xff] %vm715_vm6, %v707_v16  ;;  %v705_v17 = vpop.permute.xlu0 %704  ;;  %v1117_v16 = vld [vmem:[%s4694_s27 + $0x18] sm:$0xff] }
 0x3bc   :  { %714 = vst.msk [vmem:[#allocation2] sm:$0xfe] %vm713_vm7, %v705_v17  ;;  %1182 = vmatpush1.msra.mxu0 %v1117_v16 }
 0x3bd   :  { %1183 = vmatprep.subr.mxu0 %v3952_v0 }
 0x3be   :  { %v720_v18 = vpop.permute.xlu1 %719 }
 0x3bf   :  { %729 = vst.msk [vmem:[#allocation2 + $0x30] sm:$0xfe] %vm713_vm7, %v720_v18  ;;  %v722_v19 = vpop.permute.xlu0 %721  ;;  %v743_v20 = vld [vmem:[#allocation2 + $0x20] sm:$0x1]  ;;  %v1116_v18 = vld [vmem:[%s4694_s27 + $0x10] sm:$0xff] }
 0x3c0   :  { %730 = vst.msk [vmem:[#allocation2 + $0x40] sm:$0xff] %vm715_vm6, %v722_v19  ;;  %v757_v25 = vrot.slane %v743_v20, 1  ;;  %v783_v29 = vld [vmem:[#allocation2 + $0x20] sm:$0x3]  ;;  %1184 = vmatpush1.msra.mxu0 %v1116_v18 }
 0x3c1   :  { %v797_v37 = vrot.slane %v783_v29, 2  ;;  %v3112_v19 = vld [vmem:[#allocation10] ss:$0 sm:$0xff]  ;;  %1185 = vmatprep.subr.mxu0 %v3952_v0 }
 0x3c2   :  { %v724_v21 = vpop.permute.xlu1 %723  ;;  %v742_v22 = vld [vmem:[#allocation2 + $0x10] sm:$0xff] }
 0x3c3   :  { %731 = vst.msk [vmem:[#allocation2 + $0x50] sm:$0x1] %vm717_vm5, %v724_v21  ;;  %v755_v24 = vrot.slane %v742_v22, 1  ;;  %v741_v26 = vld [vmem:[#allocation2] sm:$0xfe]  ;;  %v795_v32 = vrot.slane %v742_v22, 2 }
 0x3c4   :  { %v781_v27 = vld [vmem:[#allocation2] sm:$0xfc]  ;;  %738 = vst.msk [vmem:[#allocation4 + $0x30] sm:$0xff] %vm736_vm8, %v742_v22  ;;  %v754_v28 = vrot.slane %v741_v26, 1  ;;  %v1115_v21 = vld [vmem:[%s4694_s27 + $0x8] sm:$0xff] }
 0x3c5   :  { %v732_v30 = vld [vmem:[#allocation2] sm:$0xff]  ;;  %v758_v31 = vsel %vm753_vm9, %v755_v24, %v757_v25  ;;  %v794_v35 = vrot.slane %v781_v27, 2  ;;  %v798_v40 = vsel %vm793_vm10, %v795_v32, %v797_v37  ;;  %1186 = vmatpush1.msra.mxu0 %v1115_v21  ;;  %v1137_v25 = vld [vmem:[%s4694_s27 + $0xb8] sm:$0xff] }
 0x3c6   :  { %737 = vst.msk [vmem:[#allocation4] sm:$0xff] %vm736_vm8, %v732_v30  ;;  %766 = vrot.lane.b32.xlu1 %v758_v31, %s3956_s26  ;;  %v756_v34 = vsel %vm753_vm9, %v754_v28, %v755_v24  ;;  %v734_v36 = vld [vmem:[#allocation2 + $0x30] sm:$0xff]  ;;  %1187 = vmatprep.subr.mxu0 %v3952_v0 }
 0x3c7   :  { %764 = vrot.lane.b32.xlu0 %v756_v34, %s3956_s26  ;;  %v745_v38 = vld [vmem:[#allocation2 + $0x40] sm:$0xff]  ;;  %v744_v39 = vld [vmem:[#allocation2 + $0x30] sm:$0xfe]  ;;  %739 = vst.msk [vmem:[#allocation4 + $0x60] sm:$0xff] %vm736_vm8, %v734_v36  ;;  %v796_v41 = vsel %vm793_vm10, %v794_v35, %v795_v32  ;;  %1188 = vmatpush1.msra.mxu0 %v1114_v23  ;;  %v1135_v32 = vld [vmem:[%s4694_s27 + $0xa8] sm:$0xff] }
 0x3c8   :  { %740 = vst.msk [vmem:[#allocation4 + $0x90] sm:$0xff] %vm736_vm8, %v745_v38  ;;  %v760_v43 = vrot.slane %v745_v38, 1  ;;  %v759_v44 = vrot.slane %v744_v39, 1  ;;  %v784_v47 = vld [vmem:[#allocation2 + $0x30] sm:$0xfc]  ;;  %v800_v51 = vrot.slane %v745_v38, 2  ;;  %1205 = vmatprep.subr.mxu0 %v3952_v0 }
 0x3c9   :  { %v799_v52 = vrot.slane %v784_v47, 2  ;;  %v1136_v28 = vld [vmem:[%s4694_s27 + $0xb0] sm:$0xff]  ;;  %1206 = vmatpush2.msra.mxu0 %v1137_v25  ;;  %v1134_v35 = vld [vmem:[%s4694_s27 + $0xa0] sm:$0xff] }
 0x3ca   :  { %806 = vrot.lane.b32.xlu1 %v798_v40, %s3957_s18  ;;  %v746_v42 = vld [vmem:[#allocation2 + $0x50] sm:$0x1]  ;;  %v761_v50 = vsel %vm753_vm9, %v759_v44, %v760_v43  ;;  %1207 = vmatprep.subr.mxu0 %v3952_v0 }
 0x3cb   :  { %v786_v45 = vld [vmem:[#allocation2 + $0x50] sm:$0x3]  ;;  %804 = vrot.lane.b32.xlu0 %v796_v41, %s3957_s18  ;;  %v762_v46 = vrot.slane %v746_v42, 1  ;;  %v801_v54 = vsel %vm793_vm10, %v799_v52, %v800_v51  ;;  %1208 = vmatpush2.msra.mxu0 %v1136_v28 }
 0x3cc   :  { %v802_v49 = vrot.slane %v786_v45, 2  ;;  %1209 = vmatprep.subr.mxu0 %v3952_v0 }
 0x3cd   :  { %v763_v48 = vsel %vm753_vm9, %v760_v43, %v762_v46  ;;  %1210 = vmatpush2.msra.mxu0 %v1135_v32 }
 0x3ce   :  { %770 = vrot.lane.b32.xlu1 %v763_v48, %s3956_s26  ;;  %v803_v53 = vsel %vm793_vm10, %v800_v51, %v802_v49  ;;  %1211 = vmatprep.subr.mxu0 %v3952_v0 }
 0x3cf   :  { %768 = vrot.lane.b32.xlu0 %v761_v50, %s3956_s26  ;;  %1212 = vmatpush2.msra.mxu0 %v1134_v35  ;;  %v1130_v35 = vld [vmem:[%s4694_s27 + $0x80] sm:$0xff] }
 0x3d0   :  { %1213 = vmatprep.subr.mxu0 %v3952_v0 }
 0x3d2   :  { %810 = vrot.lane.b32.xlu1 %v803_v53, %s3957_s18 }
 0x3d3   :  { %808 = vrot.lane.b32.xlu0 %v801_v54, %s3957_s18 }
 0x438   :  { %v767_v55 = vpop.permute.xlu1 %766 }
 0x439   :  { %778 = vst.msk [vmem:[#allocation4 + $0x30] sm:$0xff] %vm776_vm11, %v767_v55  ;;  %v765_v56 = vpop.permute.xlu0 %764 }
 0x43a   :  { %777 = vst.msk [vmem:[#allocation4] sm:$0xff] %vm776_vm11, %v765_v56 }
 0x43c   :  { %v807_v57 = vpop.permute.xlu1 %806 }
 0x43d   :  { %818 = vst.msk [vmem:[#allocation4 + $0x30] sm:$0xff] %vm816_vm12, %v807_v57  ;;  %v805_v58 = vpop.permute.xlu0 %804 }
 0x43e   :  { %817 = vst.msk [vmem:[#allocation4] sm:$0xff] %vm816_vm12, %v805_v58 }
 0x440   :  { %v771_v59 = vpop.permute.xlu1 %770 }
 0x441   :  { %780 = vst.msk [vmem:[#allocation4 + $0x90] sm:$0xff] %vm776_vm11, %v771_v59  ;;  %v769_v60 = vpop.permute.xlu0 %768 }
 0x442   :  { %779 = vst.msk [vmem:[#allocation4 + $0x60] sm:$0xff] %vm776_vm11, %v769_v60 }
 0x444   :  { %v811_v61 = vpop.permute.xlu1 %810  ;;  %v822_v1 = vld [vmem:[#allocation4 + $0x30] sm:$0xff] }
 0x445   :  { %820 = vst.msk [vmem:[#allocation4 + $0x90] sm:$0xff] %vm816_vm12, %v811_v61  ;;  %v809_v62 = vpop.permute.xlu0 %808  ;;  %v821_v63 = vld [vmem:[#allocation4] sm:$0xff] }
 0x446   :  { %819 = vst.msk [vmem:[#allocation4 + $0x60] sm:$0xff] %vm816_vm12, %v809_v62  ;;  %3383 = vmatprep.mubr.msk.f32.mxu1 %vm834_vm13, %v821_v63 }
 0x447   :  { %3384 = vmatmul.mubr.msk.f32.vlgmr.msra.gmra.mxu1 %vm834_vm13, %v822_v1 }
 0x44c   :  { %v824_v3 = vld [vmem:[#allocation4 + $0x90] sm:$0xff] }
 0x44d   :  { %v823_v2 = vld [vmem:[#allocation4 + $0x60] sm:$0xff] }
 0x44e   :  { %3386 = vmatprep.mubr.msk.f32.mxu1 %vm834_vm13, %v823_v2 }
 0x44f   :  { %3387 = vmatmul.mubr.msk.f32.gmra.mxu1 %vm834_vm13, %v824_v3 }
 0x507   :  { %v3385_v17 = vpop.f32.mrf.mxu1 }
 0x508   :  { %v922_v24 = vadd.f32 %v3385_v17, %v3112_v19  ;;  %v3119_v17 = vld [vmem:[#allocation13] ss:$0 sm:$0xff] }
 0x509   :  { %v916_v20 = vpop.f32.mrf.mxu1 }
 0x50a   :  { %v917_v22 = vadd.f32 %v3112_v19, %v916_v20  ;;  %v936_v29 = vmax.f32 %v922_v24, 0.0 }
 0x50c   :  { %v935_v26 = vmax.f32 %v917_v22, 0.0  ;;  %v941_v36 = vsel %vm939_vm14, %v936_v29, 0.0 }
 0x50e   :  { %v940_v33 = vsel %vm939_vm14, %v935_v26, 0.0 }
 0x50f   :  { %v3388_v27 = vpop.f32.mrf.mxu1  ;;  %v942_v39 = vadd.f32 %v941_v36, %v940_v33 }
 0x510   :  { %v932_v30 = vadd.f32 %v3388_v27, %v3112_v19 }
 0x511   :  { %v926_v31 = vpop.f32.mrf.mxu1 }
 0x512   :  { %v927_v34 = vadd.f32 %v3112_v19, %v926_v31  ;;  %v938_v37 = vmax.f32 %v932_v30, 0.0  ;;  %v1133_v30 = vld [vmem:[%s4694_s27 + $0x98] sm:$0xff]  ;;  %v1132_v31 = vld [vmem:[%s4694_s27 + $0x90] sm:$0xff] }
 0x513   :  { %1214 = vmatpush2.msra.mxu0 %v1133_v30  ;;  %v1421_v30 = vld [vmem:[%s4695_s6 + $0x88] sm:$0xff] }
 0x514   :  { %v937_v38 = vmax.f32 %v927_v34, 0.0  ;;  %v945_v42 = vsel %vm939_vm14, %v938_v37, 0.0  ;;  %1215 = vmatprep.subr.mxu0 %v3952_v0  ;;  %v1131_v34 = vld [vmem:[%s4694_s27 + $0x88] sm:$0xff] }
 0x515   :  { %1216 = vmatpush2.msra.mxu0 %v1132_v31  ;;  %v1420_v31 = vld [vmem:[%s4695_s6 + $0x80] sm:$0xff] }
 0x516   :  { %v943_v40 = vsel %vm939_vm14, %v937_v38, 0.0  ;;  %1217 = vmatprep.subr.mxu0 %v3952_v0 }
 0x517   :  { %v944_v41 = vadd.f32 %v943_v40, %v942_v39  ;;  %1218 = vmatpush2.msra.mxu0 %v1131_v34  ;;  %v1417_v34 = vld [vmem:[%s4695_s6 + $0x68] sm:$0xff] }
 0x518   :  { %1219 = vmatprep.subr.mxu0 %v3952_v0 }
 0x519   :  { %v946_v43 = vadd.f32 %v945_v42, %v944_v41  ;;  %1220 = vmatpush2.msra.mxu0 %v1130_v35  ;;  %v1416_v35 = vld [vmem:[%s4695_s6 + $0x60] sm:$0xff] }
 0x51b   :  { %v947_v44 = vrot.slane %v946_v43, 4 }
 0x51d   :  { %v948_v45 = vadd.f32 %v947_v44, %v946_v43 }
 0x51f   :  { %v949_v46 = vrot.slane %v948_v45, 2 }
 0x521   :  { %v950_v47 = vadd.f32 %v949_v46, %v948_v45 }
 0x523   :  { %v951_v48 = vrot.slane %v950_v47, 1 }
 0x525   :  { %v952_v49 = vadd.f32 %v951_v48, %v950_v47 }
 0x527   :  { %v954_v50 = vmul.f32 0.03125, %v952_v49 }
 0x529   :  { %v955_v51 = vsub.f32 %v935_v26, %v954_v50  ;;  %v956_v52 = vsub.f32 %v936_v29, %v954_v50  ;;  %v957_v53 = vsub.f32 %v937_v38, %v954_v50  ;;  %v958_v54 = vsub.f32 %v938_v37, %v954_v50 }
 0x52b   :  { %v959_v55 = vmul.f32 %v955_v51, %v955_v51  ;;  %v960_v56 = vmul.f32 %v956_v52, %v956_v52  ;;  %v961_v57 = vmul.f32 %v957_v53, %v957_v53  ;;  %v962_v58 = vmul.f32 %v958_v54, %v958_v54 }
 0x52d   :  { %v963_v59 = vsel %vm939_vm14, %v959_v55, 0.0  ;;  %v964_v60 = vsel %vm939_vm14, %v960_v56, 0.0  ;;  %v966_v62 = vsel %vm939_vm14, %v961_v57, 0.0  ;;  %v968_v1 = vsel %vm939_vm14, %v962_v58, 0.0 }
 0x52e   :  { %v965_v61 = vadd.f32 %v964_v60, %v963_v59 }
 0x530   :  { %v967_v63 = vadd.f32 %v966_v62, %v965_v61 }
 0x532   :  { %v969_v2 = vadd.f32 %v968_v1, %v967_v63 }
 0x534   :  { %v970_v3 = vrot.slane %v969_v2, 4 }
 0x536   :  { %v971_v4 = vadd.f32 %v970_v3, %v969_v2 }
 0x538   :  { %v972_v5 = vrot.slane %v971_v4, 2 }
 0x53a   :  { %v973_v6 = vadd.f32 %v972_v5, %v971_v4 }
 0x53c   :  { %v974_v7 = vrot.slane %v973_v6, 1 }
 0x53e   :  { %v975_v8 = vadd.f32 %v974_v7, %v973_v6 }
 0x540   :  { %v976_v9 = vmul.f32 0.03125, %v975_v8 }
 0x542   :  { %v977_v10 = vadd.f32 1e-05, %v976_v9 }
 0x544   :  { %3487 = vrsqrt.f32 %v977_v10 }
 0x551   :  { %v3488_v11 = vpop.eup %3487 }
 0x552   :  { %v979_v13 = vmul.f32 %v3488_v11, %v955_v51  ;;  %v980_v14 = vmul.f32 %v3488_v11, %v956_v52  ;;  %v981_v15 = vmul.f32 %v3488_v11, %v957_v53  ;;  %v982_v16 = vmul.f32 %v3488_v11, %v958_v54 }
 0x554   :  { %v990_v18 = vmul.f32 %v3118_v12, %v979_v13  ;;  %v991_v19 = vmul.f32 %v3118_v12, %v980_v14  ;;  %v992_v20 = vmul.f32 %v3118_v12, %v981_v15  ;;  %v993_v21 = vmul.f32 %v3118_v12, %v982_v16 }
 0x556   :  { %v1001_v22 = vadd.f32 %v3119_v17, %v990_v18  ;;  %v1002_v23 = vadd.f32 %v3119_v17, %v991_v19  ;;  %v1003_v24 = vadd.f32 %v3119_v17, %v992_v20  ;;  %v1004_v25 = vadd.f32 %v3119_v17, %v993_v21  ;;  %v1435_v17 = vld [vmem:[%s4695_s6 + $0xf8] sm:$0xff]  ;;  %v1434_v18 = vld [vmem:[%s4695_s6 + $0xf0] sm:$0xff]  ;;  %v1433_v19 = vld [vmem:[%s4695_s6 + $0xe8] sm:$0xff] }
 0x557   :  { %1512 = vmatprep.subr.mxu1 %v1435_v17  ;;  %v1432_v20 = vld [vmem:[%s4695_s6 + $0xe0] sm:$0xff]  ;;  %v1431_v21 = vld [vmem:[%s4695_s6 + $0xd8] sm:$0xff] }
 0x558   :  { %v1009_v26 = vrot.slane %v1001_v22, 7  ;;  %v1010_v27 = vrot.slane %v1002_v23, 7  ;;  %v1012_v28 = vrot.slane %v1003_v24, 7  ;;  %v1013_v29 = vrot.slane %v1004_v25, 7  ;;  %1513 = vmatpush1.msra.mxu1 %v1434_v18  ;;  %v1430_v22 = vld [vmem:[%s4695_s6 + $0xd0] sm:$0xff]  ;;  %v1429_v23 = vld [vmem:[%s4695_s6 + $0xc8] sm:$0xff] }
 0x559   :  { %1514 = vmatprep.subr.mxu1 %v1433_v19  ;;  %v1427_v24 = vld [vmem:[%s4695_s6 + $0xb8] sm:$0xff]  ;;  %v1426_v25 = vld [vmem:[%s4695_s6 + $0xb0] sm:$0xff] }
 0x55a   :  { %v1011_v32 = vsel %vm677_vm2, %v1009_v26, %v1010_v27  ;;  %v1014_v33 = vsel %vm677_vm2, %v1012_v28, %v1013_v29  ;;  %1022 = vst.msk [vmem:[#allocation3] sm:$0xfe] %vm1021_vm15, %v1009_v26  ;;  %1026 = vst.msk [vmem:[#allocation3 + $0x30] sm:$0xfe] %vm1021_vm15, %v1012_v28  ;;  %1515 = vmatpush1.msra.mxu1 %v1432_v20  ;;  %v1425_v26 = vld [vmem:[%s4695_s6 + $0xa8] sm:$0xff]  ;;  %v1423_v28 = vld [vmem:[%s4695_s6 + $0x98] sm:$0xff] }
 0x55b   :  { %1025 = vst.msk [vmem:[#allocation3 + $0x20] sm:$0x1] %vm1024_vm0, %v1010_v27  ;;  %1028 = vst.msk [vmem:[#allocation3 + $0x50] sm:$0x1] %vm1024_vm0, %v1013_v29  ;;  %1516 = vmatprep.subr.mxu1 %v1431_v21  ;;  %v1424_v27 = vld [vmem:[%s4695_s6 + $0xa0] sm:$0xff]  ;;  %v1422_v29 = vld [vmem:[%s4695_s6 + $0x90] sm:$0xff] }
 0x55c   :  { %1023 = vst.msk [vmem:[#allocation3 + $0x10] sm:$0xff] %vm939_vm14, %v1011_v32  ;;  %1027 = vst.msk [vmem:[#allocation3 + $0x40] sm:$0xff] %vm939_vm14, %v1014_v33  ;;  %1517 = vmatpush1.msra.mxu1 %v1430_v22  ;;  %v1419_v32 = vld [vmem:[%s4695_s6 + $0x78] sm:$0xff]  ;;  %v1418_v33 = vld [vmem:[%s4695_s6 + $0x70] sm:$0xff] }
 0x55d   :  { %1518 = vmatprep.subr.mxu1 %v1429_v23  ;;  %v1483_v17 = vld [vmem:[%s4695_s6 + $0x278] sm:$0xff]  ;;  %v1482_v19 = vld [vmem:[%s4695_s6 + $0x270] sm:$0xff]  ;;  %v1481_v21 = vld [vmem:[%s4695_s6 + $0x268] sm:$0xff] }
 0x55e   :  { %v1451_v18 = vld [vmem:[%s4695_s6 + $0x178] sm:$0xff]  ;;  %v1450_v20 = vld [vmem:[%s4695_s6 + $0x170] sm:$0xff]  ;;  %v1449_v22 = vld [vmem:[%s4695_s6 + $0x168] sm:$0xff] }
 0x55f   :  { %v1480_v23 = vld [vmem:[%s4695_s6 + $0x260] sm:$0xff] }
 0x561   :  { %v1037_v37 = vld [vmem:[#allocation3] sm:$0xfe]  ;;  %v1040_v46 = vld [vmem:[#allocation3 + $0x30] sm:$0xfe] }
 0x562   :  { %v1039_v36 = vld [vmem:[#allocation3 + $0x20] sm:$0x1]  ;;  %v1042_v38 = vld [vmem:[#allocation3 + $0x50] sm:$0x1]  ;;  %v1049_v41 = vrot.slane %v1037_v37, 1  ;;  %v1054_v55 = vrot.slane %v1040_v46, 1 }
 0x563   :  { %v1038_v39 = vld [vmem:[#allocation3 + $0x10] sm:$0xff]  ;;  %v1052_v40 = vrot.slane %v1039_v36, 1  ;;  %v1041_v42 = vld [vmem:[#allocation3 + $0x40] sm:$0xff]  ;;  %v1057_v45 = vrot.slane %v1042_v38, 1  ;;  %v1415_v36 = vld [vmem:[%s4695_s6 + $0x58] sm:$0xff] }
 0x564   :  { %v1029_v43 = vld [vmem:[#allocation3] sm:$0xff]  ;;  %v1050_v44 = vrot.slane %v1038_v39, 1  ;;  %1034 = vst.msk [vmem:[#allocation4 + $0x30] sm:$0xff] %vm939_vm14, %v1038_v39  ;;  %1036 = vst.msk [vmem:[#allocation4 + $0x90] sm:$0xff] %vm939_vm14, %v1041_v42  ;;  %v1055_v48 = vrot.slane %v1041_v42, 1  ;;  %v1089_v50 = vrot.slane %v1038_v39, 2 }
 0x565   :  { %v1076_v47 = vld [vmem:[#allocation3] sm:$0xfc]  ;;  %1033 = vst.msk [vmem:[#allocation4] sm:$0xff] %vm939_vm14, %v1029_v43  ;;  %v1031_v51 = vld [vmem:[#allocation3 + $0x30] sm:$0xff]  ;;  %v1078_v52 = vld [vmem:[#allocation3 + $0x20] sm:$0x3] }
 0x566   :  { %v1088_v49 = vrot.slane %v1076_v47, 2  ;;  %v1053_v53 = vsel %vm753_vm9, %v1050_v44, %v1052_v40  ;;  %v1051_v54 = vsel %vm753_vm9, %v1049_v41, %v1050_v44  ;;  %1035 = vst.msk [vmem:[#allocation4 + $0x60] sm:$0xff] %vm939_vm14, %v1031_v51  ;;  %v1091_v56 = vrot.slane %v1078_v52, 2  ;;  %v1079_v57 = vld [vmem:[#allocation3 + $0x30] sm:$0xfc]  ;;  %v1413_v38 = vld [vmem:[%s4695_s6 + $0x48] sm:$0xff] }
 0x567   :  { %v1081_v58 = vld [vmem:[#allocation3 + $0x50] sm:$0x3]  ;;  %1061 = vrot.lane.b32.xlu1 %v1053_v53, %s3958_s29  ;;  %1059 = vrot.lane.b32.xlu0 %v1051_v54, %s3958_s29  ;;  %v1093_v60 = vrot.slane %v1079_v57, 2  ;;  %v1094_v61 = vrot.slane %v1041_v42, 2  ;;  %v1058_v2 = vsel %vm753_vm9, %v1055_v48, %v1057_v45  ;;  %v1056_v3 = vsel %vm753_vm9, %v1054_v55, %v1055_v48  ;;  %v1412_v39 = vld [vmem:[%s4695_s6 + $0x40] sm:$0xff]  ;;  %v1411_v40 = vld [vmem:[%s4695_s6 + $0x38] sm:$0xff] }
 0x568   :  { %v1090_v59 = vsel %vm793_vm10, %v1088_v49, %v1089_v50  ;;  %v1092_v62 = vsel %vm793_vm10, %v1089_v50, %v1091_v56  ;;  %v1096_v63 = vrot.slane %v1081_v58, 2  ;;  %v1414_v37 = vld [vmem:[%s4695_s6 + $0x50] sm:$0xff]  ;;  %v1409_v42 = vld [vmem:[%s4695_s6 + $0x28] sm:$0xff]  ;;  %v1408_v43 = vld [vmem:[%s4695_s6 + $0x20] sm:$0xff] }
 0x569   :  { %1102 = vst.msk [vmem:[#allocation4 + $0x8] sm:$0xff] %vm939_vm14, %v1090_v59  ;;  %1103 = vst.msk [vmem:[#allocation4 + $0x38] sm:$0xff] %vm939_vm14, %v1092_v62  ;;  %v1095_v1 = vsel %vm793_vm10, %v1093_v60, %v1094_v61  ;;  %v1410_v41 = vld [vmem:[%s4695_s6 + $0x30] sm:$0xff]  ;;  %v1407_v44 = vld [vmem:[%s4695_s6 + $0x18] sm:$0xff] }
 0x56a   :  { %1104 = vst.msk [vmem:[#allocation4 + $0x68] sm:$0xff] %vm939_vm14, %v1095_v1  ;;  %v1097_v4 = vsel %vm793_vm10, %v1094_v61, %v1096_v63  ;;  %v1406_v45 = vld [vmem:[%s4695_s6 + $0x10] sm:$0xff]  ;;  %v1405_v46 = vld [vmem:[%s4695_s6 + $0x8] sm:$0xff]  ;;  %v1404_v47 = vld [vmem:[%s4695_s6] sm:$0xff] }
 0x56b   :  { %1065 = vrot.lane.b32.xlu1 %v1058_v2, %s3958_s29  ;;  %1063 = vrot.lane.b32.xlu0 %v1056_v3, %s3958_s29  ;;  %1105 = vst.msk [vmem:[#allocation4 + $0x98] sm:$0xff] %vm939_vm14, %v1097_v4  ;;  %v1499_v48 = vld [vmem:[%s4695_s6 + $0x2f8] sm:$0xff]  ;;  %v1498_v50 = vld [vmem:[%s4695_s6 + $0x2f0] sm:$0xff] }
 0x56c   :  { %1601 = vmatprep.subr.mxu0 %v1499_v48  ;;  %v1467_v49 = vld [vmem:[%s4695_s6 + $0x1f8] sm:$0xff]  ;;  %v1466_v51 = vld [vmem:[%s4695_s6 + $0x1f0] sm:$0xff]  ;;  %v1497_v52 = vld [vmem:[%s4695_s6 + $0x2e8] sm:$0xff] }
 0x56d   :  { %v1465_v53 = vld [vmem:[%s4695_s6 + $0x1e8] sm:$0xff]  ;;  %v1496_v54 = vld [vmem:[%s4695_s6 + $0x2e0] sm:$0xff]  ;;  %v1495_v56 = vld [vmem:[%s4695_s6 + $0x2d8] sm:$0xff] }
 0x56e   :  { %v1464_v55 = vld [vmem:[%s4695_s6 + $0x1e0] sm:$0xff]  ;;  %v1463_v57 = vld [vmem:[%s4695_s6 + $0x1d8] sm:$0xff]  ;;  %v1494_v58 = vld [vmem:[%s4695_s6 + $0x2d0] sm:$0xff] }
 0x56f   :  { %v1462_v59 = vld [vmem:[%s4695_s6 + $0x1d0] sm:$0xff]  ;;  %v1493_v60 = vld [vmem:[%s4695_s6 + $0x2c8] sm:$0xff]  ;;  %v1492_v62 = vld [vmem:[%s4695_s6 + $0x2c0] sm:$0xff] }
 0x570   :  { %v1107_v5 = vld [vmem:[#allocation4 + $0x8] sm:$0xff]  ;;  %v1109_v11 = vld [vmem:[#allocation4 + $0x38] sm:$0xff]  ;;  %v1460_v63 = vld [vmem:[%s4695_s6 + $0x1c0] sm:$0xff] }
 0x571   :  { %3121 = vmatprep.mubr.msk.f32.mxu0 %vm939_vm14, %v1107_v5  ;;  %v1111_v13 = vld [vmem:[#allocation4 + $0x68] sm:$0xff]  ;;  %v1491_v1 = vld [vmem:[%s4695_s6 + $0x2b8] sm:$0xff]  ;;  %v1490_v3 = vld [vmem:[%s4695_s6 + $0x2b0] sm:$0xff] }
 0x572   :  { %v1113_v15 = vld [vmem:[#allocation4 + $0x98] sm:$0xff]  ;;  %v1461_v61 = vld [vmem:[%s4695_s6 + $0x1c8] sm:$0xff]  ;;  %v1458_v4 = vld [vmem:[%s4695_s6 + $0x1b0] sm:$0xff] }
 0x573   :  { %v1459_v2 = vld [vmem:[%s4695_s6 + $0x1b8] sm:$0xff]  ;;  %v1489_v5 = vld [vmem:[%s4695_s6 + $0x2a8] sm:$0xff] }
 0x5d9   :  { %v1062_v6 = vpop.permute.xlu1 %1061  ;;  %v1060_v7 = vpop.permute.xlu0 %1059 }
 0x5da   :  { %1073 = vst.msk [vmem:[#allocation4 + $0x30] sm:$0xff] %vm1071_vm1, %v1062_v6  ;;  %1072 = vst.msk [vmem:[#allocation4] sm:$0xff] %vm1071_vm1, %v1060_v7  ;;  %v1457_v6 = vld [vmem:[%s4695_s6 + $0x1a8] sm:$0xff]  ;;  %v1488_v7 = vld [vmem:[%s4695_s6 + $0x2a0] sm:$0xff] }
 0x5dd   :  { %v1066_v8 = vpop.permute.xlu1 %1065  ;;  %v1064_v9 = vpop.permute.xlu0 %1063 }
 0x5de   :  { %1075 = vst.msk [vmem:[#allocation4 + $0x90] sm:$0xff] %vm1071_vm1, %v1066_v8  ;;  %1074 = vst.msk [vmem:[#allocation4 + $0x60] sm:$0xff] %vm1071_vm1, %v1064_v9  ;;  %v1456_v8 = vld [vmem:[%s4695_s6 + $0x1a0] sm:$0xff]  ;;  %v1487_v9 = vld [vmem:[%s4695_s6 + $0x298] sm:$0xff] }
 0x5e1   :  { %v1106_v10 = vld [vmem:[#allocation4] sm:$0xff]  ;;  %v1108_v12 = vld [vmem:[#allocation4 + $0x30] sm:$0xff] }
 0x5e2   :  { %1222 = vmatmul.mubr.f32.vlgmr.msra.gmra.mxu0 %v1106_v10  ;;  %v1455_v10 = vld [vmem:[%s4695_s6 + $0x198] sm:$0xff] }
 0x5e3   :  { %3122 = vmatprep.mubr.msk.f32.mxu0 %vm939_vm14, %v1109_v11  ;;  %1602 = vmatpush1.msra.mxu0 %v1498_v50  ;;  %v1486_v11 = vld [vmem:[%s4695_s6 + $0x290] sm:$0xff]  ;;  %v3120_v50 = vld [vmem:[#allocation15] ss:$0 sm:$0xff] }
 0x5e4   :  { %1603 = vmatprep.subr.mxu0 %v1497_v52 }
 0x5e5   :  { %v1110_v14 = vld [vmem:[#allocation4 + $0x60] sm:$0xff]  ;;  %v1112_v16 = vld [vmem:[#allocation4 + $0x90] sm:$0xff]  ;;  %1604 = vmatpush1.msra.mxu0 %v1496_v54 }
 0x5e6   :  { %1227 = vmatmul.mubr.f32.gmra.mxu0 %v1108_v12  ;;  %1605 = vmatprep.subr.mxu0 %v1495_v56  ;;  %v1454_v12 = vld [vmem:[%s4695_s6 + $0x190] sm:$0xff] }
 0x5e7   :  { %3123 = vmatprep.mubr.msk.f32.mxu0 %vm939_vm14, %v1111_v13  ;;  %1606 = vmatpush1.msra.mxu0 %v1494_v58  ;;  %v1485_v13 = vld [vmem:[%s4695_s6 + $0x288] sm:$0xff] }
 0x5e8   :  { %1607 = vmatprep.subr.mxu0 %v1493_v60 }
 0x5e9   :  { %1608 = vmatpush1.msra.mxu0 %v1492_v62 }
 0x5ea   :  { %1232 = vmatmul.mubr.f32.gmra.mxu0 %v1110_v14  ;;  %1609 = vmatprep.subr.mxu0 %v1491_v1  ;;  %v1453_v14 = vld [vmem:[%s4695_s6 + $0x188] sm:$0xff] }
 0x5eb   :  { %3124 = vmatprep.mubr.msk.f32.mxu0 %vm939_vm14, %v1113_v15  ;;  %1610 = vmatpush1.msra.mxu0 %v1490_v3  ;;  %v1484_v15 = vld [vmem:[%s4695_s6 + $0x280] sm:$0xff] }
 0x5ec   :  { %1611 = vmatprep.subr.mxu0 %v1489_v5 }
 0x5ed   :  { %1612 = vmatpush1.msra.mxu0 %v1488_v7 }
 0x5ee   :  { %1237 = vmatmul.mubr.f32.gmra.mxu0 %v1112_v16  ;;  %1613 = vmatprep.subr.mxu0 %v1487_v9  ;;  %v1452_v16 = vld [vmem:[%s4695_s6 + $0x180] sm:$0xff] }
 0x5ef   :  { %1665 = vmatprep.mubr.f32.mxu0 %v3952_v0  ;;  %v1428_v0 = vld [vmem:[%s4695_s6 + $0xc0] sm:$0xff]  ;;  %1614 = vmatpush1.msra.mxu0 %v1486_v11 }
 0x5f0   :  { %1519 = vmatpush1.msra.mxu1 %v1428_v0  ;;  %1615 = vmatprep.subr.mxu0 %v1485_v13  ;;  %v1448_v0 = vld [vmem:[%s4695_s6 + $0x160] sm:$0xff] }
 0x5f1   :  { %1520 = vmatprep.subr.mxu1 %v1427_v24  ;;  %1616 = vmatpush1.msra.mxu0 %v1484_v15  ;;  %v1479_v24 = vld [vmem:[%s4695_s6 + $0x258] sm:$0xff] }
 0x5f2   :  { %1521 = vmatpush1.msra.mxu1 %v1426_v25  ;;  %1617 = vmatprep.subr.mxu0 %v1483_v17  ;;  %v1447_v25 = vld [vmem:[%s4695_s6 + $0x158] sm:$0xff] }
 0x5f3   :  { %1522 = vmatprep.subr.mxu1 %v1425_v26  ;;  %1618 = vmatpush1.msra.mxu0 %v1482_v19  ;;  %v1478_v26 = vld [vmem:[%s4695_s6 + $0x250] sm:$0xff] }
 0x5f4   :  { %1523 = vmatpush1.msra.mxu1 %v1424_v27  ;;  %1619 = vmatprep.subr.mxu0 %v1481_v21  ;;  %v1446_v27 = vld [vmem:[%s4695_s6 + $0x150] sm:$0xff] }
 0x5f5   :  { %1524 = vmatprep.subr.mxu1 %v1423_v28  ;;  %1620 = vmatpush1.msra.mxu0 %v1480_v23  ;;  %v1477_v28 = vld [vmem:[%s4695_s6 + $0x248] sm:$0xff] }
 0x5f6   :  { %1525 = vmatpush1.msra.mxu1 %v1422_v29  ;;  %1621 = vmatprep.subr.mxu0 %v1479_v24  ;;  %v1445_v29 = vld [vmem:[%s4695_s6 + $0x148] sm:$0xff] }
 0x5f7   :  { %1526 = vmatprep.subr.mxu1 %v1421_v30  ;;  %v1476_v30 = vld [vmem:[%s4695_s6 + $0x240] sm:$0xff]  ;;  %1622 = vmatpush1.msra.mxu0 %v1478_v26 }
 0x5f8   :  { %1527 = vmatpush1.msra.mxu1 %v1420_v31  ;;  %v1444_v31 = vld [vmem:[%s4695_s6 + $0x140] sm:$0xff]  ;;  %1623 = vmatprep.subr.mxu0 %v1477_v28 }
 0x5f9   :  { %1528 = vmatprep.subr.mxu1 %v1419_v32  ;;  %v1475_v32 = vld [vmem:[%s4695_s6 + $0x238] sm:$0xff]  ;;  %1624 = vmatpush1.msra.mxu0 %v1476_v30 }
 0x5fa   :  { %1529 = vmatpush1.msra.mxu1 %v1418_v33  ;;  %v1443_v33 = vld [vmem:[%s4695_s6 + $0x138] sm:$0xff]  ;;  %1625 = vmatprep.subr.mxu0 %v1475_v32 }
 0x5fb   :  { %1530 = vmatprep.subr.mxu1 %v1417_v34  ;;  %v1474_v34 = vld [vmem:[%s4695_s6 + $0x230] sm:$0xff] }
 0x5fc   :  { %1531 = vmatpush1.msra.mxu1 %v1416_v35  ;;  %v1442_v35 = vld [vmem:[%s4695_s6 + $0x130] sm:$0xff]  ;;  %1626 = vmatpush1.msra.mxu0 %v1474_v34 }
 0x5fd   :  { %1532 = vmatprep.subr.mxu1 %v1415_v36  ;;  %v1473_v36 = vld [vmem:[%s4695_s6 + $0x228] sm:$0xff] }
 0x5fe   :  { %1533 = vmatpush1.msra.mxu1 %v1414_v37  ;;  %v1441_v37 = vld [vmem:[%s4695_s6 + $0x128] sm:$0xff]  ;;  %1627 = vmatprep.subr.mxu0 %v1473_v36 }
 0x5ff   :  { %1534 = vmatprep.subr.mxu1 %v1413_v38  ;;  %v1472_v38 = vld [vmem:[%s4695_s6 + $0x220] sm:$0xff]  ;;  %v3126_v36 = vld [vmem:[#allocation18] ss:$0 sm:$0xff] }
 0x600   :  { %1535 = vmatpush1.msra.mxu1 %v1412_v39  ;;  %v1440_v39 = vld [vmem:[%s4695_s6 + $0x120] sm:$0xff]  ;;  %1628 = vmatpush1.msra.mxu0 %v1472_v38 }
 0x601   :  { %1536 = vmatprep.subr.mxu1 %v1411_v40  ;;  %v1471_v40 = vld [vmem:[%s4695_s6 + $0x218] sm:$0xff] }
 0x602   :  { %1537 = vmatpush1.msra.mxu1 %v1410_v41  ;;  %v1439_v41 = vld [vmem:[%s4695_s6 + $0x118] sm:$0xff]  ;;  %1629 = vmatprep.subr.mxu0 %v1471_v40 }
 0x603   :  { %1538 = vmatprep.subr.mxu1 %v1409_v42  ;;  %v1470_v42 = vld [vmem:[%s4695_s6 + $0x210] sm:$0xff] }
 0x604   :  { %1539 = vmatpush1.msra.mxu1 %v1408_v43  ;;  %v1438_v43 = vld [vmem:[%s4695_s6 + $0x110] sm:$0xff]  ;;  %1630 = vmatpush1.msra.mxu0 %v1470_v42 }
 0x605   :  { %1540 = vmatprep.subr.mxu1 %v1407_v44  ;;  %v1469_v44 = vld [vmem:[%s4695_s6 + $0x208] sm:$0xff] }
 0x606   :  { %1541 = vmatpush1.msra.mxu1 %v1406_v45  ;;  %v1437_v45 = vld [vmem:[%s4695_s6 + $0x108] sm:$0xff]  ;;  %1631 = vmatprep.subr.mxu0 %v1469_v44 }
 0x607   :  { %1542 = vmatprep.subr.mxu1 %v1405_v46  ;;  %v1468_v46 = vld [vmem:[%s4695_s6 + $0x200] sm:$0xff] }
 0x608   :  { %1543 = vmatpush1.msra.mxu1 %v1404_v47  ;;  %v1436_v47 = vld [vmem:[%s4695_s6 + $0x100] sm:$0xff]  ;;  %1632 = vmatpush1.msra.mxu0 %v1468_v46 }
 0x609   :  { %1544 = vmatprep.subr.mxu1 %v1467_v49 }
 0x60a   :  { %1545 = vmatpush2.msra.mxu1 %v1466_v51 }
 0x60b   :  { %1546 = vmatprep.subr.mxu1 %v1465_v53 }
 0x60c   :  { %1547 = vmatpush2.msra.mxu1 %v1464_v55 }
 0x60d   :  { %1548 = vmatprep.subr.mxu1 %v1463_v57 }
 0x60e   :  { %1549 = vmatpush2.msra.mxu1 %v1462_v59 }
 0x60f   :  { %1550 = vmatprep.subr.mxu1 %v1461_v61 }
 0x610   :  { %1551 = vmatpush2.msra.mxu1 %v1460_v63 }
 0x611   :  { %1552 = vmatprep.subr.mxu1 %v1459_v2 }
 0x612   :  { %1553 = vmatpush2.msra.mxu1 %v1458_v4 }
 0x613   :  { %1554 = vmatprep.subr.mxu1 %v1457_v6 }
 0x614   :  { %1555 = vmatpush2.msra.mxu1 %v1456_v8 }
 0x615   :  { %1556 = vmatprep.subr.mxu1 %v1455_v10 }
 0x616   :  { %1557 = vmatpush2.msra.mxu1 %v1454_v12 }
 0x617   :  { %1558 = vmatprep.subr.mxu1 %v1453_v14 }
 0x618   :  { %1559 = vmatpush2.msra.mxu1 %v1452_v16 }
 0x619   :  { %1560 = vmatprep.subr.mxu1 %v1451_v18 }
 0x61a   :  { %1561 = vmatpush2.msra.mxu1 %v1450_v20 }
 0x61b   :  { %1562 = vmatprep.subr.mxu1 %v1449_v22 }
 0x61c   :  { %1563 = vmatpush2.msra.mxu1 %v1448_v0 }
 0x61d   :  { %1564 = vmatprep.subr.mxu1 %v1447_v25 }
 0x61e   :  { %1565 = vmatpush2.msra.mxu1 %v1446_v27 }
 0x61f   :  { %1566 = vmatprep.subr.mxu1 %v1445_v29 }
 0x620   :  { %1567 = vmatpush2.msra.mxu1 %v1444_v31  ;;  %v3125_v31 = vld [vmem:[#allocation16] ss:$0 sm:$0xff] }
 0x621   :  { %1568 = vmatprep.subr.mxu1 %v1443_v33 }
 0x622   :  { %1569 = vmatpush2.msra.mxu1 %v1442_v35 }
 0x623   :  { %1570 = vmatprep.subr.mxu1 %v1441_v37 }
 0x624   :  { %1571 = vmatpush2.msra.mxu1 %v1440_v39 }
 0x625   :  { %1572 = vmatprep.subr.mxu1 %v1439_v41 }
 0x626   :  { %1573 = vmatpush2.msra.mxu1 %v1438_v43 }
 0x627   :  { %1574 = vmatprep.subr.mxu1 %v1437_v45 }
 0x628   :  { %1575 = vmatpush2.msra.mxu1 %v1436_v47 }
 0x6a2   :  { %v1223_v48 = vpop.f32.mrf.mxu0 }
 0x6a3   :  { %v1224_v54 = vadd.f32 %v3120_v50, %v1223_v48 }
 0x6a4   :  { %v1225_v49 = vpop.f32.mrf.mxu0 }
 0x6a5   :  { %v1242_v59 = vmax.f32 %v1224_v54, 0.0 }
 0x6a6   :  { %v1228_v51 = vpop.f32.mrf.mxu0 }
 0x6a7   :  { %v1229_v52 = vadd.f32 %v3120_v50, %v1228_v51 }
 0x6a8   :  { %v1230_v53 = vpop.f32.mrf.mxu0 }
 0x6a9   :  { %v1243_v56 = vmax.f32 %v1229_v52, 0.0 }
 0x6aa   :  { %v1233_v55 = vpop.f32.mrf.mxu0 }
 0x6ab   :  { %v1234_v57 = vadd.f32 %v3120_v50, %v1233_v55  ;;  %v1246_v62 = vadd.f32 %v1243_v56, %v1242_v59 }
 0x6ac   :  { %v1235_v58 = vpop.f32.mrf.mxu0 }
 0x6ad   :  { %v1244_v60 = vmax.f32 %v1234_v57, 0.0 }
 0x6ae   :  { %v1238_v61 = vpop.f32.mrf.mxu0 }
 0x6af   :  { %v1239_v63 = vadd.f32 %v3120_v50, %v1238_v61  ;;  %v1247_v2 = vadd.f32 %v1246_v62, %v1244_v60 }
 0x6b0   :  { %v1240_v1 = vpop.f32.mrf.mxu0 }
 0x6b1   :  { %v1245_v3 = vmax.f32 %v1239_v63, 0.0 }
 0x6b3   :  { %v1248_v4 = vadd.f32 %v1247_v2, %v1245_v3 }
 0x6b5   :  { %v1249_v5 = vrot.slane %v1248_v4, 4 }
 0x6b7   :  { %v1250_v6 = vadd.f32 %v1249_v5, %v1248_v4  ;;  %v3499_v4 = vld [vmem:[#allocation2 + $0x8] sm:$0xff] }
 0x6b9   :  { %v1251_v7 = vrot.slane %v1250_v6, 2 }
 0x6bb   :  { %v1252_v8 = vadd.f32 %v1251_v7, %v1250_v6 }
 0x6bd   :  { %v1253_v9 = vrot.slane %v1252_v8, 1 }
 0x6bf   :  { %v1254_v10 = vadd.f32 %v1253_v9, %v1252_v8 }
 0x6c1   :  { %v1255_v11 = vmul.f32 0.03125, %v1254_v10 }
 0x6c3   :  { %v1256_v12 = vsub.f32 %v1242_v59, %v1255_v11  ;;  %v1257_v13 = vsub.f32 %v1243_v56, %v1255_v11  ;;  %v1258_v14 = vsub.f32 %v1244_v60, %v1255_v11  ;;  %v1259_v15 = vsub.f32 %v1245_v3, %v1255_v11 }
 0x6c5   :  { %v1260_v16 = vmul.f32 %v1256_v12, %v1256_v12  ;;  %v1261_v17 = vmul.f32 %v1257_v13, %v1257_v13  ;;  %v1262_v18 = vmul.f32 %v1258_v14, %v1258_v14  ;;  %v1263_v20 = vmul.f32 %v1259_v15, %v1259_v15 }
 0x6c7   :  { %v1264_v19 = vadd.f32 %v1261_v17, %v1260_v16 }
 0x6c9   :  { %v1265_v21 = vadd.f32 %v1264_v19, %v1262_v18  ;;  %v2041_v19 = vld [vmem:[#allocation22 + $0xf8] sm:$0xff] }
 0x6ca   :  { %3158 = vmatprep.subr.mxu1 %v2041_v19  ;;  %v2042_v19 = vld [vmem:[#allocation22 + $0x100] sm:$0xff] }
 0x6cb   :  { %v1266_v22 = vadd.f32 %v1265_v21, %v1263_v20  ;;  %v2025_v20 = vld [vmem:[#allocation22 + $0x78] sm:$0xff]  ;;  %v2040_v21 = vld [vmem:[#allocation22 + $0xf0] sm:$0xff] }
 0x6cd   :  { %v1267_v23 = vrot.slane %v1266_v22, 4 }
 0x6cf   :  { %v1268_v0 = vadd.f32 %v1267_v23, %v1266_v22  ;;  %v2024_v22 = vld [vmem:[#allocation22 + $0x70] sm:$0xff]  ;;  %v2039_v23 = vld [vmem:[#allocation22 + $0xe8] sm:$0xff] }
 0x6d1   :  { %v1269_v24 = vrot.slane %v1268_v0, 2 }
 0x6d3   :  { %v1270_v25 = vadd.f32 %v1269_v24, %v1268_v0  ;;  %v2073_v0 = vld [vmem:[#allocation22 + $0x1f8] sm:$0xff]  ;;  %v2023_v24 = vld [vmem:[#allocation22 + $0x68] sm:$0xff] }
 0x6d4   :  { %3202 = vmatprep.subr.mxu0 %v2073_v0 }
 0x6d5   :  { %v1271_v26 = vrot.slane %v1270_v25, 1 }
 0x6d7   :  { %v1272_v27 = vadd.f32 %v1271_v26, %v1270_v25  ;;  %v2057_v25 = vld [vmem:[#allocation22 + $0x178] sm:$0xff]  ;;  %v2038_v26 = vld [vmem:[#allocation22 + $0xe0] sm:$0xff] }
 0x6d9   :  { %v1273_v28 = vmul.f32 0.03125, %v1272_v27  ;;  %v2072_v27 = vld [vmem:[#allocation22 + $0x1f0] sm:$0xff] }
 0x6db   :  { %v1274_v29 = vadd.f32 1e-05, %v1273_v28  ;;  %v2022_v28 = vld [vmem:[#allocation22 + $0x60] sm:$0xff] }
 0x6dd   :  { %3489 = vrsqrt.f32 %v1274_v29  ;;  %v2056_v29 = vld [vmem:[#allocation22 + $0x170] sm:$0xff] }
 0x6ea   :  { %v3490_v30 = vpop.eup %3489 }
 0x6eb   :  { %v1276_v32 = vmul.f32 %v3490_v30, %v1256_v12  ;;  %v1277_v33 = vmul.f32 %v3490_v30, %v1257_v13  ;;  %v1278_v34 = vmul.f32 %v3490_v30, %v1258_v14  ;;  %v1279_v35 = vmul.f32 %v3490_v30, %v1259_v15  ;;  %v2037_v30 = vld [vmem:[#allocation22 + $0xd8] sm:$0xff] }
 0x6ed   :  { %v1287_v37 = vmul.f32 %v3125_v31, %v1276_v32  ;;  %v1288_v38 = vmul.f32 %v3125_v31, %v1277_v33  ;;  %v1289_v39 = vmul.f32 %v3125_v31, %v1278_v34  ;;  %v1290_v40 = vmul.f32 %v3125_v31, %v1279_v35  ;;  %v2071_v31 = vld [vmem:[#allocation22 + $0x1e8] sm:$0xff]  ;;  %v2021_v32 = vld [vmem:[#allocation22 + $0x58] sm:$0xff]  ;;  %v2036_v34 = vld [vmem:[#allocation22 + $0xd0] sm:$0xff] }
 0x6ee   :  { %v2055_v33 = vld [vmem:[#allocation22 + $0x168] sm:$0xff]  ;;  %v2070_v35 = vld [vmem:[#allocation22 + $0x1e0] sm:$0xff] }
 0x6ef   :  { %v1298_v41 = vadd.f32 %v3126_v36, %v1287_v37  ;;  %v1299_v42 = vadd.f32 %v3126_v36, %v1288_v38  ;;  %v1300_v43 = vadd.f32 %v3126_v36, %v1289_v39  ;;  %v1301_v44 = vadd.f32 %v3126_v36, %v1290_v40  ;;  %v2020_v36 = vld [vmem:[#allocation22 + $0x50] sm:$0xff]  ;;  %v2054_v37 = vld [vmem:[#allocation22 + $0x160] sm:$0xff]  ;;  %v2035_v38 = vld [vmem:[#allocation22 + $0xc8] sm:$0xff] }
 0x6f0   :  { %v2069_v39 = vld [vmem:[#allocation22 + $0x1d8] sm:$0xff]  ;;  %v2019_v40 = vld [vmem:[#allocation22 + $0x48] sm:$0xff] }
 0x6f1   :  { %v1306_v45 = vrot.slane %v1298_v41, 7  ;;  %v1307_v46 = vrot.slane %v1299_v42, 7  ;;  %v1309_v47 = vrot.slane %v1300_v43, 7  ;;  %v1310_v48 = vrot.slane %v1301_v44, 7  ;;  %v2053_v41 = vld [vmem:[#allocation22 + $0x158] sm:$0xff]  ;;  %v2034_v42 = vld [vmem:[#allocation22 + $0xc0] sm:$0xff] }
 0x6f2   :  { %v2068_v43 = vld [vmem:[#allocation22 + $0x1d0] sm:$0xff]  ;;  %v2018_v44 = vld [vmem:[#allocation22 + $0x40] sm:$0xff] }
 0x6f3   :  { %1318 = vst [vmem:[#allocation2] sm:$0xfe] %v1306_v45  ;;  %1320 = vst [vmem:[#allocation2 + $0x20] sm:$0x1] %v1307_v46  ;;  %v1308_v49 = vsel %vm677_vm2, %v1306_v45, %v1307_v46  ;;  %v1311_v63 = vsel %vm677_vm2, %v1309_v47, %v1310_v48  ;;  %v2052_v45 = vld [vmem:[#allocation22 + $0x150] sm:$0xff]  ;;  %v2033_v46 = vld [vmem:[#allocation22 + $0xb8] sm:$0xff] }
 0x6f4   :  { %1321 = vst [vmem:[#allocation2 + $0x30] sm:$0xfe] %v1309_v47  ;;  %1323 = vst [vmem:[#allocation2 + $0x50] sm:$0x1] %v1310_v48  ;;  %v1345_v51 = vrot.slane %v1308_v49, 1  ;;  %v1375_v53 = vrot.slane %v1308_v49, 2 }
 0x6f5   :  { %v1350_v8 = vrot.slane %v1311_v63, 1  ;;  %v1380_v12 = vrot.slane %v1311_v63, 2  ;;  %v2067_v47 = vld [vmem:[#allocation22 + $0x1c8] sm:$0xff]  ;;  %v2017_v48 = vld [vmem:[#allocation22 + $0x38] sm:$0xff] }
 0x6fa   :  { %v1332_v50 = vld [vmem:[#allocation2] sm:$0xfe]  ;;  %v1334_v56 = vld [vmem:[#allocation2 + $0x20] sm:$0x1] }
 0x6fb   :  { %v1362_v52 = vld [vmem:[#allocation2] sm:$0xfc]  ;;  %v1344_v54 = vrot.slane %v1332_v50, 1  ;;  %v1364_v57 = vld [vmem:[#allocation2 + $0x20] sm:$0x3]  ;;  %v1347_v58 = vrot.slane %v1334_v56, 1 }
 0x6fc   :  { %v1374_v55 = vrot.slane %v1362_v52, 2  ;;  %v1335_v59 = vld [vmem:[#allocation2 + $0x30] sm:$0xfe]  ;;  %v1377_v62 = vrot.slane %v1364_v57, 2  ;;  %v1324_v1 = vld [vmem:[#allocation2] sm:$0xff]  ;;  %v2015_v56 = vld [vmem:[#allocation22 + $0x28] sm:$0xff] }
 0x6fd   :  { %v1346_v60 = vsel %vm753_vm9, %v1344_v54, %v1345_v51  ;;  %v1365_v2 = vld [vmem:[#allocation2 + $0x30] sm:$0xfc]  ;;  %v1348_v3 = vsel %vm753_vm9, %v1345_v51, %v1347_v58  ;;  %v1349_v5 = vrot.slane %v1335_v59, 1  ;;  %v1337_v6 = vld [vmem:[#allocation2 + $0x50] sm:$0x1]  ;;  %v2032_v50 = vld [vmem:[#allocation22 + $0xb0] sm:$0xff] }
 0x6fe   :  { %v1376_v61 = vsel %vm793_vm10, %v1374_v55, %v1375_v53  ;;  %1576 = vmatprep.mubr.f32.mxu1 %v1346_v60  ;;  %v1378_v7 = vsel %vm793_vm10, %v1375_v53, %v1377_v62  ;;  %v1379_v9 = vrot.slane %v1365_v2, 2  ;;  %v1367_v10 = vld [vmem:[#allocation2 + $0x50] sm:$0x3]  ;;  %v1352_v13 = vrot.slane %v1337_v6, 1  ;;  %v2016_v52 = vld [vmem:[#allocation22 + $0x30] sm:$0xff]  ;;  %v2031_v54 = vld [vmem:[#allocation22 + $0xa8] sm:$0xff] }
 0x6ff   :  { %1666 = vmatmul.mubr.f32.vlgmr.msra.gmra.mxu0 %v1376_v61  ;;  %1577 = vmatmul.mubr.f32.vlgmr.msra.gmra.mxu1 %v1324_v1  ;;  %v1351_v11 = vsel %vm753_vm9, %v1349_v5, %v1350_v8  ;;  %v1382_v15 = vrot.slane %v1367_v10, 2  ;;  %v1326_v16 = vld [vmem:[#allocation2 + $0x30] sm:$0xff]  ;;  %v2065_v55 = vld [vmem:[#allocation22 + $0x1b8] sm:$0xff]  ;;  %v2064_v60 = vld [vmem:[#allocation22 + $0x1b0] sm:$0xff] }
 0x700   :  { %1671 = vmatprep.mubr.f32.mxu0 %v3499_v4  ;;  %1582 = vmatprep.mubr.f32.mxu1 %v1348_v3  ;;  %v1381_v14 = vsel %vm793_vm10, %v1379_v9, %v1380_v12  ;;  %v1353_v17 = vsel %vm753_vm9, %v1350_v8, %v1352_v13  ;;  %v2066_v51 = vld [vmem:[#allocation22 + $0x1c0] sm:$0xff]  ;;  %v2049_v57 = vld [vmem:[#allocation22 + $0x138] sm:$0xff]  ;;  %v2048_v62 = vld [vmem:[#allocation22 + $0x130] sm:$0xff] }
 0x701   :  { %v1383_v18 = vsel %vm793_vm10, %v1380_v12, %v1382_v15  ;;  %3159 = vmatpush3.msra.mxu1 %v2025_v20  ;;  %3203 = vmatpush3.msra.mxu0 %v2057_v25  ;;  %v2050_v53 = vld [vmem:[#allocation22 + $0x140] sm:$0xff]  ;;  %v2029_v61 = vld [vmem:[#allocation22 + $0x98] sm:$0xff]  ;;  %v2063_v1 = vld [vmem:[#allocation22 + $0x1a8] sm:$0xff]  ;;  %v1502_v20 = vlaneseq }
 0x702   :  { %3160 = vmatprep.subr.mxu1 %v2040_v21  ;;  %3204 = vmatprep.subr.mxu0 %v2072_v27  ;;  %v2030_v58 = vld [vmem:[#allocation22 + $0xa0] sm:$0xff]  ;;  %v2028_v2 = vld [vmem:[#allocation22 + $0x90] sm:$0xff]  ;;  %v2047_v3 = vld [vmem:[#allocation22 + $0x128] sm:$0xff] }
 0x703   :  { %1672 = vmatmul.mubr.f32.gmra.mxu0 %v1378_v7  ;;  %1583 = vmatmul.mubr.f32.gmra.mxu1 %v1308_v49  ;;  %v2051_v49 = vld [vmem:[#allocation22 + $0x148] sm:$0xff]  ;;  %v2014_v59 = vld [vmem:[#allocation22 + $0x20] sm:$0xff]  ;;  %v2061_v8 = vld [vmem:[#allocation22 + $0x198] sm:$0xff]  ;;  %v1503_v21 = vshrl.u32 %v1502_v20, 7 }
 0x704   :  { %1677 = vmatprep.mubr.f32.mxu0 %v3499_v4  ;;  %1588 = vmatprep.mubr.f32.mxu1 %v1351_v11  ;;  %v2062_v5 = vld [vmem:[#allocation22 + $0x1a0] sm:$0xff]  ;;  %v2027_v6 = vld [vmem:[#allocation22 + $0x88] sm:$0xff]  ;;  %v2045_v10 = vld [vmem:[#allocation22 + $0x118] sm:$0xff] }
 0x705   :  { %3161 = vmatpush3.msra.mxu1 %v2024_v22  ;;  %3205 = vmatpush3.msra.mxu0 %v2056_v29  ;;  %v2046_v7 = vld [vmem:[#allocation22 + $0x120] sm:$0xff]  ;;  %v2011_v9 = vld [vmem:[#allocation22 + $0x8] sm:$0xff]  ;;  %v2060_v12 = vld [vmem:[#allocation22 + $0x190] sm:$0xff]  ;;  %v4418_v22 = vsub.s32 0, %v1503_v21  ;;  %v4421_v0 = vsub.s32 1, %v1503_v21 }
 0x706   :  { %3162 = vmatprep.subr.mxu1 %v2039_v23  ;;  %3206 = vmatprep.subr.mxu0 %v2071_v31  ;;  %v2026_v11 = vld [vmem:[#allocation22 + $0x80] sm:$0xff]  ;;  %v2105_v15 = vld [vmem:[#allocation22 + $0x2f8] sm:$0xff]  ;;  %v1500_v23 = vld [vmem:[%s4696_s16] sm:$0x3] }
 0x707   :  { %1678 = vmatmul.mubr.f32.gmra.mxu0 %v1381_v14  ;;  %1589 = vmatmul.mubr.f32.gmra.mxu1 %v1326_v16  ;;  %v2010_v13 = vld [vmem:[#allocation22] sm:$0xff]  ;;  %v2044_v14 = vld [vmem:[#allocation22 + $0x110] sm:$0xff]  ;;  %v2059_v16 = vld [vmem:[#allocation22 + $0x188] sm:$0xff]  ;;  %v1505_v25 = vrot.slane %v1500_v23, %v4418_v22 }
 0x708   :  { %1683 = vmatprep.mubr.f32.mxu0 %v3499_v4  ;;  %1594 = vmatprep.mubr.f32.mxu1 %v1353_v17  ;;  %v2012_v4 = vld [vmem:[#allocation22 + $0x10] sm:$0xff]  ;;  %v2043_v17 = vld [vmem:[#allocation22 + $0x108] sm:$0xff] }
 0x709   :  { %3163 = vmatpush3.msra.mxu1 %v2023_v24  ;;  %3207 = vmatpush3.msra.mxu0 %v2055_v33 }
 0x70a   :  { %3164 = vmatprep.subr.mxu1 %v2038_v26  ;;  %3208 = vmatprep.subr.mxu0 %v2070_v35 }
 0x70b   :  { %1684 = vmatmul.mubr.f32.gmra.mxu0 %v1383_v18  ;;  %1595 = vmatmul.mubr.f32.gmra.mxu1 %v1311_v63  ;;  %v2013_v63 = vld [vmem:[#allocation22 + $0x18] sm:$0xff]  ;;  %v2058_v18 = vld [vmem:[#allocation22 + $0x180] sm:$0xff] }
 0x70c   :  { %3165 = vmatpush3.msra.mxu1 %v2022_v28  ;;  %3209 = vmatpush3.msra.mxu0 %v2054_v37  ;;  %v1509_v28 = vrot.slane %v1500_v23, %v4421_v0 }
 0x70d   :  { %3166 = vmatprep.subr.mxu1 %v2037_v30  ;;  %3210 = vmatprep.subr.mxu0 %v2069_v39 }
 0x70e   :  { %3167 = vmatpush3.msra.mxu1 %v2021_v32  ;;  %3211 = vmatpush3.msra.mxu0 %v2053_v41 }
 0x70f   :  { %3168 = vmatprep.subr.mxu1 %v2036_v34  ;;  %3212 = vmatprep.subr.mxu0 %v2068_v43 }
 0x710   :  { %3169 = vmatpush3.msra.mxu1 %v2020_v36  ;;  %3213 = vmatpush3.msra.mxu0 %v2052_v45 }
 0x711   :  { %3170 = vmatprep.subr.mxu1 %v2035_v38  ;;  %3214 = vmatprep.subr.mxu0 %v2067_v47 }
 0x712   :  { %3171 = vmatpush3.msra.mxu1 %v2019_v40  ;;  %3215 = vmatpush3.msra.mxu0 %v2051_v49 }
 0x713   :  { %3172 = vmatprep.subr.mxu1 %v2034_v42  ;;  %3216 = vmatprep.subr.mxu0 %v2066_v51 }
 0x714   :  { %3173 = vmatpush3.msra.mxu1 %v2018_v44  ;;  %3217 = vmatpush3.msra.mxu0 %v2050_v53 }
 0x715   :  { %3174 = vmatprep.subr.mxu1 %v2033_v46  ;;  %3218 = vmatprep.subr.mxu0 %v2065_v55 }
 0x716   :  { %3175 = vmatpush3.msra.mxu1 %v2017_v48  ;;  %3219 = vmatpush3.msra.mxu0 %v2049_v57 }
 0x717   :  { %3176 = vmatprep.subr.mxu1 %v2032_v50  ;;  %3220 = vmatprep.subr.mxu0 %v2064_v60 }
 0x718   :  { %3177 = vmatpush3.msra.mxu1 %v2016_v52  ;;  %3221 = vmatpush3.msra.mxu0 %v2048_v62 }
 0x719   :  { %3178 = vmatprep.subr.mxu1 %v2031_v54  ;;  %3222 = vmatprep.subr.mxu0 %v2063_v1 }
 0x71a   :  { %3179 = vmatpush3.msra.mxu1 %v2015_v56  ;;  %3223 = vmatpush3.msra.mxu0 %v2047_v3 }
 0x71b   :  { %3180 = vmatprep.subr.mxu1 %v2030_v58  ;;  %3224 = vmatprep.subr.mxu0 %v2062_v5 }
 0x71c   :  { %3181 = vmatpush3.msra.mxu1 %v2014_v59  ;;  %3225 = vmatpush3.msra.mxu0 %v2046_v7 }
 0x71d   :  { %3182 = vmatprep.subr.mxu1 %v2029_v61  ;;  %3226 = vmatprep.subr.mxu0 %v2061_v8 }
 0x71e   :  { %3183 = vmatpush3.msra.mxu1 %v2013_v63  ;;  %3227 = vmatpush3.msra.mxu0 %v2045_v10 }
 0x71f   :  { %3184 = vmatprep.subr.mxu1 %v2028_v2  ;;  %3228 = vmatprep.subr.mxu0 %v2060_v12 }
 0x720   :  { %3185 = vmatpush3.msra.mxu1 %v2012_v4  ;;  %3229 = vmatpush3.msra.mxu0 %v2044_v14 }
 0x721   :  { %3186 = vmatprep.subr.mxu1 %v2027_v6  ;;  %3230 = vmatprep.subr.mxu0 %v2059_v16 }
 0x722   :  { %3187 = vmatpush3.msra.mxu1 %v2011_v9  ;;  %3231 = vmatpush3.msra.mxu0 %v2043_v17 }
 0x723   :  { %3188 = vmatprep.subr.mxu1 %v2026_v11  ;;  %3232 = vmatprep.subr.mxu0 %v2058_v18 }
 0x724   :  { %3189 = vmatpush3.msra.mxu1 %v2010_v13  ;;  %3233 = vmatpush3.msra.mxu0 %v2042_v19 }
 0x725   :  { %3246 = vmatprep.subr.mxu1 %v2105_v15 }
 0x7bf   :  { %v1667_v24 = vpop.f32.mrf.mxu0  ;;  %v1578_v26 = vpop.f32.mrf.mxu1 }
 0x7c0   :  { %v1579_v31 = vadd.f32 %v1578_v26, %v1505_v25 }
 0x7c1   :  { %v1669_v27 = vpop.f32.mrf.mxu0  ;;  %v1580_v29 = vpop.f32.mrf.mxu1 }
 0x7c2   :  { %v1581_v35 = vadd.f32 %v1580_v29, %v1509_v28  ;;  %v1668_v40 = vadd.f32 %v1667_v24, %v1579_v31 }
 0x7c3   :  { %v1673_v30 = vpop.f32.mrf.mxu0  ;;  %v1584_v32 = vpop.f32.mrf.mxu1 }
 0x7c4   :  { %v1585_v33 = vadd.f32 %v1584_v32, %v1505_v25  ;;  %v1670_v45 = vadd.f32 %v1669_v27, %v1581_v35  ;;  %v1690_v50 = vmax.f32 %v1668_v40, 0.0 }
 0x7c5   :  { %v1675_v34 = vpop.f32.mrf.mxu0  ;;  %v1586_v36 = vpop.f32.mrf.mxu1 }
 0x7c6   :  { %v1674_v37 = vadd.f32 %v1673_v30, %v1585_v33  ;;  %v1587_v38 = vadd.f32 %v1586_v36, %v1509_v28  ;;  %v1691_v57 = vmax.f32 %v1670_v45, 0.0 }
 0x7c7   :  { %v1679_v39 = vpop.f32.mrf.mxu0  ;;  %v1590_v41 = vpop.f32.mrf.mxu1 }
 0x7c8   :  { %v1676_v42 = vadd.f32 %v1675_v34, %v1587_v38  ;;  %v1591_v43 = vadd.f32 %v1590_v41, %v1505_v25  ;;  %v1692_v47 = vmax.f32 %v1674_v37, 0.0 }
 0x7c9   :  { %v1681_v44 = vpop.f32.mrf.mxu0  ;;  %v1592_v46 = vpop.f32.mrf.mxu1 }
 0x7ca   :  { %v1680_v48 = vadd.f32 %v1679_v39, %v1591_v43  ;;  %v1593_v49 = vadd.f32 %v1592_v46, %v1509_v28  ;;  %v1693_v53 = vmax.f32 %v1676_v42, 0.0  ;;  %v1698_v59 = vadd.f32 %v1692_v47, %v1690_v50 }
 0x7cb   :  { %v1685_v51 = vpop.f32.mrf.mxu0  ;;  %v1596_v52 = vpop.f32.mrf.mxu1 }
 0x7cc   :  { %v1694_v54 = vmax.f32 %v1680_v48, 0.0  ;;  %v1682_v55 = vadd.f32 %v1681_v44, %v1593_v49  ;;  %v1597_v56 = vadd.f32 %v1596_v52, %v1505_v25  ;;  %v1707_v1 = vadd.f32 %v1693_v53, %v1691_v57 }
 0x7cd   :  { %v1598_v58 = vpop.f32.mrf.mxu1  ;;  %v1687_v63 = vpop.f32.mrf.mxu0 }
 0x7ce   :  { %v1695_v60 = vmax.f32 %v1682_v55, 0.0  ;;  %v1686_v61 = vadd.f32 %v1685_v51, %v1597_v56  ;;  %v1599_v62 = vadd.f32 %v1598_v58, %v1509_v28  ;;  %v1699_v2 = vadd.f32 %v1698_v59, %v1694_v54 }
 0x7d0   :  { %v1696_v3 = vmax.f32 %v1686_v61, 0.0  ;;  %v1688_v4 = vadd.f32 %v1687_v63, %v1599_v62  ;;  %v1708_v5 = vadd.f32 %v1707_v1, %v1695_v60  ;;  %v1766_v62 = vld [vmem:[#allocation19] sm:$0x3]  ;;  %v1786_v63 = vld [vmem:[#allocation21] sm:$0x3] }
 0x7d1   :  { %v1771_v1 = vrot.slane %v1766_v62, %v4418_v22 }
 0x7d2   :  { %v1700_v6 = vadd.f32 %v1699_v2, %v1696_v3  ;;  %v1697_v7 = vmax.f32 %v1688_v4, 0.0 }
 0x7d4   :  { %v1701_v8 = vrot.slane %v1700_v6, 4  ;;  %v1709_v9 = vadd.f32 %v1708_v5, %v1697_v7 }
 0x7d6   :  { %v1702_v10 = vadd.f32 %v1701_v8, %v1700_v6  ;;  %v1710_v11 = vrot.slane %v1709_v9, 4  ;;  %v1795_v8 = vrot.slane %v1786_v63, %v4421_v0 }
 0x7d8   :  { %v1703_v12 = vrot.slane %v1702_v10, 2  ;;  %v1711_v13 = vadd.f32 %v1710_v11, %v1709_v9  ;;  %v1775_v9 = vrot.slane %v1766_v62, %v4421_v0 }
 0x7da   :  { %v1704_v14 = vadd.f32 %v1703_v12, %v1702_v10  ;;  %v1712_v15 = vrot.slane %v1711_v13, 2 }
 0x7dc   :  { %v1705_v16 = vrot.slane %v1704_v14, 1  ;;  %v1713_v17 = vadd.f32 %v1712_v15, %v1711_v13 }
 0x7de   :  { %v1706_v18 = vadd.f32 %v1705_v16, %v1704_v14  ;;  %v1714_v19 = vrot.slane %v1713_v17, 1 }
 0x7e0   :  { %v1716_v20 = vmul.f32 0.03125, %v1706_v18  ;;  %v1715_v21 = vadd.f32 %v1714_v19, %v1713_v17 }
 0x7e2   :  { %v1718_v23 = vsub.f32 %v1690_v50, %v1716_v20  ;;  %v1720_v24 = vsub.f32 %v1692_v47, %v1716_v20  ;;  %v1722_v25 = vsub.f32 %v1694_v54, %v1716_v20  ;;  %v1717_v26 = vmul.f32 0.03125, %v1715_v21 }
 0x7e3   :  { %v1724_v27 = vsub.f32 %v1696_v3, %v1716_v20  ;;  %v1791_v3 = vrot.slane %v1786_v63, %v4418_v22 }
 0x7e4   :  { %v1726_v28 = vmul.f32 %v1718_v23, %v1718_v23  ;;  %v1728_v29 = vmul.f32 %v1720_v24, %v1720_v24  ;;  %v1719_v30 = vsub.f32 %v1691_v57, %v1717_v26  ;;  %v1721_v31 = vsub.f32 %v1693_v53, %v1717_v26 }
 0x7e5   :  { %v1723_v32 = vsub.f32 %v1695_v60, %v1717_v26  ;;  %v1730_v33 = vmul.f32 %v1722_v25, %v1722_v25  ;;  %v1725_v35 = vsub.f32 %v1697_v7, %v1717_v26  ;;  %v1732_v38 = vmul.f32 %v1724_v27, %v1724_v27 }
 0x7e6   :  { %v1734_v34 = vadd.f32 %v1728_v29, %v1726_v28  ;;  %v1727_v36 = vmul.f32 %v1719_v30, %v1719_v30  ;;  %v1729_v37 = vmul.f32 %v1721_v31, %v1721_v31 }
 0x7e7   :  { %v1731_v40 = vmul.f32 %v1723_v32, %v1723_v32  ;;  %v1733_v43 = vmul.f32 %v1725_v35, %v1725_v35 }
 0x7e8   :  { %v1735_v39 = vadd.f32 %v1734_v34, %v1730_v33  ;;  %v1743_v41 = vadd.f32 %v1729_v37, %v1727_v36 }
 0x7ea   :  { %v1736_v42 = vadd.f32 %v1735_v39, %v1732_v38  ;;  %v1744_v44 = vadd.f32 %v1743_v41, %v1731_v40 }
 0x7ec   :  { %v1737_v45 = vrot.slane %v1736_v42, 4  ;;  %v1745_v46 = vadd.f32 %v1744_v44, %v1733_v43  ;;  %v2089_v43 = vld [vmem:[#allocation22 + $0x278] sm:$0xff] }
 0x7ee   :  { %v1738_v47 = vadd.f32 %v1737_v45, %v1736_v42  ;;  %v1746_v48 = vrot.slane %v1745_v46, 4 }
 0x7f0   :  { %v1739_v49 = vrot.slane %v1738_v47, 2  ;;  %v1747_v50 = vadd.f32 %v1746_v48, %v1745_v46  ;;  %v2104_v48 = vld [vmem:[#allocation22 + $0x2f0] sm:$0xff] }
 0x7f2   :  { %v1740_v51 = vadd.f32 %v1739_v49, %v1738_v47  ;;  %v1748_v52 = vrot.slane %v1747_v50, 2 }
 0x7f4   :  { %v1741_v53 = vrot.slane %v1740_v51, 1  ;;  %v1749_v54 = vadd.f32 %v1748_v52, %v1747_v50 }
 0x7f6   :  { %v1742_v55 = vadd.f32 %v1741_v53, %v1740_v51  ;;  %v1750_v56 = vrot.slane %v1749_v54, 1 }
 0x7f8   :  { %v1752_v57 = vmul.f32 0.03125, %v1742_v55  ;;  %v1751_v58 = vadd.f32 %v1750_v56, %v1749_v54  ;;  %v2088_v56 = vld [vmem:[#allocation22 + $0x270] sm:$0xff] }
 0x7fa   :  { %v1754_v59 = vadd.f32 1e-05, %v1752_v57  ;;  %v1753_v60 = vmul.f32 0.03125, %v1751_v58 }
 0x7fc   :  { %3491 = vrsqrt.f32 %v1754_v59  ;;  %v1755_v61 = vadd.f32 1e-05, %v1753_v60 }
 0x7fe   :  { %3493 = vrsqrt.f32 %v1755_v61  ;;  %v2103_v61 = vld [vmem:[#allocation22 + $0x2e8] sm:$0xff] }
 0x809   :  { %v3492_v2 = vpop.eup %3491 }
 0x80a   :  { %v1758_v4 = vmul.f32 %v3492_v2, %v1718_v23  ;;  %v1760_v5 = vmul.f32 %v3492_v2, %v1720_v24  ;;  %v1762_v6 = vmul.f32 %v3492_v2, %v1722_v25  ;;  %v1764_v7 = vmul.f32 %v3492_v2, %v1724_v27  ;;  %v2087_v2 = vld [vmem:[#allocation22 + $0x268] sm:$0xff] }
 0x80b   :  { %v3494_v10 = vpop.eup %3493 }
 0x80c   :  { %v1778_v11 = vmul.f32 %v1771_v1, %v1758_v4  ;;  %v1780_v12 = vmul.f32 %v1771_v1, %v1760_v5  ;;  %v1782_v13 = vmul.f32 %v1771_v1, %v1762_v6  ;;  %v1784_v14 = vmul.f32 %v1771_v1, %v1764_v7 }
 0x80d   :  { %v1759_v15 = vmul.f32 %v3494_v10, %v1719_v30  ;;  %v1761_v16 = vmul.f32 %v3494_v10, %v1721_v31  ;;  %v1763_v17 = vmul.f32 %v3494_v10, %v1723_v32  ;;  %v1765_v18 = vmul.f32 %v3494_v10, %v1725_v35  ;;  %v2102_v10 = vld [vmem:[#allocation22 + $0x2e0] sm:$0xff] }
 0x80e   :  { %v1798_v19 = vadd.f32 %v1791_v3, %v1778_v11  ;;  %v1800_v20 = vadd.f32 %v1791_v3, %v1780_v12  ;;  %v1802_v22 = vadd.f32 %v1791_v3, %v1782_v13  ;;  %v1804_v21 = vadd.f32 %v1791_v3, %v1784_v14 }
 0x80f   :  { %v1779_v23 = vmul.f32 %v1775_v9, %v1759_v15  ;;  %v1781_v24 = vmul.f32 %v1775_v9, %v1761_v16  ;;  %v1783_v25 = vmul.f32 %v1775_v9, %v1763_v17  ;;  %v1785_v26 = vmul.f32 %v1775_v9, %v1765_v18 }
 0x810   :  { %v1814_v27 = vrot.slane %v1798_v19, 7  ;;  %v1816_v28 = vrot.slane %v1800_v20, 7  ;;  %v1820_v0 = vrot.slane %v1802_v22, 7  ;;  %v1822_v29 = vrot.slane %v1804_v21, 7 }
 0x811   :  { %v1799_v33 = vadd.f32 %v1795_v8, %v1779_v23  ;;  %v1801_v34 = vadd.f32 %v1795_v8, %v1781_v24  ;;  %v1803_v36 = vadd.f32 %v1795_v8, %v1783_v25  ;;  %v1805_v37 = vadd.f32 %v1795_v8, %v1785_v26 }
 0x812   :  { %v4430_v30 = vsel %vm677_vm2, %v1814_v27, %v1816_v28  ;;  %v4433_v31 = vsel %vm677_vm2, %v1820_v0, %v1822_v29  ;;  %1838 = vst [vmem:[#allocation3] sm:$0xfe] %v1814_v27  ;;  %1842 = vst [vmem:[#allocation3 + $0x20] sm:$0x1] %v1816_v28 }
 0x813   :  { %1844 = vst [vmem:[#allocation3 + $0x30] sm:$0xfe] %v1820_v0  ;;  %1848 = vst [vmem:[#allocation3 + $0x50] sm:$0x1] %v1822_v29  ;;  %v1815_v32 = vrot.slane %v1799_v33, 7  ;;  %v1818_v35 = vrot.slane %v1801_v34, 7 }
 0x814   :  { %1840 = vst [vmem:[#allocation3 + $0x10] sm:$0xff] %v4430_v30  ;;  %1846 = vst [vmem:[#allocation3 + $0x40] sm:$0xff] %v4433_v31  ;;  %v1821_v38 = vrot.slane %v1803_v36, 7  ;;  %v1824_v39 = vrot.slane %v1805_v37, 7  ;;  %v1891_v44 = vrot.slane %v4430_v30, 1  ;;  %v1951_v46 = vrot.slane %v4430_v30, 2 }
 0x815   :  { %v4438_v40 = vsel %vm677_vm2, %v1815_v32, %v1818_v35  ;;  %1839 = vst [vmem:[#allocation3 + $0x8] sm:$0xfe] %v1815_v32  ;;  %1843 = vst [vmem:[#allocation3 + $0x28] sm:$0x1] %v1818_v35  ;;  %v1961_v47 = vrot.slane %v4433_v31, 2  ;;  %v2086_v0 = vld [vmem:[#allocation22 + $0x260] sm:$0xff] }
 0x816   :  { %v4441_v41 = vsel %vm677_vm2, %v1821_v38, %v1824_v39  ;;  %1845 = vst [vmem:[#allocation3 + $0x38] sm:$0xfe] %v1821_v38  ;;  %1849 = vst [vmem:[#allocation3 + $0x58] sm:$0x1] %v1824_v39  ;;  %v1894_v49 = vrot.slane %v4438_v40, 1  ;;  %v1954_v52 = vrot.slane %v4438_v40, 2 }
 0x817   :  { %v1904_v51 = vrot.slane %v4441_v41, 1  ;;  %v1964_v59 = vrot.slane %v4441_v41, 2  ;;  %v2101_v37 = vld [vmem:[#allocation22 + $0x2d8] sm:$0xff] }
 0x818   :  { %v2085_v39 = vld [vmem:[#allocation22 + $0x258] sm:$0xff] }
 0x819   :  { %v1866_v42 = vld [vmem:[#allocation3] sm:$0xfe]  ;;  %v4444_v45 = vld [vmem:[#allocation3 + $0x20] sm:$0x1] }
 0x81a   :  { %v1890_v50 = vrot.slane %v1866_v42, 1  ;;  %v1926_v53 = vld [vmem:[#allocation3] sm:$0xfc]  ;;  %v1896_v63 = vrot.slane %v4444_v45, 1  ;;  %v1872_v11 = vld [vmem:[#allocation3 + $0x30] sm:$0xfe] }
 0x81b   :  { %v1850_v55 = vld [vmem:[#allocation3] sm:$0xff]  ;;  %v1950_v58 = vrot.slane %v1926_v53, 2  ;;  %v1932_v22 = vld [vmem:[#allocation3 + $0x30] sm:$0xfc]  ;;  %v1936_v27 = vld [vmem:[#allocation3 + $0x50] sm:$0x3] }
 0x81c   :  { %v1851_v54 = vld [vmem:[#allocation3 + $0x8] sm:$0xff]  ;;  %v1892_v9 = vsel %vm753_vm9, %v1890_v50, %v1891_v44  ;;  %v1930_v15 = vld [vmem:[#allocation3 + $0x20] sm:$0x3]  ;;  %v1960_v25 = vrot.slane %v1932_v22, 2  ;;  %v1966_v36 = vrot.slane %v1936_v27, 2  ;;  %v1897_v38 = vsel %vm753_vm9, %v1891_v44, %v1896_v63  ;;  %v1854_v45 = vld [vmem:[#allocation3 + $0x30] sm:$0xff] }
 0x81d   :  { %v1867_v57 = vld [vmem:[#allocation3 + $0x8] sm:$0xfe]  ;;  %2177 = vmatprep.mubr.f32.mxu1 %v1851_v54  ;;  %v1871_v62 = vld [vmem:[#allocation3 + $0x28] sm:$0x1]  ;;  %v1873_v1 = vld [vmem:[#allocation3 + $0x38] sm:$0xfe]  ;;  %v4454_v7 = vsel %vm793_vm10, %v1950_v58, %v1951_v46 }
 0x81e   :  { %v1893_v60 = vrot.slane %v1867_v57, 1  ;;  %2178 = vmatmul.mubr.f32.vlgmr.msra.gmra.mxu1 %v1850_v55  ;;  %v1898_v3 = vrot.slane %v1871_v62, 1  ;;  %v1903_v4 = vrot.slane %v1873_v1, 1  ;;  %v1877_v5 = vld [vmem:[#allocation3 + $0x58] sm:$0x1]  ;;  %v1956_v19 = vrot.slane %v1930_v15, 2 }
 0x81f   :  { %v1927_v6 = vld [vmem:[#allocation3 + $0x8] sm:$0xfc]  ;;  %3247 = vmatpush3.msra.mxu1 %v2089_v43  ;;  %2182 = vmatprep.mubr.f32.mxu1 %v4438_v40  ;;  %v1908_v12 = vrot.slane %v1877_v5, 1  ;;  %v1931_v14 = vld [vmem:[#allocation3 + $0x28] sm:$0x3]  ;;  %v1855_v28 = vld [vmem:[#allocation3 + $0x38] sm:$0xff]  ;;  %v4478_v35 = vsel %vm793_vm10, %v1960_v25, %v1961_v47  ;;  %v4489_v43 = vsel %vm793_vm10, %v1961_v47, %v1966_v36 }
 0x820   :  { %v1895_v8 = vsel %vm753_vm9, %v1893_v60, %v1894_v49  ;;  %v1953_v13 = vrot.slane %v1927_v6, 2  ;;  %3248 = vmatprep.subr.mxu1 %v2104_v48  ;;  %v1899_v16 = vsel %vm753_vm9, %v1894_v49, %v1898_v3  ;;  %v1905_v17 = vsel %vm753_vm9, %v1903_v4, %v1904_v51  ;;  %v1933_v20 = vld [vmem:[#allocation3 + $0x38] sm:$0xfc]  ;;  %v1937_v26 = vld [vmem:[#allocation3 + $0x58] sm:$0x3]  ;;  %v2082_v53 = vld [vmem:[#allocation22 + $0x240] sm:$0xff] }
 0x821   :  { %2262 = vmatprep.mubr.f32.mxu0 %v1895_v8  ;;  %v1958_v18 = vrot.slane %v1931_v14, 2  ;;  %3249 = vmatpush3.msra.mxu1 %v2088_v56  ;;  %v1909_v21 = vsel %vm753_vm9, %v1904_v51, %v1908_v12  ;;  %v1963_v24 = vrot.slane %v1933_v20, 2  ;;  %v4470_v33 = vsel %vm793_vm10, %v1951_v46, %v1956_v19  ;;  %v2100_v46 = vld [vmem:[#allocation22 + $0x2d0] sm:$0xff]  ;;  %v1876_v48 = vld [vmem:[#allocation3 + $0x50] sm:$0x1]  ;;  %v2099_v49 = vld [vmem:[#allocation22 + $0x2c8] sm:$0xff] }
 0x822   :  { %2263 = vmatmul.mubr.f32.vlgmr.msra.gmra.mxu0 %v1892_v9  ;;  %v1955_v23 = vsel %vm793_vm10, %v1953_v13, %v1954_v52  ;;  %3250 = vmatprep.subr.mxu1 %v2103_v61  ;;  %v1968_v34 = vrot.slane %v1937_v26, 2  ;;  %v1900_v40 = vrot.slane %v1872_v11, 1  ;;  %v1901_v44 = vrot.slane %v4433_v31, 1  ;;  %v2083_v47 = vld [vmem:[#allocation22 + $0x248] sm:$0xff]  ;;  %v2097_v54 = vld [vmem:[#allocation22 + $0x2b8] sm:$0xff]  ;;  %v2096_v56 = vld [vmem:[#allocation22 + $0x2b0] sm:$0xff] }
 0x823   :  { %2183 = vmatmul.mubr.f32.gmra.mxu1 %v4430_v30  ;;  %v4467_v29 = vsel %vm793_vm10, %v1954_v52, %v1958_v18  ;;  %v4473_v32 = vsel %vm793_vm10, %v1963_v24, %v1964_v59  ;;  %2267 = vmatprep.mubr.f32.mxu0 %v1899_v16  ;;  %v2084_v30 = vld [vmem:[#allocation22 + $0x250] sm:$0xff]  ;;  %v1906_v51 = vrot.slane %v1876_v48, 1  ;;  %v2098_v52 = vld [vmem:[#allocation22 + $0x2c0] sm:$0xff]  ;;  %v2081_v55 = vld [vmem:[#allocation22 + $0x238] sm:$0xff] }
 0x824   :  { %3251 = vmatpush3.msra.mxu1 %v2087_v2  ;;  %2187 = vmatprep.mubr.f32.mxu1 %v1855_v28  ;;  %v4484_v42 = vsel %vm793_vm10, %v1964_v59, %v1968_v34  ;;  %v1902_v50 = vsel %vm753_vm9, %v1900_v40, %v1901_v44  ;;  %v2080_v57 = vld [vmem:[#allocation22 + $0x230] sm:$0xff]  ;;  %v2095_v58 = vld [vmem:[#allocation22 + $0x2a8] sm:$0xff]  ;;  %v2078_v60 = vld [vmem:[#allocation22 + $0x220] sm:$0xff] }
 0x825   :  { %3252 = vmatprep.subr.mxu1 %v2102_v10  ;;  %v2079_v59 = vld [vmem:[#allocation22 + $0x228] sm:$0xff]  ;;  %v2093_v61 = vld [vmem:[#allocation22 + $0x298] sm:$0xff]  ;;  %v2092_v63 = vld [vmem:[#allocation22 + $0x290] sm:$0xff] }
 0x826   :  { %3253 = vmatpush3.msra.mxu1 %v2086_v0  ;;  %2268 = vmatmul.mubr.f32.gmra.mxu0 %v1897_v38  ;;  %v2077_v62 = vld [vmem:[#allocation22 + $0x218] sm:$0xff]  ;;  %v2076_v1 = vld [vmem:[#allocation22 + $0x210] sm:$0xff]  ;;  %v2091_v2 = vld [vmem:[#allocation22 + $0x288] sm:$0xff] }
 0x827   :  { %3254 = vmatprep.subr.mxu1 %v2101_v37  ;;  %2188 = vmatmul.mubr.f32.gmra.mxu1 %v1854_v45  ;;  %v2075_v3 = vld [vmem:[#allocation22 + $0x208] sm:$0xff]  ;;  %v2090_v4 = vld [vmem:[#allocation22 + $0x280] sm:$0xff]  ;;  %v2559_v12 = vld [vmem:[%s4697_s20 + $0xe8] sm:$0xff] }
 0x828   :  { %3255 = vmatpush3.msra.mxu1 %v2085_v39  ;;  %2192 = vmatprep.mubr.f32.mxu1 %v4441_v41  ;;  %v1907_v41 = vsel %vm753_vm9, %v1901_v44, %v1906_v51  ;;  %v2074_v5 = vld [vmem:[#allocation22 + $0x200] sm:$0xff]  ;;  %v2561_v6 = vld [vmem:[%s4697_s20 + $0xf8] sm:$0xff]  ;;  %v2575_v13 = vld [vmem:[%s4697_s20 + $0x168] sm:$0xff] }
 0x829   :  { %2272 = vmatprep.mubr.f32.mxu0 %v1905_v17  ;;  %3256 = vmatprep.subr.mxu1 %v2100_v46  ;;  %v2577_v8 = vld [vmem:[%s4697_s20 + $0x178] sm:$0xff]  ;;  %v2560_v9 = vld [vmem:[%s4697_s20 + $0xf0] sm:$0xff]  ;;  %v2543_v14 = vld [vmem:[%s4697_s20 + $0x68] sm:$0xff] }
 0x82a   :  { %3257 = vmatpush3.msra.mxu1 %v2084_v30  ;;  %2273 = vmatmul.mubr.f32.gmra.mxu0 %v1902_v50  ;;  %v2576_v10 = vld [vmem:[%s4697_s20 + $0x170] sm:$0xff]  ;;  %v2558_v15 = vld [vmem:[%s4697_s20 + $0xe0] sm:$0xff]  ;;  %v2557_v18 = vld [vmem:[%s4697_s20 + $0xd8] sm:$0xff] }
 0x82b   :  { %3258 = vmatprep.subr.mxu1 %v2099_v49  ;;  %2193 = vmatmul.mubr.f32.gmra.mxu1 %v4433_v31  ;;  %v2094_v31 = vld [vmem:[#allocation22 + $0x2a0] sm:$0xff]  ;;  %v2574_v16 = vld [vmem:[%s4697_s20 + $0x160] sm:$0xff]  ;;  %v2573_v19 = vld [vmem:[%s4697_s20 + $0x158] sm:$0xff] }
 0x82c   :  { %3259 = vmatpush3.msra.mxu1 %v2083_v47  ;;  %2277 = vmatprep.mubr.f32.mxu0 %v1909_v21  ;;  %v2544_v11 = vld [vmem:[%s4697_s20 + $0x70] sm:$0xff]  ;;  %v2542_v17 = vld [vmem:[%s4697_s20 + $0x60] sm:$0xff]  ;;  %v2541_v20 = vld [vmem:[%s4697_s20 + $0x58] sm:$0xff] }
 0x82d   :  { %3260 = vmatprep.subr.mxu1 %v2098_v52  ;;  %2347 = vmatprep.mubr.f32.mxu1 %v1955_v23  ;;  %v2556_v22 = vld [vmem:[%s4697_s20 + $0xd0] sm:$0xff]  ;;  %v2555_v24 = vld [vmem:[%s4697_s20 + $0xc8] sm:$0xff]  ;;  %v2554_v27 = vld [vmem:[%s4697_s20 + $0xc0] sm:$0xff] }
 0x82e   :  { %3261 = vmatpush3.msra.mxu1 %v2082_v53  ;;  %2278 = vmatmul.mubr.f32.gmra.mxu0 %v1907_v41  ;;  %v2572_v21 = vld [vmem:[%s4697_s20 + $0x150] sm:$0xff]  ;;  %v2571_v25 = vld [vmem:[%s4697_s20 + $0x148] sm:$0xff]  ;;  %v2570_v28 = vld [vmem:[%s4697_s20 + $0x140] sm:$0xff] }
 0x82f   :  { %3262 = vmatprep.subr.mxu1 %v2097_v54  ;;  %3290 = vmatprep.subr.mxu0 %v2561_v6  ;;  %v2540_v23 = vld [vmem:[%s4697_s20 + $0x50] sm:$0xff]  ;;  %v2539_v26 = vld [vmem:[%s4697_s20 + $0x48] sm:$0xff]  ;;  %v2538_v0 = vld [vmem:[%s4697_s20 + $0x40] sm:$0xff] }
 0x830   :  { %3263 = vmatpush3.msra.mxu1 %v2081_v55  ;;  %v2537_v34 = vld [vmem:[%s4697_s20 + $0x38] sm:$0xff]  ;;  %v2552_v36 = vld [vmem:[%s4697_s20 + $0xb0] sm:$0xff]  ;;  %v2567_v38 = vld [vmem:[%s4697_s20 + $0x128] sm:$0xff] }
 0x831   :  { %3264 = vmatprep.subr.mxu1 %v2096_v56  ;;  %v2568_v37 = vld [vmem:[%s4697_s20 + $0x130] sm:$0xff]  ;;  %v2535_v39 = vld [vmem:[%s4697_s20 + $0x28] sm:$0xff]  ;;  %v2550_v40 = vld [vmem:[%s4697_s20 + $0xa0] sm:$0xff] }
 0x832   :  { %3265 = vmatpush3.msra.mxu1 %v2080_v57  ;;  %v2549_v45 = vld [vmem:[%s4697_s20 + $0x98] sm:$0xff]  ;;  %v2548_v30 = vld [vmem:[%s4697_s20 + $0x90] sm:$0xff]  ;;  %v2547_v50 = vld [vmem:[%s4697_s20 + $0x88] sm:$0xff] }
 0x833   :  { %3266 = vmatprep.subr.mxu1 %v2095_v58  ;;  %v2565_v46 = vld [vmem:[%s4697_s20 + $0x118] sm:$0xff]  ;;  %v2564_v44 = vld [vmem:[%s4697_s20 + $0x110] sm:$0xff]  ;;  %v2563_v47 = vld [vmem:[%s4697_s20 + $0x108] sm:$0xff] }
 0x834   :  { %3267 = vmatpush3.msra.mxu1 %v2079_v59  ;;  %v2533_v48 = vld [vmem:[%s4697_s20 + $0x18] sm:$0xff]  ;;  %v2532_v49 = vld [vmem:[%s4697_s20 + $0x10] sm:$0xff]  ;;  %v2531_v51 = vld [vmem:[%s4697_s20 + $0x8] sm:$0xff] }
 0x835   :  { %3268 = vmatprep.subr.mxu1 %v2094_v31  ;;  %v2546_v53 = vld [vmem:[%s4697_s20 + $0x80] sm:$0xff]  ;;  %v4551_v56 = vld [vmem:[#allocation2 + $0x8] sm:$0xff] }
 0x836   :  { %3269 = vmatpush3.msra.mxu1 %v2078_v60  ;;  %v2562_v54 = vld [vmem:[%s4697_s20 + $0x100] sm:$0xff] }
 0x837   :  { %3270 = vmatprep.subr.mxu1 %v2093_v61  ;;  %v2530_v41 = vld [vmem:[%s4697_s20] sm:$0xff] }
 0x838   :  { %3271 = vmatpush3.msra.mxu1 %v2077_v62 }
 0x839   :  { %3272 = vmatprep.subr.mxu1 %v2092_v63 }
 0x83a   :  { %3273 = vmatpush3.msra.mxu1 %v2076_v1 }
 0x83b   :  { %3274 = vmatprep.subr.mxu1 %v2091_v2 }
 0x83c   :  { %3275 = vmatpush3.msra.mxu1 %v2075_v3 }
 0x83d   :  { %3276 = vmatprep.subr.mxu1 %v2090_v4 }
 0x83e   :  { %3277 = vmatpush3.msra.mxu1 %v2074_v5 }
 0x83f   :  { %2348 = vmatmul.mubr.f32.vlgmr.msra.gmra.mxu1 %v4454_v7  ;;  %3389 = vmatprep.subr.mxu1 %v2577_v8  ;;  %v2545_v7 = vld [vmem:[%s4697_s20 + $0x78] sm:$0xff] }
 0x840   :  { %2352 = vmatprep.mubr.f32.mxu1 %v4467_v29  ;;  %3291 = vmatpush3.msra.mxu0 %v2545_v7  ;;  %v2553_v29 = vld [vmem:[%s4697_s20 + $0xb8] sm:$0xff]  ;;  %v3127_v7 = vld [vmem:[#allocation24] ss:$0 sm:$0xff] }
 0x841   :  { %3390 = vmatpush3.msra.mxu1 %v2577_v8  ;;  %3292 = vmatprep.subr.mxu0 %v2560_v9 }
 0x842   :  { %3391 = vmatprep.subr.mxu1 %v2576_v10  ;;  %3293 = vmatpush3.msra.mxu0 %v2544_v11 }
 0x843   :  { %2353 = vmatmul.mubr.f32.gmra.mxu1 %v4470_v33  ;;  %3294 = vmatprep.subr.mxu0 %v2559_v12  ;;  %v2569_v33 = vld [vmem:[%s4697_s20 + $0x138] sm:$0xff] }
 0x844   :  { %2357 = vmatprep.mubr.f32.mxu1 %v4473_v32  ;;  %3392 = vmatpush3.msra.mxu1 %v2576_v10  ;;  %v2536_v32 = vld [vmem:[%s4697_s20 + $0x30] sm:$0xff] }
 0x845   :  { %3393 = vmatprep.subr.mxu1 %v2575_v13  ;;  %3295 = vmatpush3.msra.mxu0 %v2543_v14 }
 0x846   :  { %3394 = vmatpush3.msra.mxu1 %v2575_v13  ;;  %3296 = vmatprep.subr.mxu0 %v2558_v15 }
 0x847   :  { %2358 = vmatmul.mubr.f32.gmra.mxu1 %v4478_v35  ;;  %3395 = vmatprep.subr.mxu1 %v2574_v16  ;;  %v2551_v35 = vld [vmem:[%s4697_s20 + $0xa8] sm:$0xff] }
 0x848   :  { %2362 = vmatprep.mubr.f32.mxu1 %v4484_v42  ;;  %3297 = vmatpush3.msra.mxu0 %v2542_v17  ;;  %v2566_v42 = vld [vmem:[%s4697_s20 + $0x120] sm:$0xff] }
 0x849   :  { %3396 = vmatpush3.msra.mxu1 %v2574_v16  ;;  %3298 = vmatprep.subr.mxu0 %v2557_v18 }
 0x84a   :  { %3397 = vmatprep.subr.mxu1 %v2573_v19  ;;  %3299 = vmatpush3.msra.mxu0 %v2541_v20 }
 0x84b   :  { %2363 = vmatmul.mubr.f32.gmra.mxu1 %v4489_v43  ;;  %3300 = vmatprep.subr.mxu0 %v2556_v22  ;;  %v2534_v43 = vld [vmem:[%s4697_s20 + $0x20] sm:$0xff] }
 0x84c   :  { %3398 = vmatpush3.msra.mxu1 %v2573_v19  ;;  %3301 = vmatpush3.msra.mxu0 %v2540_v23 }
 0x84d   :  { %3399 = vmatprep.subr.mxu1 %v2572_v21  ;;  %3302 = vmatprep.subr.mxu0 %v2555_v24 }
 0x84e   :  { %3400 = vmatpush3.msra.mxu1 %v2572_v21  ;;  %3303 = vmatpush3.msra.mxu0 %v2539_v26 }
 0x84f   :  { %3401 = vmatprep.subr.mxu1 %v2571_v25  ;;  %3304 = vmatprep.subr.mxu0 %v2554_v27 }
 0x850   :  { %3402 = vmatpush3.msra.mxu1 %v2571_v25  ;;  %3305 = vmatpush3.msra.mxu0 %v2538_v0 }
 0x851   :  { %3403 = vmatprep.subr.mxu1 %v2570_v28  ;;  %3306 = vmatprep.subr.mxu0 %v2553_v29 }
 0x852   :  { %3404 = vmatpush3.msra.mxu1 %v2570_v28  ;;  %3307 = vmatpush3.msra.mxu0 %v2537_v34 }
 0x853   :  { %3405 = vmatprep.subr.mxu1 %v2569_v33  ;;  %3308 = vmatprep.subr.mxu0 %v2552_v36 }
 0x854   :  { %3406 = vmatpush3.msra.mxu1 %v2569_v33  ;;  %3309 = vmatpush3.msra.mxu0 %v2536_v32 }
 0x855   :  { %3407 = vmatprep.subr.mxu1 %v2568_v37  ;;  %3310 = vmatprep.subr.mxu0 %v2551_v35 }
 0x856   :  { %3408 = vmatpush3.msra.mxu1 %v2568_v37  ;;  %3311 = vmatpush3.msra.mxu0 %v2535_v39 }
 0x857   :  { %3409 = vmatprep.subr.mxu1 %v2567_v38  ;;  %3312 = vmatprep.subr.mxu0 %v2550_v40 }
 0x858   :  { %3410 = vmatpush3.msra.mxu1 %v2567_v38  ;;  %3313 = vmatpush3.msra.mxu0 %v2534_v43 }
 0x859   :  { %3411 = vmatprep.subr.mxu1 %v2566_v42  ;;  %3314 = vmatprep.subr.mxu0 %v2549_v45 }
 0x85a   :  { %3412 = vmatpush3.msra.mxu1 %v2566_v42  ;;  %3315 = vmatpush3.msra.mxu0 %v2533_v48 }
 0x85b   :  { %3413 = vmatprep.subr.mxu1 %v2565_v46  ;;  %3316 = vmatprep.subr.mxu0 %v2548_v30 }
 0x85c   :  { %3414 = vmatpush3.msra.mxu1 %v2565_v46  ;;  %3317 = vmatpush3.msra.mxu0 %v2532_v49 }
 0x85d   :  { %3415 = vmatprep.subr.mxu1 %v2564_v44  ;;  %3318 = vmatprep.subr.mxu0 %v2547_v50 }
 0x85e   :  { %3416 = vmatpush3.msra.mxu1 %v2564_v44  ;;  %3319 = vmatpush3.msra.mxu0 %v2531_v51 }
 0x85f   :  { %3417 = vmatprep.subr.mxu1 %v2563_v47  ;;  %3320 = vmatprep.subr.mxu0 %v2546_v53 }
 0x860   :  { %3418 = vmatpush3.msra.mxu1 %v2563_v47  ;;  %3321 = vmatpush3.msra.mxu0 %v2530_v41 }
 0x861   :  { %3419 = vmatprep.subr.mxu1 %v2562_v54  ;;  %2972 = vmatprep.subr.mxu0 %v4551_v56 }
 0x862   :  { %3420 = vmatpush3.msra.mxu1 %v2562_v54 }
 0x8de   :  { %v3190_v52 = vpop.f32.mrf.mxu1 }
 0x8e0   :  { %v3191_v55 = vpop.f32.mrf.mxu1 }
 0x8e1   :  { %v3192_v8 = vadd.f32 %v3191_v55, %v3190_v52 }
 0x8e2   :  { %v3234_v58 = vpop.f32.mrf.mxu0 }
 0x8e3   :  { %v3193_v57 = vpop.f32.mrf.mxu1  ;;  %v2180_v15 = vadd.f32 %v3192_v8, %v3127_v7 }
 0x8e4   :  { %v3235_v31 = vpop.f32.mrf.mxu0 }
 0x8e5   :  { %v3194_v59 = vpop.f32.mrf.mxu1  ;;  %v3236_v16 = vadd.f32 %v3235_v31, %v3234_v58 }
 0x8e6   :  { %v3237_v61 = vpop.f32.mrf.mxu0  ;;  %v3195_v4 = vadd.f32 %v3194_v59, %v3193_v57 }
 0x8e7   :  { %v3196_v60 = vpop.f32.mrf.mxu1  ;;  %v2265_v26 = vadd.f32 %v3236_v16, %v2180_v15  ;;  %v3129_v16 = vld [vmem:[#allocation27] ss:$0 sm:$0xff] }
 0x8e8   :  { %v3238_v63 = vpop.f32.mrf.mxu0  ;;  %v2185_v11 = vadd.f32 %v3195_v4, %v3127_v7 }
 0x8e9   :  { %v3197_v62 = vpop.f32.mrf.mxu1  ;;  %v3239_v12 = vadd.f32 %v3238_v63, %v3237_v61 }
 0x8ea   :  { %v3240_v2 = vpop.f32.mrf.mxu0  ;;  %v3198_v9 = vadd.f32 %v3197_v62, %v3196_v60 }
 0x8eb   :  { %v3199_v1 = vpop.f32.mrf.mxu1  ;;  %v2270_v20 = vadd.f32 %v3239_v12, %v2185_v11  ;;  %v3128_v11 = vld [vmem:[#allocation25] ss:$0 sm:$0xff] }
 0x8ec   :  { %v3241_v5 = vpop.f32.mrf.mxu0  ;;  %v2190_v17 = vadd.f32 %v3198_v9, %v3127_v7 }
 0x8ed   :  { %v3200_v3 = vpop.f32.mrf.mxu1  ;;  %v3242_v18 = vadd.f32 %v3241_v5, %v3240_v2 }
 0x8ee   :  { %v3243_v13 = vpop.f32.mrf.mxu0  ;;  %v3201_v22 = vadd.f32 %v3200_v3, %v3199_v1 }
 0x8ef   :  { %v2275_v28 = vadd.f32 %v3242_v18, %v2190_v17 }
 0x8f0   :  { %v3244_v24 = vpop.f32.mrf.mxu0  ;;  %v2195_v29 = vadd.f32 %v3201_v22, %v3127_v7 }
 0x8f1   :  { %v3245_v33 = vadd.f32 %v3244_v24, %v3243_v13 }
 0x8f3   :  { %v2280_v39 = vadd.f32 %v3245_v33, %v2195_v29 }
 0x8ff   :  { %v3278_v6 = vpop.f32.mrf.mxu1 }
 0x901   :  { %v3279_v10 = vpop.f32.mrf.mxu1 }
 0x902   :  { %v3280_v21 = vadd.f32 %v3279_v10, %v3278_v6 }
 0x903   :  { %v3281_v14 = vpop.f32.mrf.mxu1 }
 0x904   :  { %v2350_v34 = vadd.f32 %v3280_v21, %v2265_v26 }
 0x905   :  { %v3282_v19 = vpop.f32.mrf.mxu1 }
 0x906   :  { %v3283_v23 = vadd.f32 %v3282_v19, %v3281_v14  ;;  %v2368_v40 = vmax.f32 %v2350_v34, 0.0 }
 0x907   :  { %v3284_v25 = vpop.f32.mrf.mxu1 }
 0x908   :  { %v2355_v27 = vadd.f32 %v3283_v23, %v2270_v20 }
 0x909   :  { %v3285_v0 = vpop.f32.mrf.mxu1 }
 0x90a   :  { %v3286_v36 = vadd.f32 %v3285_v0, %v3284_v25  ;;  %v2369_v32 = vmax.f32 %v2355_v27, 0.0 }
 0x90b   :  { %v3287_v37 = vpop.f32.mrf.mxu1 }
 0x90c   :  { %v2360_v35 = vadd.f32 %v3286_v36, %v2275_v28  ;;  %v2372_v45 = vadd.f32 %v2369_v32, %v2368_v40 }
 0x90d   :  { %v3288_v38 = vpop.f32.mrf.mxu1 }
 0x90e   :  { %v2370_v42 = vmax.f32 %v2360_v35, 0.0  ;;  %v3289_v43 = vadd.f32 %v3288_v38, %v3287_v37 }
 0x910   :  { %v2365_v46 = vadd.f32 %v3289_v43, %v2280_v39  ;;  %v2373_v48 = vadd.f32 %v2372_v45, %v2370_v42 }
 0x912   :  { %v2371_v30 = vmax.f32 %v2365_v46, 0.0 }
 0x914   :  { %v2374_v44 = vadd.f32 %v2373_v48, %v2371_v30 }
 0x916   :  { %v2375_v49 = vrot.slane %v2374_v44, 4 }
 0x918   :  { %v2376_v50 = vadd.f32 %v2375_v49, %v2374_v44 }
 0x91a   :  { %v2377_v47 = vrot.slane %v2376_v50, 2 }
 0x91c   :  { %v2378_v51 = vadd.f32 %v2377_v47, %v2376_v50 }
 0x91e   :  { %v2379_v52 = vrot.slane %v2378_v51, 1 }
 0x920   :  { %v2380_v53 = vadd.f32 %v2379_v52, %v2378_v51 }
 0x922   :  { %v2381_v54 = vmul.f32 0.03125, %v2380_v53 }
 0x924   :  { %v2382_v41 = vsub.f32 %v2368_v40, %v2381_v54  ;;  %v2383_v55 = vsub.f32 %v2369_v32, %v2381_v54  ;;  %v2384_v57 = vsub.f32 %v2370_v42, %v2381_v54  ;;  %v2385_v58 = vsub.f32 %v2371_v30, %v2381_v54 }
 0x926   :  { %v2386_v59 = vmul.f32 %v2382_v41, %v2382_v41  ;;  %v2387_v31 = vmul.f32 %v2383_v55, %v2383_v55  ;;  %v2388_v60 = vmul.f32 %v2384_v57, %v2384_v57  ;;  %v2389_v62 = vmul.f32 %v2385_v58, %v2385_v58 }
 0x928   :  { %v2390_v61 = vadd.f32 %v2387_v31, %v2386_v59 }
 0x92a   :  { %v2391_v63 = vadd.f32 %v2390_v61, %v2388_v60  ;;  %v2944_v61 = vld [vmem:[%s4107_s25 + $0x78] sm:$0xff] }
 0x92c   :  { %v2392_v1 = vadd.f32 %v2391_v63, %v2389_v62  ;;  %v2943_v62 = vld [vmem:[%s4107_s25 + $0x70] sm:$0xff]  ;;  %v2942_v63 = vld [vmem:[%s4107_s25 + $0x68] sm:$0xff] }
 0x92e   :  { %v2393_v2 = vrot.slane %v2392_v1, 4 }
 0x930   :  { %v2394_v3 = vadd.f32 %v2393_v2, %v2392_v1  ;;  %v2941_v1 = vld [vmem:[%s4107_s25 + $0x60] sm:$0xff]  ;;  %v2940_v2 = vld [vmem:[%s4107_s25 + $0x58] sm:$0xff] }
 0x932   :  { %v2395_v4 = vrot.slane %v2394_v3, 2 }
 0x934   :  { %v2396_v5 = vadd.f32 %v2395_v4, %v2394_v3  ;;  %v2939_v3 = vld [vmem:[%s4107_s25 + $0x50] sm:$0xff]  ;;  %v2938_v4 = vld [vmem:[%s4107_s25 + $0x48] sm:$0xff] }
 0x936   :  { %v2397_v6 = vrot.slane %v2396_v5, 1 }
 0x938   :  { %v2398_v8 = vadd.f32 %v2397_v6, %v2396_v5  ;;  %v2937_v5 = vld [vmem:[%s4107_s25 + $0x40] sm:$0xff]  ;;  %v2936_v6 = vld [vmem:[%s4107_s25 + $0x38] sm:$0xff] }
 0x93a   :  { %v2399_v7 = vmul.f32 0.03125, %v2398_v8  ;;  %v2935_v8 = vld [vmem:[%s4107_s25 + $0x30] sm:$0xff] }
 0x93c   :  { %v2400_v9 = vadd.f32 1e-05, %v2399_v7 }
 0x93e   :  { %3495 = vrsqrt.f32 %v2400_v9  ;;  %v2934_v9 = vld [vmem:[%s4107_s25 + $0x28] sm:$0xff] }
 0x94b   :  { %v3496_v10 = vpop.eup %3495 }
 0x94c   :  { %v2402_v12 = vmul.f32 %v3496_v10, %v2382_v41  ;;  %v2403_v13 = vmul.f32 %v3496_v10, %v2383_v55  ;;  %v2404_v14 = vmul.f32 %v3496_v10, %v2384_v57  ;;  %v2405_v15 = vmul.f32 %v3496_v10, %v2385_v58 }
 0x94e   :  { %v2413_v17 = vmul.f32 %v3128_v11, %v2402_v12  ;;  %v2414_v18 = vmul.f32 %v3128_v11, %v2403_v13  ;;  %v2415_v19 = vmul.f32 %v3128_v11, %v2404_v14  ;;  %v2416_v20 = vmul.f32 %v3128_v11, %v2405_v15  ;;  %v2933_v12 = vld [vmem:[%s4107_s25 + $0x20] sm:$0xff]  ;;  %v3130_v14 = vld [vmem:[#allocation28] ss:$0 sm:$0xff] }
 0x950   :  { %v2424_v22 = vadd.f32 %v3129_v16, %v2413_v17  ;;  %v2425_v21 = vadd.f32 %v3129_v16, %v2414_v18  ;;  %v2426_v23 = vadd.f32 %v3129_v16, %v2415_v19  ;;  %v2427_v24 = vadd.f32 %v3129_v16, %v2416_v20  ;;  %v2932_v16 = vld [vmem:[%s4107_s25 + $0x18] sm:$0xff]  ;;  %v2931_v19 = vld [vmem:[%s4107_s25 + $0x10] sm:$0xff] }
 0x952   :  { %v2432_v25 = vrot.slane %v2424_v22, 7  ;;  %v2433_v26 = vrot.slane %v2425_v21, 7  ;;  %v2435_v27 = vrot.slane %v2426_v23, 7  ;;  %v2436_v28 = vrot.slane %v2427_v24, 7  ;;  %v2930_v23 = vld [vmem:[%s4107_s25 + $0x8] sm:$0xff] }
 0x954   :  { %v2434_v0 = vsel %vm677_vm2, %v2432_v25, %v2433_v26  ;;  %v2437_v29 = vsel %vm677_vm2, %v2435_v27, %v2436_v28  ;;  %2444 = vst [vmem:[#allocation2] sm:$0xfe] %v2432_v25  ;;  %2446 = vst [vmem:[#allocation2 + $0x20] sm:$0x1] %v2433_v26 }
 0x955   :  { %2447 = vst [vmem:[#allocation2 + $0x30] sm:$0xfe] %v2435_v27  ;;  %2449 = vst [vmem:[#allocation2 + $0x50] sm:$0x1] %v2436_v28  ;;  %v2471_v33 = vrot.slane %v2434_v0, 1  ;;  %v2501_v34 = vrot.slane %v2434_v0, 2 }
 0x956   :  { %2445 = vst [vmem:[#allocation2 + $0x10] sm:$0xff] %v2434_v0  ;;  %2448 = vst [vmem:[#allocation2 + $0x40] sm:$0xff] %v2437_v29  ;;  %v2506_v35 = vrot.slane %v2437_v29, 2  ;;  %v2476_v41 = vrot.slane %v2437_v29, 1  ;;  %v2929_v27 = vld [vmem:[%s4107_s25] sm:$0xff] }
 0x957   :  { %2455 = vst [vmem:[#allocation4 + $0x30] sm:$0xff] %v2434_v0  ;;  %2457 = vst [vmem:[#allocation4 + $0x90] sm:$0xff] %v2437_v29 }
 0x95b   :  { %v2458_v36 = vld [vmem:[#allocation2] sm:$0xfe]  ;;  %v2460_v42 = vld [vmem:[#allocation2 + $0x20] sm:$0x1] }
 0x95c   :  { %v2488_v37 = vld [vmem:[#allocation2] sm:$0xfc]  ;;  %v2470_v38 = vrot.slane %v2458_v36, 1  ;;  %v2490_v40 = vld [vmem:[#allocation2 + $0x20] sm:$0x3]  ;;  %v2473_v45 = vrot.slane %v2460_v42, 1 }
 0x95d   :  { %v2450_v32 = vld [vmem:[#allocation2] sm:$0xff]  ;;  %v2500_v39 = vrot.slane %v2488_v37, 2  ;;  %v2503_v43 = vrot.slane %v2490_v40, 2  ;;  %v2491_v46 = vld [vmem:[#allocation2 + $0x30] sm:$0xfc] }
 0x95e   :  { %2454 = vst [vmem:[#allocation4] sm:$0xff] %v2450_v32  ;;  %v2493_v48 = vld [vmem:[#allocation2 + $0x50] sm:$0x3]  ;;  %v2472_v30 = vsel %vm753_vm9, %v2470_v38, %v2471_v33  ;;  %v2505_v49 = vrot.slane %v2491_v46, 2  ;;  %v2474_v53 = vsel %vm753_vm9, %v2471_v33, %v2473_v45 }
 0x95f   :  { %v2502_v44 = vsel %vm793_vm10, %v2500_v39, %v2501_v34  ;;  %v2508_v50 = vrot.slane %v2493_v48, 2  ;;  %v2461_v47 = vld [vmem:[#allocation2 + $0x30] sm:$0xfe]  ;;  %2484 = vst [vmem:[#allocation4 + $0x8] sm:$0xff] %v2472_v30  ;;  %2649 = vmatprep.mubr.f32.mxu0 %v2472_v30  ;;  %v2504_v52 = vsel %vm793_vm10, %v2501_v34, %v2503_v43  ;;  %v2463_v55 = vld [vmem:[#allocation2 + $0x50] sm:$0x1] }
 0x960   :  { %v2452_v51 = vld [vmem:[#allocation2 + $0x30] sm:$0xff]  ;;  %3421 = vmatprep.mubr.f32.mxu1 %v2502_v44  ;;  %v2475_v54 = vrot.slane %v2461_v47, 1  ;;  %2650 = vmatmul.mubr.f32.vlgmr.msra.gmra.mxu0 %v2450_v32  ;;  %2485 = vst [vmem:[#allocation4 + $0x38] sm:$0xff] %v2474_v53  ;;  %v2507_v57 = vsel %vm793_vm10, %v2505_v49, %v2506_v35  ;;  %v2478_v59 = vrot.slane %v2463_v55, 1  ;;  %v2952_v34 = vld [vmem:[%s4107_s25 + $0xb8] sm:$0xff]  ;;  %v2950_v43 = vld [vmem:[%s4107_s25 + $0xa8] sm:$0xff] }
 0x961   :  { %2456 = vst [vmem:[#allocation4 + $0x60] sm:$0xff] %v2452_v51  ;;  %3422 = vmatmul.mubr.f32.vlgmr.msra.gmra.mxu1 %v2504_v52  ;;  %v2509_v58 = vsel %vm793_vm10, %v2506_v35, %v2508_v50  ;;  %2654 = vmatprep.mubr.f32.mxu0 %v2474_v53  ;;  %v2951_v38 = vld [vmem:[%s4107_s25 + $0xb0] sm:$0xff]  ;;  %v2949_v30 = vld [vmem:[%s4107_s25 + $0xa0] sm:$0xff] }
 0x962   :  { %3424 = vmatprep.mubr.f32.mxu1 %v2507_v57  ;;  %v2477_v31 = vsel %vm753_vm9, %v2475_v54, %v2476_v41  ;;  %v2479_v60 = vsel %vm753_vm9, %v2476_v41, %v2478_v59  ;;  %2973 = vmatpush1.msra.mxu0 %v2944_v61 }
 0x963   :  { %2486 = vst [vmem:[#allocation4 + $0x68] sm:$0xff] %v2477_v31  ;;  %2487 = vst [vmem:[#allocation4 + $0x98] sm:$0xff] %v2479_v60  ;;  %2974 = vmatprep.subr.mxu0 %v4551_v56 }
 0x964   :  { %2655 = vmatmul.mubr.f32.gmra.mxu0 %v2434_v0 }
 0x965   :  { %3425 = vmatmul.mubr.f32.gmra.mxu1 %v2509_v58  ;;  %2659 = vmatprep.mubr.f32.mxu0 %v2477_v31 }
 0x966   :  { %2975 = vmatpush1.msra.mxu0 %v2943_v62 }
 0x967   :  { %2976 = vmatprep.subr.mxu0 %v4551_v56 }
 0x968   :  { %2660 = vmatmul.mubr.f32.gmra.mxu0 %v2452_v51 }
 0x969   :  { %2664 = vmatprep.mubr.f32.mxu0 %v2479_v60  ;;  %2977 = vmatpush1.msra.mxu0 %v2942_v63 }
 0x96a   :  { %2978 = vmatprep.subr.mxu0 %v4551_v56 }
 0x96b   :  { %2979 = vmatpush1.msra.mxu0 %v2941_v1 }
 0x96c   :  { %2665 = vmatmul.mubr.f32.gmra.mxu0 %v2437_v29  ;;  %2980 = vmatprep.subr.mxu0 %v4551_v56 }
 0x96d   :  { %2981 = vmatpush1.msra.mxu0 %v2940_v2 }
 0x96e   :  { %2982 = vmatprep.subr.mxu0 %v4551_v56 }
 0x96f   :  { %2983 = vmatpush1.msra.mxu0 %v2939_v3 }
 0x970   :  { %2984 = vmatprep.subr.mxu0 %v4551_v56 }
 0x971   :  { %2985 = vmatpush1.msra.mxu0 %v2938_v4 }
 0x972   :  { %2986 = vmatprep.subr.mxu0 %v4551_v56 }
 0x973   :  { %2987 = vmatpush1.msra.mxu0 %v2937_v5 }
 0x974   :  { %2988 = vmatprep.subr.mxu0 %v4551_v56 }
 0x975   :  { %2989 = vmatpush1.msra.mxu0 %v2936_v6 }
 0x976   :  { %2990 = vmatprep.subr.mxu0 %v4551_v56 }
 0x977   :  { %2991 = vmatpush1.msra.mxu0 %v2935_v8 }
 0x978   :  { %2992 = vmatprep.subr.mxu0 %v4551_v56 }
 0x979   :  { %2993 = vmatpush1.msra.mxu0 %v2934_v9 }
 0x97a   :  { %2994 = vmatprep.subr.mxu0 %v4551_v56 }
 0x97b   :  { %2995 = vmatpush1.msra.mxu0 %v2933_v12 }
 0x97c   :  { %2996 = vmatprep.subr.mxu0 %v4551_v56 }
 0x97d   :  { %2997 = vmatpush1.msra.mxu0 %v2932_v16 }
 0x97e   :  { %2998 = vmatprep.subr.mxu0 %v4551_v56 }
 0x97f   :  { %2999 = vmatpush1.msra.mxu0 %v2931_v19 }
 0x980   :  { %3000 = vmatprep.subr.mxu0 %v4551_v56 }
 0x981   :  { %3001 = vmatpush1.msra.mxu0 %v2930_v23 }
 0x982   :  { %3002 = vmatprep.subr.mxu0 %v4551_v56 }
 0x983   :  { %3003 = vmatpush1.msra.mxu0 %v2929_v27  ;;  %v3132_v27 = vld [vmem:[#allocation31] ss:$0 sm:$0xff] }
 0x984   :  { %3020 = vmatprep.subr.mxu0 %v4551_v56 }
 0x985   :  { %3021 = vmatpush2.msra.mxu0 %v2952_v34 }
 0x986   :  { %3022 = vmatprep.subr.mxu0 %v4551_v56 }
 0x987   :  { %3023 = vmatpush2.msra.mxu0 %v2951_v38 }
 0x988   :  { %3024 = vmatprep.subr.mxu0 %v4551_v56 }
 0x989   :  { %3025 = vmatpush2.msra.mxu0 %v2950_v43  ;;  %v2947_v43 = vld [vmem:[%s4107_s25 + $0x90] sm:$0xff] }
 0x98a   :  { %3026 = vmatprep.subr.mxu0 %v4551_v56 }
 0x98b   :  { %3027 = vmatpush2.msra.mxu0 %v2949_v30  ;;  %v2945_v30 = vld [vmem:[%s4107_s25 + $0x80] sm:$0xff] }
 0x98c   :  { %3028 = vmatprep.subr.mxu0 %v4551_v56 }
 0xa20   :  { %v3322_v7 = vpop.f32.mrf.mxu0 }
 0xa21   :  { %v3423_v10 = vpop.f32.mrf.mxu1 }
 0xa22   :  { %v3323_v11 = vpop.f32.mrf.mxu0 }
 0xa23   :  { %v3324_v13 = vadd.f32 %v3323_v11, %v3322_v7  ;;  %v2736_v17 = vpop.f32.mrf.mxu1 }
 0xa24   :  { %v3325_v15 = vpop.f32.mrf.mxu0 }
 0xa25   :  { %v2652_v20 = vadd.f32 %v3324_v13, %v3130_v14  ;;  %v3426_v25 = vpop.f32.mrf.mxu1 }
 0xa26   :  { %v3326_v18 = vpop.f32.mrf.mxu0 }
 0xa27   :  { %v3327_v22 = vadd.f32 %v3326_v18, %v3325_v15  ;;  %v2737_v28 = vadd.f32 %v2736_v17, %v2652_v20  ;;  %v2746_v32 = vpop.f32.mrf.mxu1 }
 0xa28   :  { %v3328_v21 = vpop.f32.mrf.mxu0 }
 0xa29   :  { %v2657_v24 = vadd.f32 %v3327_v22, %v3130_v14  ;;  %v2755_v39 = vmax.f32 %v2737_v28, 0.0 }
 0xa2a   :  { %v3329_v26 = vpop.f32.mrf.mxu0 }
 0xa2b   :  { %v2742_v0 = vadd.f32 %v3423_v10, %v2657_v24  ;;  %v3330_v29 = vadd.f32 %v3329_v26, %v3328_v21  ;;  %v2759_v44 = vsel %vm939_vm14, %v2755_v39, 0.0  ;;  %v3131_v21 = vld [vmem:[#allocation30] ss:$0 sm:$0xff] }
 0xa2c   :  { %v3331_v33 = vpop.f32.mrf.mxu0 }
 0xa2d   :  { %v2756_v36 = vmax.f32 %v2742_v0, 0.0  ;;  %v2662_v37 = vadd.f32 %v3330_v29, %v3130_v14 }
 0xa2e   :  { %v3332_v35 = vpop.f32.mrf.mxu0 }
 0xa2f   :  { %v2747_v40 = vadd.f32 %v2746_v32, %v2662_v37  ;;  %v3333_v42 = vadd.f32 %v3332_v35, %v3331_v33  ;;  %v2760_v45 = vsel %vm939_vm14, %v2756_v36, 0.0 }
 0xa30   :  { %v2761_v47 = vadd.f32 %v2760_v45, %v2759_v44 }
 0xa31   :  { %v2757_v46 = vmax.f32 %v2747_v40, 0.0  ;;  %v2667_v48 = vadd.f32 %v3333_v42, %v3130_v14  ;;  %v2948_v42 = vld [vmem:[%s4107_s25 + $0x98] sm:$0xff] }
 0xa32   :  { %3029 = vmatpush2.msra.mxu0 %v2948_v42 }
 0xa33   :  { %v2762_v49 = vsel %vm939_vm14, %v2757_v46, 0.0  ;;  %v2752_v50 = vadd.f32 %v3426_v25, %v2667_v48  ;;  %3030 = vmatprep.subr.mxu0 %v4551_v56  ;;  %v2946_v48 = vld [vmem:[%s4107_s25 + $0x88] sm:$0xff] }
 0xa34   :  { %v2763_v52 = vadd.f32 %v2762_v49, %v2761_v47  ;;  %3031 = vmatpush2.msra.mxu0 %v2947_v43 }
 0xa35   :  { %v2758_v51 = vmax.f32 %v2752_v50, 0.0  ;;  %3032 = vmatprep.subr.mxu0 %v4551_v56 }
 0xa36   :  { %3033 = vmatpush2.msra.mxu0 %v2946_v48 }
 0xa37   :  { %v2764_v53 = vsel %vm939_vm14, %v2758_v51, 0.0  ;;  %3034 = vmatprep.subr.mxu0 %v4551_v56 }
 0xa38   :  { %v2765_v54 = vadd.f32 %v2764_v53, %v2763_v52  ;;  %3035 = vmatpush2.msra.mxu0 %v2945_v30 }
 0xa3a   :  { %v2766_v41 = vrot.slane %v2765_v54, 4 }
 0xa3c   :  { %v2767_v55 = vadd.f32 %v2766_v41, %v2765_v54 }
 0xa3e   :  { %v2768_v57 = vrot.slane %v2767_v55, 2 }
 0xa40   :  { %v2769_v58 = vadd.f32 %v2768_v57, %v2767_v55 }
 0xa42   :  { %v2770_v59 = vrot.slane %v2769_v58, 1 }
 0xa44   :  { %v2771_v31 = vadd.f32 %v2770_v59, %v2769_v58 }
 0xa46   :  { %v2772_v60 = vmul.f32 0.03125, %v2771_v31 }
 0xa48   :  { %v2773_v61 = vsub.f32 %v2755_v39, %v2772_v60  ;;  %v2774_v62 = vsub.f32 %v2756_v36, %v2772_v60  ;;  %v2775_v63 = vsub.f32 %v2757_v46, %v2772_v60  ;;  %v2776_v1 = vsub.f32 %v2758_v51, %v2772_v60 }
 0xa4a   :  { %v2777_v2 = vmul.f32 %v2773_v61, %v2773_v61  ;;  %v2778_v3 = vmul.f32 %v2774_v62, %v2774_v62  ;;  %v2779_v4 = vmul.f32 %v2775_v63, %v2775_v63  ;;  %v2780_v5 = vmul.f32 %v2776_v1, %v2776_v1 }
 0xa4c   :  { %v2781_v6 = vsel %vm939_vm14, %v2777_v2, 0.0  ;;  %v2782_v8 = vsel %vm939_vm14, %v2778_v3, 0.0  ;;  %v2784_v9 = vsel %vm939_vm14, %v2779_v4, 0.0  ;;  %v2786_v11 = vsel %vm939_vm14, %v2780_v5, 0.0 }
 0xa4d   :  { %v2783_v7 = vadd.f32 %v2782_v8, %v2781_v6 }
 0xa4f   :  { %v2785_v10 = vadd.f32 %v2784_v9, %v2783_v7 }
 0xa51   :  { %v2787_v12 = vadd.f32 %v2786_v11, %v2785_v10 }
 0xa53   :  { %v2788_v13 = vrot.slane %v2787_v12, 4 }
 0xa55   :  { %v2789_v14 = vadd.f32 %v2788_v13, %v2787_v12 }
 0xa57   :  { %v2790_v15 = vrot.slane %v2789_v14, 2 }
 0xa59   :  { %v2791_v16 = vadd.f32 %v2790_v15, %v2789_v14 }
 0xa5b   :  { %v2792_v17 = vrot.slane %v2791_v16, 1 }
 0xa5d   :  { %v2793_v18 = vadd.f32 %v2792_v17, %v2791_v16 }
 0xa5f   :  { %v2794_v19 = vmul.f32 0.03125, %v2793_v18 }
 0xa61   :  { %v2795_v20 = vadd.f32 1e-05, %v2794_v19 }
 0xa63   :  { %3497 = vrsqrt.f32 %v2795_v20 }
 0xa70   :  { %v3498_v22 = vpop.eup %3497 }
 0xa71   :  { %v2797_v23 = vmul.f32 %v3498_v22, %v2773_v61  ;;  %v2798_v24 = vmul.f32 %v3498_v22, %v2774_v62  ;;  %v2799_v25 = vmul.f32 %v3498_v22, %v2775_v63  ;;  %v2800_v26 = vmul.f32 %v3498_v22, %v2776_v1 }
 0xa73   :  { %v2808_v28 = vmul.f32 %v3131_v21, %v2797_v23  ;;  %v2809_v0 = vmul.f32 %v3131_v21, %v2798_v24  ;;  %v2810_v29 = vmul.f32 %v3131_v21, %v2799_v25  ;;  %v2811_v33 = vmul.f32 %v3131_v21, %v2800_v26  ;;  %v3133_v26 = vld [vmem:[#allocation33] ss:$0 sm:$0xff] }
 0xa75   :  { %v2819_v34 = vadd.f32 %v3132_v27, %v2808_v28  ;;  %v2820_v36 = vadd.f32 %v3132_v27, %v2809_v0  ;;  %v2821_v37 = vadd.f32 %v3132_v27, %v2810_v29  ;;  %v2822_v32 = vadd.f32 %v3132_v27, %v2811_v33 }
 0xa77   :  { %v2827_v35 = vrot.slane %v2819_v34, 7  ;;  %v2828_v38 = vrot.slane %v2820_v36, 7  ;;  %v2830_v39 = vrot.slane %v2821_v37, 7  ;;  %v2831_v40 = vrot.slane %v2822_v32, 7 }
 0xa79   :  { %v2829_v45 = vsel %vm677_vm2, %v2827_v35, %v2828_v38  ;;  %v2832_v46 = vsel %vm677_vm2, %v2830_v39, %v2831_v40  ;;  %2839 = vst.msk [vmem:[#allocation3] sm:$0xfe] %vm1021_vm15, %v2827_v35  ;;  %2842 = vst.msk [vmem:[#allocation3 + $0x30] sm:$0xfe] %vm1021_vm15, %v2830_v39 }
 0xa7a   :  { %2841 = vst.msk [vmem:[#allocation3 + $0x20] sm:$0x1] %vm1024_vm0, %v2828_v38  ;;  %2844 = vst.msk [vmem:[#allocation3 + $0x50] sm:$0x1] %vm1024_vm0, %v2831_v40 }
 0xa7b   :  { %2840 = vst.msk [vmem:[#allocation3 + $0x10] sm:$0xff] %vm939_vm14, %v2829_v45  ;;  %2843 = vst.msk [vmem:[#allocation3 + $0x40] sm:$0xff] %vm939_vm14, %v2832_v46 }
 0xa80   :  { %v2853_v49 = vld [vmem:[#allocation3] sm:$0xfe]  ;;  %v2856_v57 = vld [vmem:[#allocation3 + $0x30] sm:$0xfe] }
 0xa81   :  { %v2855_v44 = vld [vmem:[#allocation3 + $0x20] sm:$0x1]  ;;  %v2858_v50 = vld [vmem:[#allocation3 + $0x50] sm:$0x1]  ;;  %v2865_v52 = vrot.slane %v2853_v49, 1  ;;  %v2870_v1 = vrot.slane %v2856_v57, 1 }
 0xa82   :  { %v2854_v47 = vld [vmem:[#allocation3 + $0x10] sm:$0xff]  ;;  %v2868_v51 = vrot.slane %v2855_v44, 1  ;;  %v2857_v53 = vld [vmem:[#allocation3 + $0x40] sm:$0xff]  ;;  %v2873_v55 = vrot.slane %v2858_v50, 1 }
 0xa83   :  { %v2845_v54 = vld [vmem:[#allocation3] sm:$0xff]  ;;  %v2866_v41 = vrot.slane %v2854_v47, 1  ;;  %2850 = vst.msk [vmem:[#allocation4 + $0x30] sm:$0xff] %vm939_vm14, %v2854_v47  ;;  %2852 = vst.msk [vmem:[#allocation4 + $0x90] sm:$0xff] %vm939_vm14, %v2857_v53  ;;  %v2871_v56 = vrot.slane %v2857_v53, 1  ;;  %v2904_v31 = vrot.slane %v2854_v47, 2 }
 0xa84   :  { %v2891_v58 = vld [vmem:[#allocation3] sm:$0xfc]  ;;  %2849 = vst.msk [vmem:[#allocation4] sm:$0xff] %vm939_vm14, %v2845_v54  ;;  %v2847_v60 = vld [vmem:[#allocation3 + $0x30] sm:$0xff]  ;;  %v2893_v61 = vld [vmem:[#allocation3 + $0x20] sm:$0x3] }
 0xa85   :  { %v2903_v59 = vrot.slane %v2891_v58, 2  ;;  %v2869_v62 = vsel %vm753_vm9, %v2866_v41, %v2868_v51  ;;  %v2867_v63 = vsel %vm753_vm9, %v2865_v52, %v2866_v41  ;;  %2851 = vst.msk [vmem:[#allocation4 + $0x60] sm:$0xff] %vm939_vm14, %v2847_v60  ;;  %v2906_v2 = vrot.slane %v2893_v61, 2  ;;  %v2894_v3 = vld [vmem:[#allocation3 + $0x30] sm:$0xfc] }
 0xa86   :  { %v2896_v4 = vld [vmem:[#allocation3 + $0x50] sm:$0x3]  ;;  %2877 = vrot.lane.b32.xlu1 %v2869_v62, %s3958_s29  ;;  %2875 = vrot.lane.b32.xlu0 %v2867_v63, %s3958_s29  ;;  %v2908_v6 = vrot.slane %v2894_v3, 2  ;;  %v2909_v8 = vrot.slane %v2857_v53, 2  ;;  %v2874_v11 = vsel %vm753_vm9, %v2871_v56, %v2873_v55  ;;  %v2872_v12 = vsel %vm753_vm9, %v2870_v1, %v2871_v56 }
 0xa87   :  { %v2905_v5 = vsel %vm793_vm10, %v2903_v59, %v2904_v31  ;;  %v2907_v7 = vsel %vm793_vm10, %v2904_v31, %v2906_v2  ;;  %v2911_v9 = vrot.slane %v2896_v4, 2 }
 0xa88   :  { %2917 = vst.msk [vmem:[#allocation4 + $0x8] sm:$0xff] %vm939_vm14, %v2905_v5  ;;  %2918 = vst.msk [vmem:[#allocation4 + $0x38] sm:$0xff] %vm939_vm14, %v2907_v7  ;;  %v2910_v10 = vsel %vm793_vm10, %v2908_v6, %v2909_v8 }
 0xa89   :  { %2919 = vst.msk [vmem:[#allocation4 + $0x68] sm:$0xff] %vm939_vm14, %v2910_v10  ;;  %v2912_v13 = vsel %vm793_vm10, %v2909_v8, %v2911_v9 }
 0xa8a   :  { %2881 = vrot.lane.b32.xlu1 %v2874_v11, %s3958_s29  ;;  %2879 = vrot.lane.b32.xlu0 %v2872_v12, %s3958_s29  ;;  %2920 = vst.msk [vmem:[#allocation4 + $0x98] sm:$0xff] %vm939_vm14, %v2912_v13 }
 0xa8f   :  { %v2922_v14 = vld [vmem:[#allocation4 + $0x8] sm:$0xff]  ;;  %v2924_v20 = vld [vmem:[#allocation4 + $0x38] sm:$0xff] }
 0xa90   :  { %3134 = vmatprep.mubr.msk.f32.mxu0 %vm939_vm14, %v2922_v14  ;;  %v2926_v21 = vld [vmem:[#allocation4 + $0x68] sm:$0xff] }
 0xa91   :  { %v2928_v24 = vld [vmem:[#allocation4 + $0x98] sm:$0xff] }
 0xaf8   :  { %v2878_v15 = vpop.permute.xlu1 %2877  ;;  %v2876_v16 = vpop.permute.xlu0 %2875 }
 0xaf9   :  { %2888 = vst.msk [vmem:[#allocation4 + $0x30] sm:$0xff] %vm1071_vm1, %v2878_v15  ;;  %2887 = vst.msk [vmem:[#allocation4] sm:$0xff] %vm1071_vm1, %v2876_v16 }
 0xafc   :  { %v2882_v17 = vpop.permute.xlu1 %2881  ;;  %v2880_v18 = vpop.permute.xlu0 %2879 }
 0xafd   :  { %2890 = vst.msk [vmem:[#allocation4 + $0x90] sm:$0xff] %vm1071_vm1, %v2882_v17  ;;  %2889 = vst.msk [vmem:[#allocation4 + $0x60] sm:$0xff] %vm1071_vm1, %v2880_v18 }
 0xb00   :  { %v2921_v19 = vld [vmem:[#allocation4] sm:$0xff]  ;;  %v2923_v22 = vld [vmem:[#allocation4 + $0x30] sm:$0xff] }
 0xb01   :  { %3037 = vmatmul.mubr.f32.vlgmr.msra.gmra.mxu0 %v2921_v19 }
 0xb02   :  { %3135 = vmatprep.mubr.msk.f32.mxu0 %vm939_vm14, %v2924_v20 }
 0xb04   :  { %v2925_v23 = vld [vmem:[#allocation4 + $0x60] sm:$0xff]  ;;  %v2927_v25 = vld [vmem:[#allocation4 + $0x90] sm:$0xff] }
 0xb05   :  { %3042 = vmatmul.mubr.f32.gmra.mxu0 %v2923_v22 }
 0xb06   :  { %3136 = vmatprep.mubr.msk.f32.mxu0 %vm939_vm14, %v2926_v21 }
 0xb09   :  { %3047 = vmatmul.mubr.f32.gmra.mxu0 %v2925_v23 }
 0xb0a   :  { %3137 = vmatprep.mubr.msk.f32.mxu0 %vm939_vm14, %v2928_v24 }
 0xb0d   :  { %3052 = vmatmul.mubr.f32.gmra.mxu0 %v2927_v25 }
 0xbc1   :  { %v3038_v27 = vpop.f32.mrf.mxu0 }
 0xbc2   :  { %v3039_v28 = vadd.f32 %v3133_v26, %v3038_v27 }
 0xbc3   :  { %v3040_v0 = vpop.f32.mrf.mxu0 }
 0xbc4   :  { %3057 = vst.msk [vmem:[%s4117_s17] sm:$0xff] %vm692_vm3, %v3039_v28 }
 0xbc5   :  { %v3043_v29 = vpop.f32.mrf.mxu0 }
 0xbc6   :  { %v3044_v33 = vadd.f32 %v3133_v26, %v3043_v29 }
 0xbc7   :  { %v3045_v34 = vpop.f32.mrf.mxu0 }
 0xbc8   :  { %3058 = vst.msk [vmem:[%s4117_s17 + $0x8] sm:$0xff] %vm692_vm3, %v3044_v33 }
 0xbc9   :  { %v3048_v36 = vpop.f32.mrf.mxu0 }
 0xbca   :  { %v3049_v37 = vadd.f32 %v3133_v26, %v3048_v36 }
 0xbcb   :  { %v3050_v32 = vpop.f32.mrf.mxu0 }
 0xbcc   :  { %3059 = vst.msk [vmem:[%s4117_s17 + $0x10] sm:$0xff] %vm692_vm3, %v3049_v37 }
 0xbcd   :  { %v3053_v35 = vpop.f32.mrf.mxu0 }
 0xbce   :  { %v3054_v38 = vadd.f32 %v3133_v26, %v3053_v35 }
 0xbcf   :  { %v3055_v39 = vpop.f32.mrf.mxu0 }
 0xbd0   :  { %3060 = vst.msk [vmem:[%s4117_s17 + $0x18] sm:$0xff] %vm692_vm3, %v3054_v38 }
 0xbd1   :  { %3065 = vsyncpa [#allocation6], 1 }
 0xbd2   :  { %3066 = vsyncpa [#allocation8], 1 }
 0xbd3   :  { %3067 = vsyncpa [#allocation11], 1 }
 0xbd4   :  { %3068 = vsyncpa [#allocation14], 1 }
 0xbd5   :  { %3069 = vsyncpa [#allocation17], 1 }
 0xbd6   :  { %3070 = vsyncpa [#allocation20], 1 }
 0xbd7   :  { %3071 = vsyncpa [#allocation23], 1 }
 0xbd8   :  { %3072 = vsyncpa [#allocation26], 1 }
 0xbd9   :  { %3073 = vsyncpa [#allocation29], 1 }
 0xbda   :  { %3074 = vsyncpa [#allocation32], 1 }

</bundles_post_ra>
